<compile_context>
chip_gen: v6e
topology: v6e:2x2x1
jax: 0.10.0
libtpu: 0.0.40
codegen_flags: <defaults>
</compile_context>

<pallas_src>
import functools

import jax
import jax.numpy as jnp
import numpy as np
from jax.experimental import pallas as pl
from jax.experimental.pallas import tpu as pltpu

_VMEM_LIMIT = 32 * 1024 * 1024


# ---------------------------------------------------------------------------
# helpers
# ---------------------------------------------------------------------------
def _round_up(x, m):
    return ((x + m - 1) // m) * m


def _pad_axis(x, axis, new_size):
    pad = new_size - x.shape[axis]
    if pad == 0:
        return x
    widths = [(0, 0)] * x.ndim
    widths[axis] = (0, pad)
    return jnp.pad(x, widths)


def _choose_tile_m(m):
    # Biggest lane/MXU friendly tile that fits comfortably in VMEM on all gens.
    return min(512, _round_up(m, 128))


def _im2col(x_nhwc, k, pad):
    """x: (N, H, W, C) -> patches (N*Ho*Wo, k*k*C) in (ky, kx, c) order."""
    x_p = jnp.pad(x_nhwc, ((0, 0), (pad, pad), (pad, pad), (0, 0)))
    n, hp, wp, c = x_p.shape
    ho, wo = hp - k + 1, wp - k + 1
    cols = []
    for ky in range(k):
        for kx in range(k):
            cols.append(x_p[:, ky:ky + ho, kx:kx + wo, :])
    patches = jnp.stack(cols, axis=-2)           # (N, Ho, Wo, k*k, C)
    return patches.reshape(n * ho * wo, k * k * c), (n, ho, wo)


# ---------------------------------------------------------------------------
# Pallas kernels
# ---------------------------------------------------------------------------
def _conv12_fused_kernel(p_ref, w1_ref, b1_ref, w2_ref, b2_ref, o_ref):
    # conv1: (tile_m, K1) @ (K1, 128) on MXU, f32 accumulate, bias + ReLU
    acc1 = jnp.dot(p_ref[...], w1_ref[...], preferred_element_type=jnp.float32)
    acc1 = jnp.maximum(acc1 + b1_ref[...], 0.0)
    # Dropout(0.2): identity (eval mode).
    # conv2 (1x1): fused epilogue, W2 resident in VMEM; intermediate never hits HBM
    acc2 = jnp.dot(acc1.astype(jnp.bfloat16), w2_ref[...],
                   preferred_element_type=jnp.float32)
    acc2 = jnp.maximum(acc2 + b2_ref[...], 0.0)
    o_ref[...] = acc2.astype(o_ref.dtype)


def _matmul_bias_kernel(p_ref, w_ref, b_ref, o_ref, *, apply_relu):
    acc = jnp.dot(p_ref[...], w_ref[...], preferred_element_type=jnp.float32)
    acc = acc + b_ref[...]
    if apply_relu:
        acc = jnp.maximum(acc, 0.0)
    o_ref[...] = acc.astype(o_ref.dtype)


# ---------------------------------------------------------------------------
# pallas_call wrappers (tiled over M, weights/bias resident across the grid)
# ---------------------------------------------------------------------------
def fused_conv1_conv2(patches, w1, b1, w2, b2):
    """patches (M, K1) bf16, w1 (K1, C1) bf16, w2 (C1, C2) bf16, b f32.
    Returns (M, C2) f32 = relu(relu(patches @ w1 + b1) @ w2 + b2)."""
    m, k1 = patches.shape
    c1 = w1.shape[1]
    c2 = w2.shape[1]
    tile_m = _choose_tile_m(m)
    m_pad = _round_up(m, tile_m)
    patches = _pad_axis(patches, 0, m_pad)
    grid = (m_pad // tile_m,)
    cost = pl.CostEstimate(
        flops=2 * m_pad * k1 * c1 + 2 * m_pad * c1 * c2,
        transcendentals=0,
        bytes_accessed=(m_pad * k1 * 2 + k1 * c1 * 2 + c1 * c2 * 2
                        + (c1 + c2) * 4 + m_pad * c2 * 4),
    )
    out = pl.pallas_call(
        _conv12_fused_kernel,
        out_shape=jax.ShapeDtypeStruct((m_pad, c2), jnp.float32),
        grid_spec=pltpu.PrefetchScalarGridSpec(
            num_scalar_prefetch=0,
            grid=grid,
            in_specs=[
                pl.BlockSpec((tile_m, k1), lambda i: (i, 0)),
                pl.BlockSpec((k1, c1), lambda i: (0, 0)),
                pl.BlockSpec((1, c1), lambda i: (0, 0)),
                pl.BlockSpec((c1, c2), lambda i: (0, 0)),
                pl.BlockSpec((1, c2), lambda i: (0, 0)),
            ],
            out_specs=pl.BlockSpec((tile_m, c2), lambda i: (i, 0)),
        ),
        compiler_params=pltpu.CompilerParams(
            dimension_semantics=("parallel",),
            vmem_limit_bytes=_VMEM_LIMIT),
        cost_estimate=cost,
    )(patches, w1, b1.reshape(1, c1).astype(jnp.float32),
      w2, b2.reshape(1, c2).astype(jnp.float32))
    return out[:m]


def matmul_bias(patches, w, b, apply_relu):
    """patches (M, K) bf16, w (K, N) bf16, b (N,) f32 -> (M, N) f32."""
    m, k = patches.shape
    n = w.shape[1]
    tile_m = _choose_tile_m(m)
    m_pad = _round_up(m, tile_m)
    patches = _pad_axis(patches, 0, m_pad)
    grid = (m_pad // tile_m,)
    kernel = functools.partial(_matmul_bias_kernel, apply_relu=apply_relu)
    cost = pl.CostEstimate(
        flops=2 * m_pad * k * n,
        transcendentals=0,
        bytes_accessed=m_pad * k * 2 + k * n * 2 + n * 4 + m_pad * n * 4,
    )
    out = pl.pallas_call(
        kernel,
        out_shape=jax.ShapeDtypeStruct((m_pad, n), jnp.float32),
        grid_spec=pltpu.PrefetchScalarGridSpec(
            num_scalar_prefetch=0,
            grid=grid,
            in_specs=[
                pl.BlockSpec((tile_m, k), lambda i: (i, 0)),
                pl.BlockSpec((k, n), lambda i: (0, 0)),
                pl.BlockSpec((1, n), lambda i: (0, 0)),
            ],
            out_specs=pl.BlockSpec((tile_m, n), lambda i: (i, 0)),
        ),
        compiler_params=pltpu.CompilerParams(
            dimension_semantics=("parallel",),
            vmem_limit_bytes=_VMEM_LIMIT),
        cost_estimate=cost,
    )(patches, w, b.reshape(1, n).astype(jnp.float32))
    return out[:m]


# ---------------------------------------------------------------------------
# SRCNN1 forward (eval mode)
# ---------------------------------------------------------------------------
_PADS = (2, 2, 2)  # padding of conv1, conv2, conv3 (fixed by the module)


def init_srcnn1_params(key):
    """Deterministic init; weight layout (k, k, Cin, Cout), bias (Cout,)."""
    defs = [(9, 3, 128), (1, 128, 64), (5, 64, 3)]
    params = []
    for i, (k, cin, cout) in enumerate(defs):
        kw, kb = jax.random.split(jax.random.fold_in(key, i))
        bound = 1.0 / np.sqrt(k * k * cin)
        w = jax.random.uniform(kw, (k, k, cin, cout), jnp.float32, -bound, bound)
        b = jax.random.uniform(kb, (cout,), jnp.float32, -bound, bound)
        params.append((w, b))
    return params


@jax.jit
def srcnn1_forward(x_nchw, params):
    (w1, b1), (w2, b2), (w3, b3) = params
    p1, p2, p3 = _PADS
    x = jnp.transpose(x_nchw, (0, 2, 3, 1)).astype(jnp.float32)     # NCHW -> NHWC

    # ---- conv1 (9x9, 3->128) + ReLU + Dropout + conv2 (1x1,128->64) + ReLU, fused
    k1 = w1.shape[0]
    patches1, (n, h1, wo1) = _im2col(x, k1, p1)                     # (M1, 243)
    k1_dim = patches1.shape[1]
    k1_pad = _round_up(k1_dim, 128)                                 # 243 -> 256
    patches1 = _pad_axis(patches1, 1, k1_pad).astype(jnp.bfloat16)
    w1_mat = _pad_axis(w1.reshape(k1_dim, -1), 0, k1_pad).astype(jnp.bfloat16)
    w2_mat = w2.reshape(w2.shape[-2], w2.shape[-1]).astype(jnp.bfloat16)  # (128,64)
    c2 = w2.shape[-1]
    interior = fused_conv1_conv2(patches1, w1_mat, b1, w2_mat, b2)
    interior = interior.reshape(n, h1, wo1, c2)
    # conv2 has k=1 but padding=2: the 2-pixel frame sees only zero-padded input,
    # so its value there is relu(0 @ W2 + b2) = relu(b2).
    h2, wid2 = h1 + 2 * p2, wo1 + 2 * p2
    y2 = jnp.broadcast_to(jnp.maximum(b2, 0.0), (n, h2, wid2, c2))
    y2 = y2.at[:, p2:h2 - p2, p2:wid2 - p2, :].set(interior)

    # ---- conv3 (5x5, 64->3); Cout padded to 128 for lane-dense stores -------
    k3 = w3.shape[0]
    patches3, (n3, h3, wo3) = _im2col(y2, k3, p3)                   # (M3, 1600)
    k3_dim = patches3.shape[1]
    k3_pad = _round_up(k3_dim, 128)                                 # 1600 -> 1664
    patches3 = _pad_axis(patches3, 1, k3_pad).astype(jnp.bfloat16)
    c3 = w3.shape[-1]
    c3_pad = 128
    w3_mat = w3.reshape(k3_dim, c3)
    w3_mat = _pad_axis(_pad_axis(w3_mat, 0, k3_pad), 1, c3_pad).astype(jnp.bfloat16)
    b3_pad = _pad_axis(b3, 0, c3_pad)
    out = matmul_bias(patches3, w3_mat, b3_pad, apply_relu=False)
    out = out[:, :c3].reshape(n3, h3, wo3, c3)

    return jnp.transpose(out, (0, 3, 1, 2))                         # NHWC -> NCHW


# ---------------------------------------------------------------------------
# Pure-JAX reference (lax conv, f32) for a sanity check
# ---------------------------------------------------------------------------
def srcnn1_reference(x_nchw, params):
    x = jnp.transpose(x_nchw, (0, 2, 3, 1))
    for i, ((w, b), pad) in enumerate(zip(params, _PADS)):
        x = jax.lax.conv_general_dilated(
            x, w, window_strides=(1, 1), padding=[(pad, pad), (pad, pad)],
            dimension_numbers=("NHWC", "HWIO", "NHWC")) + b
        if i < 2:
            x = jnp.maximum(x, 0.0)
    return jnp.transpose(x, (0, 3, 1, 2))


if __name__ == "__main__":
    key = jax.random.PRNGKey(0)
    kx, kp = jax.random.split(key)

    x = jax.random.normal(kx, (2, 3, 16, 16), jnp.float32)   # NCHW like PyTorch
    params = init_srcnn1_params(kp)

    out = jax.block_until_ready(srcnn1_forward(x, params))
    assert out.shape == (2, 3, 16, 16), out.shape

    ref = jax.block_until_ready(srcnn1_reference(x, params))
    err = np.max(np.abs(np.asarray(out) - np.asarray(ref)))
    assert np.allclose(np.asarray(out), np.asarray(ref), rtol=2e-2, atol=2e-2), err

    print("KERNEL_OK")
</pallas_src>

<mosaic_0001>
module attributes {stable_mosaic.version = 11 : i64} {
  func.func @_conv12_fused_kernel(%arg0: i32, %arg1: memref<384x256xbf16, #tpu.memory_space<vmem>>, %arg2: memref<256x128xbf16, #tpu.memory_space<vmem>>, %arg3: memref<1x128xf32, #tpu.memory_space<vmem>>, %arg4: memref<128x64xbf16, #tpu.memory_space<vmem>>, %arg5: memref<1x64xf32, #tpu.memory_space<vmem>>, %arg6: memref<384x64xf32, #tpu.memory_space<vmem>>) attributes {dimension_semantics = [#tpu.dimension_semantics<parallel>], iteration_bounds = array<i64: 1>, scalar_prefetch = 0 : i64, scratch_operands = 0 : i64, tpu.core_type = #tpu.core_type<tc>, window_params = [{transform_indices = @transform_0, window_bounds = array<i64: 384, 256>}, {pipeline_mode = #tpu.pipeline_mode<synchronous>, transform_indices = @transform_1, window_bounds = array<i64: 256, 128>}, {pipeline_mode = #tpu.pipeline_mode<synchronous>, transform_indices = @transform_2, window_bounds = array<i64: 1, 128>}, {pipeline_mode = #tpu.pipeline_mode<synchronous>, transform_indices = @transform_3, window_bounds = array<i64: 128, 64>}, {pipeline_mode = #tpu.pipeline_mode<synchronous>, transform_indices = @transform_4, window_bounds = array<i64: 1, 64>}, {transform_indices = @transform_5, window_bounds = array<i64: 384, 64>}]} {
    %c0 = arith.constant 0 : index
    %c0_0 = arith.constant 0 : index
    %0 = vector.load %arg1[%c0, %c0_0] : memref<384x256xbf16, #tpu.memory_space<vmem>>, vector<384x256xbf16>
    %c0_1 = arith.constant 0 : index
    %c0_2 = arith.constant 0 : index
    %1 = vector.load %arg2[%c0_1, %c0_2] : memref<256x128xbf16, #tpu.memory_space<vmem>>, vector<256x128xbf16>
    %cst = arith.constant dense<0.000000e+00> : vector<384x128xf32>
    %2 = tpu.matmul %0, %1, %cst {dimension_numbers = #tpu.dot_dimension_numbers<[1], [0], [0], [1], [0, 0, 1, 1], [], []>} : vector<384x256xbf16>, vector<256x128xbf16>, vector<384x128xf32> -> vector<384x128xf32>
    %c0_3 = arith.constant 0 : index
    %c0_4 = arith.constant 0 : index
    %3 = vector.load %arg3[%c0_3, %c0_4] : memref<1x128xf32, #tpu.memory_space<vmem>>, vector<1x128xf32>
    %4 = vector.broadcast %3 : vector<1x128xf32> to vector<384x128xf32>
    %5 = arith.addf %2, %4 : vector<384x128xf32>
    %cst_5 = arith.constant 0.000000e+00 : f32
    %6 = vector.broadcast %cst_5 : f32 to vector<384x128xf32>
    %7 = arith.maximumf %5, %6 : vector<384x128xf32>
    %8 = arith.truncf %7 : vector<384x128xf32> to vector<384x128xbf16>
    %c0_6 = arith.constant 0 : index
    %c0_7 = arith.constant 0 : index
    %9 = vector.load %arg4[%c0_6, %c0_7] : memref<128x64xbf16, #tpu.memory_space<vmem>>, vector<128x64xbf16>
    %cst_8 = arith.constant dense<0.000000e+00> : vector<384x64xf32>
    %10 = tpu.matmul %8, %9, %cst_8 {dimension_numbers = #tpu.dot_dimension_numbers<[1], [0], [0], [1], [0, 0, 1, 1], [], []>} : vector<384x128xbf16>, vector<128x64xbf16>, vector<384x64xf32> -> vector<384x64xf32>
    %c0_9 = arith.constant 0 : index
    %c0_10 = arith.constant 0 : index
    %11 = vector.load %arg5[%c0_9, %c0_10] : memref<1x64xf32, #tpu.memory_space<vmem>>, vector<1x64xf32>
    %12 = vector.broadcast %11 : vector<1x64xf32> to vector<384x64xf32>
    %13 = arith.addf %10, %12 : vector<384x64xf32>
    %cst_11 = arith.constant 0.000000e+00 : f32
    %14 = vector.broadcast %cst_11 : f32 to vector<384x64xf32>
    %15 = arith.maximumf %13, %14 : vector<384x64xf32>
    %c0_12 = arith.constant 0 : index
    %c0_13 = arith.constant 0 : index
    %16 = vector.load %arg6[%c0_12, %c0_13] : memref<384x64xf32, #tpu.memory_space<vmem>>, vector<384x64xf32>
    tpu.vector_store %arg6[%c0_12, %c0_13], %15 {strides = array<i32>} : memref<384x64xf32, #tpu.memory_space<vmem>>, vector<384x64xf32>,
    return
  }
  func.func @transform_0(%arg0: i32) -> (i32, i32) {
    %c0_i32 = arith.constant 0 : i32
    %c0_i32_0 = arith.constant 0 : i32
    return %arg0, %c0_i32 : i32, i32
  }
  func.func @transform_1(%arg0: i32) -> (i32, i32) {
    %c0_i32 = arith.constant 0 : i32
    %c0_i32_0 = arith.constant 0 : i32
    %c0_i32_1 = arith.constant 0 : i32
    return %c0_i32, %c0_i32_0 : i32, i32
  }
  func.func @transform_2(%arg0: i32) -> (i32, i32) {
    %c0_i32 = arith.constant 0 : i32
    %c0_i32_0 = arith.constant 0 : i32
    %c0_i32_1 = arith.constant 0 : i32
    return %c0_i32, %c0_i32_0 : i32, i32
  }
  func.func @transform_3(%arg0: i32) -> (i32, i32) {
    %c0_i32 = arith.constant 0 : i32
    %c0_i32_0 = arith.constant 0 : i32
    %c0_i32_1 = arith.constant 0 : i32
    return %c0_i32, %c0_i32_0 : i32, i32
  }
  func.func @transform_4(%arg0: i32) -> (i32, i32) {
    %c0_i32 = arith.constant 0 : i32
    %c0_i32_0 = arith.constant 0 : i32
    %c0_i32_1 = arith.constant 0 : i32
    return %c0_i32, %c0_i32_0 : i32, i32
  }
  func.func @transform_5(%arg0: i32) -> (i32, i32) {
    %c0_i32 = arith.constant 0 : i32
    %c0_i32_0 = arith.constant 0 : i32
    return %arg0, %c0_i32 : i32, i32
  }
}

module attributes {stable_mosaic.version = 11 : i64} {
  func.func @_matmul_bias_kernel(%arg0: i32, %arg1: memref<512x1664xbf16, #tpu.memory_space<vmem>>, %arg2: memref<1664x128xbf16, #tpu.memory_space<vmem>>, %arg3: memref<1x128xf32, #tpu.memory_space<vmem>>, %arg4: memref<512x128xf32, #tpu.memory_space<vmem>>) attributes {dimension_semantics = [#tpu.dimension_semantics<parallel>], iteration_bounds = array<i64: 1>, scalar_prefetch = 0 : i64, scratch_operands = 0 : i64, tpu.core_type = #tpu.core_type<tc>, window_params = [{transform_indices = @transform_0, window_bounds = array<i64: 512, 1664>}, {pipeline_mode = #tpu.pipeline_mode<synchronous>, transform_indices = @transform_1, window_bounds = array<i64: 1664, 128>}, {pipeline_mode = #tpu.pipeline_mode<synchronous>, transform_indices = @transform_2, window_bounds = array<i64: 1, 128>}, {transform_indices = @transform_3, window_bounds = array<i64: 512, 128>}]} {
    %c0 = arith.constant 0 : index
    %c0_0 = arith.constant 0 : index
    %0 = vector.load %arg1[%c0, %c0_0] : memref<512x1664xbf16, #tpu.memory_space<vmem>>, vector<512x1664xbf16>
    %c0_1 = arith.constant 0 : index
    %c0_2 = arith.constant 0 : index
    %1 = vector.load %arg2[%c0_1, %c0_2] : memref<1664x128xbf16, #tpu.memory_space<vmem>>, vector<1664x128xbf16>
    %cst = arith.constant dense<0.000000e+00> : vector<512x128xf32>
    %2 = tpu.matmul %0, %1, %cst {dimension_numbers = #tpu.dot_dimension_numbers<[1], [0], [0], [1], [0, 0, 1, 1], [], []>} : vector<512x1664xbf16>, vector<1664x128xbf16>, vector<512x128xf32> -> vector<512x128xf32>
    %c0_3 = arith.constant 0 : index
    %c0_4 = arith.constant 0 : index
    %3 = vector.load %arg3[%c0_3, %c0_4] : memref<1x128xf32, #tpu.memory_space<vmem>>, vector<1x128xf32>
    %4 = vector.broadcast %3 : vector<1x128xf32> to vector<512x128xf32>
    %5 = arith.addf %2, %4 : vector<512x128xf32>
    %c0_5 = arith.constant 0 : index
    %c0_6 = arith.constant 0 : index
    %6 = vector.load %arg4[%c0_5, %c0_6] : memref<512x128xf32, #tpu.memory_space<vmem>>, vector<512x128xf32>
    tpu.vector_store %arg4[%c0_5, %c0_6], %5 {strides = array<i32>} : memref<512x128xf32, #tpu.memory_space<vmem>>, vector<512x128xf32>,
    return
  }
  func.func @transform_0(%arg0: i32) -> (i32, i32) {
    %c0_i32 = arith.constant 0 : i32
    %c0_i32_0 = arith.constant 0 : i32
    return %arg0, %c0_i32 : i32, i32
  }
  func.func @transform_1(%arg0: i32) -> (i32, i32) {
    %c0_i32 = arith.constant 0 : i32
    %c0_i32_0 = arith.constant 0 : i32
    %c0_i32_1 = arith.constant 0 : i32
    return %c0_i32, %c0_i32_0 : i32, i32
  }
  func.func @transform_2(%arg0: i32) -> (i32, i32) {
    %c0_i32 = arith.constant 0 : i32
    %c0_i32_0 = arith.constant 0 : i32
    %c0_i32_1 = arith.constant 0 : i32
    return %c0_i32, %c0_i32_0 : i32, i32
  }
  func.func @transform_3(%arg0: i32) -> (i32, i32) {
    %c0_i32 = arith.constant 0 : i32
    %c0_i32_0 = arith.constant 0 : i32
    return %arg0, %c0_i32 : i32, i32
  }
}

</mosaic_0001>

<bundles_post_ra>
// kernel: srcnn1_forward.2
= control target key start
LH: loop header
LB: loop body
LE: loop exit
PB: predicated region body
PF: predicated region fallthrough
CT: control target
= control target key end

     0   :  { %v1437_v0 = vmov 0   ;;  %vm1085_vm0 = vcmask 523264   ;;  %s2032_s1 = inlined_call_operand.vmem [shape: bf16[256,128], index: 1, kind: input, shape index: {}]   ;;  %s2033_s0 = inlined_call_operand.vmem [shape: bf16[384,256], index: 0, kind: input, shape index: {}]   ;;  %s2034_s3 = inlined_call_operand.vmem [shape: bf16[128,64], index: 3, kind: input, shape index: {}]   ;;  %s2035_s2 = inlined_call_operand.vmem [shape: f32[1,128], index: 2, kind: input, shape index: {}]   ;;  %s2036_s4 = inlined_call_operand.vmem [shape: f32[1,64], index: 4, kind: input, shape index: {}]   ;;  %s2037_s5 = inlined_call_operand.vmem [shape: f32[384,64], index: 5, kind: output, shape index: {}]  }
   0x1   :  { %444 = vmatprep.subr.bf16.mxu0 %v1437_v0  ;;  %v1341_v1 = vld [vmem:[%s2032_s1 + $0x38] sm:$0xff]   ;;  %1308 = vmatprep.subr.bf16.mxu1 %v1437_v0  ;;  %v1342_v2 = vld [vmem:[%s2032_s1 + $0x30] sm:$0xff]   ;;  %v1343_v3 = vld [vmem:[%s2032_s1 + $0x28] sm:$0xff]  }
   0x2   :  { %445 = vmatpush1.bf16.msra.mxu0 %v1341_v1  ;;  %1324 = vmatpush1.bf16.msra.mxu1 %v1341_v1  ;;  %v1344_v4 = vld [vmem:[%s2032_s1 + $0x20] sm:$0xff]   ;;  %v1345_v5 = vld [vmem:[%s2032_s1 + $0x18] sm:$0xff]   ;;  %v1346_v7 = vld [vmem:[%s2032_s1 + $0x10] sm:$0xff]  }
   0x3   :  { %446 = vmatprep.subr.bf16.mxu0 %v1437_v0  ;;  %1309 = vmatprep.subr.bf16.mxu1 %v1437_v0  ;;  %v1359_v6 = vld [vmem:[%s2033_s0 + $0x4] ss:$8 sps:$4 sm:$0xff]   ;;  %v1349_v10 = vld [vmem:[%s2032_s1 + $0x78] sm:$0xff]   ;;  %v1350_v11 = vld [vmem:[%s2032_s1 + $0x70] sm:$0xff]  }
   0x4   :  { %476 = vmatprep.mubr.bf16.mxu0 %v1359_v6  ;;  %v1347_v8 = vld [vmem:[%s2032_s1 + $0x8] sm:$0xff]   ;;  %v1348_v9 = vld [vmem:[%s2032_s1] sm:$0xff]   ;;  %v1353_v14 = vld [vmem:[%s2032_s1 + $0x58] sm:$0xff]  }
   0x5   :  { %v1351_v12 = vld [vmem:[%s2032_s1 + $0x68] sm:$0xff]   ;;  %v1352_v13 = vld [vmem:[%s2032_s1 + $0x60] sm:$0xff]   ;;  %v1354_v16 = vld [vmem:[%s2032_s1 + $0x50] sm:$0xff]  }
   0x6   :  { %447 = vmatpush1.bf16.msra.mxu0 %v1342_v2  ;;  %1325 = vmatpush1.bf16.msra.mxu1 %v1342_v2  ;;  %v1404_v15 = vld [vmem:[%s2033_s0 + $0x124] ss:$8 sps:$4 sm:$0xff]   ;;  %v1357_v19 = vld [vmem:[%s2033_s0] ss:$8 sps:$4 sm:$0xff]   ;;  %v1360_v21 = vld [vmem:[%s2033_s0 + $0x14] ss:$8 sps:$4 sm:$0xff]  }
   0x7   :  { %448 = vmatprep.subr.bf16.mxu0 %v1437_v0  ;;  %1310 = vmatprep.subr.bf16.mxu1 %v1437_v0  ;;  %v1355_v17 = vld [vmem:[%s2032_s1 + $0x48] sm:$0xff]   ;;  %v1356_v18 = vld [vmem:[%s2032_s1 + $0x40] sm:$0xff]   ;;  %v1408_v22 = vld [vmem:[%s2033_s0 + $0x134] ss:$8 sps:$4 sm:$0xff]  }
   0x8   :  { %620 = vmatprep.mubr.bf16.mxu1 %v1404_v15  ;;  %v1402_v20 = vld [vmem:[%s2033_s0 + $0x120] ss:$8 sps:$4 sm:$0xff]   ;;  %v1362_v23 = vld [vmem:[%s2033_s0 + $0x10] ss:$8 sps:$4 sm:$0xff]   ;;  %v1363_v25 = vld [vmem:[%s2033_s0 + $0x24] ss:$8 sps:$4 sm:$0xff]  }
   0x9   :  { %v1410_v24 = vld [vmem:[%s2033_s0 + $0x130] ss:$8 sps:$4 sm:$0xff]   ;;  %v1414_v26 = vld [vmem:[%s2033_s0 + $0x144] ss:$8 sps:$4 sm:$0xff]   ;;  %v1365_v27 = vld [vmem:[%s2033_s0 + $0x20] ss:$8 sps:$4 sm:$0xff]  }
   0xa   :  { %449 = vmatpush1.bf16.msra.mxu0 %v1343_v3  ;;  %1326 = vmatpush1.bf16.msra.mxu1 %v1343_v3  ;;  %v1429_v28 = vld [vmem:[%s2034_s3 + $0x38] sm:$0xff]   ;;  %v1430_v30 = vld [vmem:[%s2034_s3 + $0x30] sm:$0xff]   ;;  %v1416_v31 = vld [vmem:[%s2033_s0 + $0x140] ss:$8 sps:$4 sm:$0xff]  }
   0xb   :  { %450 = vmatprep.subr.bf16.mxu0 %v1437_v0  ;;  %1311 = vmatprep.subr.bf16.mxu1 %v1437_v0  ;;  %v1366_v29 = vld [vmem:[%s2033_s0 + $0x34] ss:$8 sps:$4 sm:$0xff]   ;;  %v1431_v33 = vld [vmem:[%s2034_s3 + $0x28] sm:$0xff]   ;;  %v1432_v34 = vld [vmem:[%s2034_s3 + $0x20] sm:$0xff]  }
   0xc   :  { %v1420_v32 = vld [vmem:[%s2033_s0 + $0x154] ss:$8 sps:$4 sm:$0xff]   ;;  %v1368_v35 = vld [vmem:[%s2033_s0 + $0x30] ss:$8 sps:$4 sm:$0xff]   ;;  %v1369_v37 = vld [vmem:[%s2033_s0 + $0x44] ss:$8 sps:$4 sm:$0xff]  }
   0xd   :  { %v1422_v36 = vld [vmem:[%s2033_s0 + $0x150] ss:$8 sps:$4 sm:$0xff]   ;;  %v1423_v38 = vld [vmem:[%s2033_s0 + $0x164] ss:$8 sps:$4 sm:$0xff]   ;;  %v1371_v39 = vld [vmem:[%s2033_s0 + $0x40] ss:$8 sps:$4 sm:$0xff]  }
   0xe   :  { %451 = vmatpush1.bf16.msra.mxu0 %v1344_v4  ;;  %1327 = vmatpush1.bf16.msra.mxu1 %v1344_v4  ;;  %v1425_v40 = vld [vmem:[%s2033_s0 + $0x160] ss:$8 sps:$4 sm:$0xff]   ;;  %v1372_v41 = vld [vmem:[%s2033_s0 + $0x54] ss:$8 sps:$4 sm:$0xff]   ;;  %v1374_v43 = vld [vmem:[%s2033_s0 + $0x50] ss:$8 sps:$4 sm:$0xff]  }
   0xf   :  { %452 = vmatprep.subr.bf16.mxu0 %v1437_v0  ;;  %1312 = vmatprep.subr.bf16.mxu1 %v1437_v0  ;;  %v1426_v42 = vld [vmem:[%s2033_s0 + $0x174] ss:$8 sps:$4 sm:$0xff]   ;;  %v1428_v44 = vld [vmem:[%s2033_s0 + $0x170] ss:$8 sps:$4 sm:$0xff]   ;;  %v1375_v45 = vld [vmem:[%s2033_s0 + $0x64] ss:$8 sps:$4 sm:$0xff]  }
  0x10   :  { %v1377_v46 = vld [vmem:[%s2033_s0 + $0x60] ss:$8 sps:$4 sm:$0xff]   ;;  %v1378_v47 = vld [vmem:[%s2033_s0 + $0x74] ss:$8 sps:$4 sm:$0xff]   ;;  %v1380_v48 = vld [vmem:[%s2033_s0 + $0x70] ss:$8 sps:$4 sm:$0xff]  }
  0x11   :  { %v1381_v49 = vld [vmem:[%s2033_s0 + $0x84] ss:$8 sps:$4 sm:$0xff]   ;;  %v1383_v50 = vld [vmem:[%s2033_s0 + $0x80] ss:$8 sps:$4 sm:$0xff]   ;;  %v1384_v51 = vld [vmem:[%s2033_s0 + $0x94] ss:$8 sps:$4 sm:$0xff]  }
  0x12   :  { %453 = vmatpush1.bf16.msra.mxu0 %v1345_v5  ;;  %1328 = vmatpush1.bf16.msra.mxu1 %v1345_v5  ;;  %v1433_v52 = vld [vmem:[%s2034_s3 + $0x18] sm:$0xff]   ;;  %v1387_v54 = vld [vmem:[%s2033_s0 + $0xa4] ss:$8 sps:$4 sm:$0xff]   ;;  %v1434_v55 = vld [vmem:[%s2034_s3 + $0x10] sm:$0xff]  }
  0x13   :  { %454 = vmatprep.subr.bf16.mxu0 %v1437_v0  ;;  %1313 = vmatprep.subr.bf16.mxu1 %v1437_v0  ;;  %v1386_v53 = vld [vmem:[%s2033_s0 + $0x90] ss:$8 sps:$4 sm:$0xff]   ;;  %v1435_v56 = vld [vmem:[%s2034_s3 + $0x8] sm:$0xff]   ;;  %v1390_v58 = vld [vmem:[%s2033_s0 + $0xb4] ss:$8 sps:$4 sm:$0xff]  }
  0x14   :  { %v1389_v57 = vld [vmem:[%s2033_s0 + $0xa0] ss:$8 sps:$4 sm:$0xff]   ;;  %v1392_v60 = vld [vmem:[%s2033_s0 + $0xb0] ss:$8 sps:$4 sm:$0xff]   ;;  %v1393_v61 = vld [vmem:[%s2033_s0 + $0xc4] ss:$8 sps:$4 sm:$0xff]  }
  0x15   :  { %v1436_v59 = vld [vmem:[%s2034_s3] sm:$0xff]   ;;  %v1396_v63 = vld [vmem:[%s2033_s0 + $0xd4] ss:$8 sps:$4 sm:$0xff]   ;;  %v1407_v4 = vld [vmem:[%s2033_s0 + $0xf0] ss:$8 sps:$4 sm:$0xff]  }
  0x16   :  { %455 = vmatpush1.bf16.msra.mxu0 %v1346_v7  ;;  %1329 = vmatpush1.bf16.msra.mxu1 %v1346_v7  ;;  %v1395_v62 = vld [vmem:[%s2033_s0 + $0xc0] ss:$8 sps:$4 sm:$0xff]   ;;  %v1399_v1 = vld [vmem:[%s2033_s0 + $0xe4] ss:$8 sps:$4 sm:$0xff]   ;;  %v1405_v3 = vld [vmem:[%s2033_s0 + $0xf4] ss:$8 sps:$4 sm:$0xff]  }
  0x17   :  { %456 = vmatprep.subr.bf16.mxu0 %v1437_v0  ;;  %1314 = vmatprep.subr.bf16.mxu1 %v1437_v0  ;;  %v1401_v2 = vld [vmem:[%s2033_s0 + $0xe0] ss:$8 sps:$4 sm:$0xff]   ;;  %v1411_v5 = vld [vmem:[%s2033_s0 + $0x104] ss:$8 sps:$4 sm:$0xff]   ;;  %v1417_v7 = vld [vmem:[%s2033_s0 + $0x114] ss:$8 sps:$4 sm:$0xff]  }
  0x18   :  { %v1413_v6 = vld [vmem:[%s2033_s0 + $0x100] ss:$8 sps:$4 sm:$0xff]  }
  0x1a   :  { %457 = vmatpush1.bf16.msra.mxu0 %v1347_v8  ;;  %1330 = vmatpush1.bf16.msra.mxu1 %v1347_v8  ;;  %v1419_v8 = vld [vmem:[%s2033_s0 + $0x110] ss:$8 sps:$4 sm:$0xff]  }
  0x1b   :  { %458 = vmatprep.subr.bf16.mxu0 %v1437_v0  ;;  %1315 = vmatprep.subr.bf16.mxu1 %v1437_v0 }
  0x1e   :  { %459 = vmatpush1.bf16.msra.mxu0 %v1348_v9  ;;  %1331 = vmatpush1.bf16.msra.mxu1 %v1348_v9  ;;  %v1719_v9 = vld [vmem:[%s2035_s2] ss:$0 sm:$0xff] }
  0x1f   :  { %460 = vmatprep.subr.bf16.mxu0 %v1437_v0  ;;  %1316 = vmatprep.subr.bf16.mxu1 %v1437_v0 }
  0x22   :  { %461 = vmatpush2.bf16.msra.mxu0 %v1349_v10  ;;  %1332 = vmatpush2.bf16.msra.mxu1 %v1349_v10 }
  0x23   :  { %462 = vmatprep.subr.bf16.mxu0 %v1437_v0  ;;  %1317 = vmatprep.subr.bf16.mxu1 %v1437_v0 }
  0x26   :  { %463 = vmatpush2.bf16.msra.mxu0 %v1350_v11  ;;  %1333 = vmatpush2.bf16.msra.mxu1 %v1350_v11 }
  0x27   :  { %464 = vmatprep.subr.bf16.mxu0 %v1437_v0  ;;  %1318 = vmatprep.subr.bf16.mxu1 %v1437_v0 }
  0x2a   :  { %465 = vmatpush2.bf16.msra.mxu0 %v1351_v12  ;;  %1334 = vmatpush2.bf16.msra.mxu1 %v1351_v12 }
  0x2b   :  { %466 = vmatprep.subr.bf16.mxu0 %v1437_v0  ;;  %1319 = vmatprep.subr.bf16.mxu1 %v1437_v0 }
  0x2e   :  { %467 = vmatpush2.bf16.msra.mxu0 %v1352_v13  ;;  %1335 = vmatpush2.bf16.msra.mxu1 %v1352_v13 }
  0x2f   :  { %468 = vmatprep.subr.bf16.mxu0 %v1437_v0  ;;  %1320 = vmatprep.subr.bf16.mxu1 %v1437_v0 }
  0x32   :  { %469 = vmatpush2.bf16.msra.mxu0 %v1353_v14  ;;  %1336 = vmatpush2.bf16.msra.mxu1 %v1353_v14 }
  0x33   :  { %470 = vmatprep.subr.bf16.mxu0 %v1437_v0  ;;  %1321 = vmatprep.subr.bf16.mxu1 %v1437_v0 }
  0x36   :  { %471 = vmatpush2.bf16.msra.mxu0 %v1354_v16  ;;  %1337 = vmatpush2.bf16.msra.mxu1 %v1354_v16 }
  0x37   :  { %472 = vmatprep.subr.bf16.mxu0 %v1437_v0  ;;  %1322 = vmatprep.subr.bf16.mxu1 %v1437_v0 }
  0x3a   :  { %473 = vmatpush2.bf16.msra.mxu0 %v1355_v17  ;;  %1338 = vmatpush2.bf16.msra.mxu1 %v1355_v17 }
  0x3b   :  { %474 = vmatprep.subr.bf16.mxu0 %v1437_v0  ;;  %1323 = vmatprep.subr.bf16.mxu1 %v1437_v0  ;;  %v1398_v0 = vld [vmem:[%s2033_s0 + $0xd0] ss:$8 sps:$4 sm:$0xff]  }
  0x3e   :  { %475 = vmatpush2.bf16.msra.mxu0 %v1356_v18  ;;  %1339 = vmatpush2.bf16.msra.mxu1 %v1356_v18 }
  0x3f   :  { %1244 = vmatprep.subr.bf16.mxu1 %v1429_v28 }
  0x41   :  { %477 = vmatmul.mubr.bf16.vlgmr.msra.gmra.mxu0 %v1357_v19  ;;  %621 = vmatmul.mubr.bf16.vlgmr.msra.gmra.mxu1 %v1402_v20 }
  0x42   :  { %484 = vmatprep.mubr.bf16.mxu0 %v1360_v21  ;;  %628 = vmatprep.mubr.bf16.mxu1 %v1408_v22 }
  0x43   :  { %1245 = vmatpush3.bf16.msra.mxu1 %v1429_v28 }
  0x44   :  { %1246 = vmatprep.subr.bf16.mxu1 %v1430_v30 }
  0x47   :  { %1247 = vmatpush3.bf16.msra.mxu1 %v1430_v30 }
  0x48   :  { %1248 = vmatprep.subr.bf16.mxu1 %v1431_v33 }
  0x49   :  { %485 = vmatmul.mubr.bf16.gmra.mxu0 %v1362_v23  ;;  %629 = vmatmul.mubr.bf16.gmra.mxu1 %v1410_v24 }
  0x4a   :  { %492 = vmatprep.mubr.bf16.mxu0 %v1363_v25  ;;  %636 = vmatprep.mubr.bf16.mxu1 %v1414_v26 }
  0x4b   :  { %1249 = vmatpush3.bf16.msra.mxu1 %v1431_v33 }
  0x4c   :  { %1250 = vmatprep.subr.bf16.mxu1 %v1432_v34 }
  0x4f   :  { %1251 = vmatpush3.bf16.msra.mxu1 %v1432_v34 }
  0x50   :  { %1252 = vmatprep.subr.bf16.mxu1 %v1433_v52 }
  0x51   :  { %493 = vmatmul.mubr.bf16.gmra.mxu0 %v1365_v27  ;;  %637 = vmatmul.mubr.bf16.gmra.mxu1 %v1416_v31 }
  0x52   :  { %500 = vmatprep.mubr.bf16.mxu0 %v1366_v29  ;;  %644 = vmatprep.mubr.bf16.mxu1 %v1420_v32 }
  0x53   :  { %1253 = vmatpush3.bf16.msra.mxu1 %v1433_v52 }
  0x54   :  { %1254 = vmatprep.subr.bf16.mxu1 %v1434_v55 }
  0x57   :  { %1255 = vmatpush3.bf16.msra.mxu1 %v1434_v55 }
  0x58   :  { %1256 = vmatprep.subr.bf16.mxu1 %v1435_v56 }
  0x59   :  { %501 = vmatmul.mubr.bf16.gmra.mxu0 %v1368_v35  ;;  %645 = vmatmul.mubr.bf16.gmra.mxu1 %v1422_v36 }
  0x5a   :  { %508 = vmatprep.mubr.bf16.mxu0 %v1369_v37  ;;  %652 = vmatprep.mubr.bf16.mxu1 %v1423_v38 }
  0x5b   :  { %1257 = vmatpush3.bf16.msra.mxu1 %v1435_v56 }
  0x5c   :  { %1258 = vmatprep.subr.bf16.mxu1 %v1436_v59 }
  0x5f   :  { %1259 = vmatpush3.bf16.msra.mxu1 %v1436_v59 }
  0x61   :  { %509 = vmatmul.mubr.bf16.gmra.mxu0 %v1371_v39  ;;  %653 = vmatmul.mubr.bf16.gmra.mxu1 %v1425_v40 }
  0x62   :  { %516 = vmatprep.mubr.bf16.mxu0 %v1372_v41  ;;  %660 = vmatprep.mubr.bf16.mxu1 %v1426_v42 }
  0x69   :  { %517 = vmatmul.mubr.bf16.gmra.mxu0 %v1374_v43  ;;  %661 = vmatmul.mubr.bf16.gmra.mxu1 %v1428_v44 }
  0x6a   :  { %524 = vmatprep.mubr.bf16.mxu0 %v1375_v45 }
  0x71   :  { %525 = vmatmul.mubr.bf16.gmra.mxu0 %v1377_v46 }
  0x72   :  { %532 = vmatprep.mubr.bf16.mxu0 %v1378_v47 }
  0x79   :  { %533 = vmatmul.mubr.bf16.gmra.mxu0 %v1380_v48 }
  0x7a   :  { %540 = vmatprep.mubr.bf16.mxu0 %v1381_v49 }
  0x81   :  { %541 = vmatmul.mubr.bf16.gmra.mxu0 %v1383_v50 }
  0x82   :  { %548 = vmatprep.mubr.bf16.mxu0 %v1384_v51 }
  0x89   :  { %549 = vmatmul.mubr.bf16.gmra.mxu0 %v1386_v53 }
  0x8a   :  { %556 = vmatprep.mubr.bf16.mxu0 %v1387_v54 }
  0x91   :  { %557 = vmatmul.mubr.bf16.gmra.mxu0 %v1389_v57 }
  0x92   :  { %564 = vmatprep.mubr.bf16.mxu0 %v1390_v58 }
  0x99   :  { %565 = vmatmul.mubr.bf16.gmra.mxu0 %v1392_v60 }
  0x9a   :  { %572 = vmatprep.mubr.bf16.mxu0 %v1393_v61 }
  0xa1   :  { %573 = vmatmul.mubr.bf16.gmra.mxu0 %v1395_v62 }
  0xa2   :  { %580 = vmatprep.mubr.bf16.mxu0 %v1396_v63 }
  0xa9   :  { %581 = vmatmul.mubr.bf16.gmra.mxu0 %v1398_v0 }
  0xaa   :  { %588 = vmatprep.mubr.bf16.mxu0 %v1399_v1 }
  0xb1   :  { %589 = vmatmul.mubr.bf16.gmra.mxu0 %v1401_v2 }
  0xb2   :  { %596 = vmatprep.mubr.bf16.mxu0 %v1405_v3 }
  0xb9   :  { %597 = vmatmul.mubr.bf16.gmra.mxu0 %v1407_v4 }
  0xba   :  { %604 = vmatprep.mubr.bf16.mxu0 %v1411_v5 }
  0xc1   :  { %605 = vmatmul.mubr.bf16.gmra.mxu0 %v1413_v6 }
  0xc2   :  { %612 = vmatprep.mubr.bf16.mxu0 %v1417_v7 }
  0xc9   :  { %613 = vmatmul.mubr.bf16.gmra.mxu0 %v1419_v8 }
 0x101   :  { %v478_v10 = vpop.f32.mrf.mxu0  ;;  %v622_v11 = vpop.f32.mrf.mxu1 }
 0x102   :  { %v623_v12 = vadd.f32 %v1719_v9, %v622_v11  ;;  %v479_v15 = vadd.f32 %v1719_v9, %v478_v10 }
 0x103   :  { %v480_v13 = vpop.f32.mrf.mxu0  ;;  %v624_v14 = vpop.f32.mrf.mxu1 }
 0x104   :  { %v705_v19 = vmax.f32 %v623_v12, 0.0  ;;  %v669_v23 = vmax.f32 %v479_v15, 0.0 }
 0x105   :  { %v481_v16 = vpop.f32.mrf.mxu0  ;;  %v625_v17 = vpop.f32.mrf.mxu1 }
 0x106   :  { %v482_v18 = vadd.f32 %v1719_v9, %v481_v16  ;;  %v626_v20 = vadd.f32 %v1719_v9, %v625_v17 }
 0x107   :  { %v483_v21 = vpop.f32.mrf.mxu0  ;;  %v627_v22 = vpop.f32.mrf.mxu1 }
 0x108   :  { %v670_v24 = vmax.f32 %v482_v18, 0.0  ;;  %v706_v25 = vmax.f32 %v626_v20, 0.0 }
 0x109   :  { %v486_v26 = vpop.f32.mrf.mxu0  ;;  %v630_v27 = vpop.f32.mrf.mxu1 }
 0x10a   :  { %v717_v28 = vpack.c.bf16 %v670_v24, %v669_v23  ;;  %v1725_v29 = vpack.c.bf16 %v706_v25, %v705_v19  ;;  %v631_v30 = vadd.f32 %v1719_v9, %v630_v27  ;;  %v487_v33 = vadd.f32 %v1719_v9, %v486_v26 }
 0x10b   :  { %v488_v31 = vpop.f32.mrf.mxu0  ;;  %v632_v32 = vpop.f32.mrf.mxu1 }
 0x10c   :  { %1260 = vmatprep.mubr.bf16.mxu1 %v717_v28  ;;  %v707_v37 = vmax.f32 %v631_v30, 0.0  ;;  %v671_v41 = vmax.f32 %v487_v33, 0.0 }
 0x10d   :  { %v489_v34 = vpop.f32.mrf.mxu0  ;;  %v633_v35 = vpop.f32.mrf.mxu1 }
 0x10e   :  { %v490_v36 = vadd.f32 %v1719_v9, %v489_v34  ;;  %v634_v38 = vadd.f32 %v1719_v9, %v633_v35 }
 0x10f   :  { %v491_v39 = vpop.f32.mrf.mxu0  ;;  %v635_v40 = vpop.f32.mrf.mxu1 }
 0x110   :  { %v672_v42 = vmax.f32 %v490_v36, 0.0  ;;  %v708_v43 = vmax.f32 %v634_v38, 0.0 }
 0x111   :  { %v494_v44 = vpop.f32.mrf.mxu0  ;;  %v638_v45 = vpop.f32.mrf.mxu1 }
 0x112   :  { %v718_v46 = vpack.c.bf16 %v672_v42, %v671_v41  ;;  %v1731_v47 = vpack.c.bf16 %v708_v43, %v707_v37  ;;  %v639_v48 = vadd.f32 %v1719_v9, %v638_v45  ;;  %v495_v51 = vadd.f32 %v1719_v9, %v494_v44 }
 0x113   :  { %v496_v49 = vpop.f32.mrf.mxu0  ;;  %v640_v50 = vpop.f32.mrf.mxu1 }
 0x114   :  { %1261 = vmatmul.mubr.bf16.vlgmr.msra.gmra.mxu1 %v718_v46  ;;  %v709_v55 = vmax.f32 %v639_v48, 0.0  ;;  %v673_v59 = vmax.f32 %v495_v51, 0.0 }
 0x115   :  { %v497_v52 = vpop.f32.mrf.mxu0  ;;  %v641_v53 = vpop.f32.mrf.mxu1 }
 0x116   :  { %v498_v54 = vadd.f32 %v1719_v9, %v497_v52  ;;  %v642_v56 = vadd.f32 %v1719_v9, %v641_v53 }
 0x117   :  { %v499_v57 = vpop.f32.mrf.mxu0  ;;  %v643_v58 = vpop.f32.mrf.mxu1 }
 0x118   :  { %v674_v60 = vmax.f32 %v498_v54, 0.0  ;;  %v710_v61 = vmax.f32 %v642_v56, 0.0 }
 0x119   :  { %v502_v62 = vpop.f32.mrf.mxu0  ;;  %v646_v63 = vpop.f32.mrf.mxu1 }
 0x11a   :  { %v719_v0 = vpack.c.bf16 %v674_v60, %v673_v59  ;;  %v1737_v1 = vpack.c.bf16 %v710_v61, %v709_v55  ;;  %v647_v2 = vadd.f32 %v1719_v9, %v646_v63  ;;  %v503_v5 = vadd.f32 %v1719_v9, %v502_v62 }
 0x11b   :  { %v504_v3 = vpop.f32.mrf.mxu0  ;;  %v648_v4 = vpop.f32.mrf.mxu1 }
 0x11c   :  { %1264 = vmatprep.mubr.bf16.mxu1 %v719_v0  ;;  %v711_v10 = vmax.f32 %v647_v2, 0.0  ;;  %v675_v14 = vmax.f32 %v503_v5, 0.0 }
 0x11d   :  { %v505_v6 = vpop.f32.mrf.mxu0  ;;  %v649_v7 = vpop.f32.mrf.mxu1 }
 0x11e   :  { %v506_v8 = vadd.f32 %v1719_v9, %v505_v6  ;;  %v650_v11 = vadd.f32 %v1719_v9, %v649_v7 }
 0x11f   :  { %v507_v12 = vpop.f32.mrf.mxu0  ;;  %v651_v13 = vpop.f32.mrf.mxu1 }
 0x120   :  { %v676_v15 = vmax.f32 %v506_v8, 0.0  ;;  %v712_v16 = vmax.f32 %v650_v11, 0.0 }
 0x121   :  { %v510_v17 = vpop.f32.mrf.mxu0  ;;  %v654_v18 = vpop.f32.mrf.mxu1 }
 0x122   :  { %v720_v19 = vpack.c.bf16 %v676_v15, %v675_v14  ;;  %v1743_v20 = vpack.c.bf16 %v712_v16, %v711_v10  ;;  %v655_v21 = vadd.f32 %v1719_v9, %v654_v18  ;;  %v511_v24 = vadd.f32 %v1719_v9, %v510_v17 }
 0x123   :  { %v512_v22 = vpop.f32.mrf.mxu0  ;;  %v656_v23 = vpop.f32.mrf.mxu1 }
 0x124   :  { %1265 = vmatmul.mubr.bf16.gmra.mxu1 %v720_v19  ;;  %v713_v28 = vmax.f32 %v655_v21, 0.0  ;;  %v677_v33 = vmax.f32 %v511_v24, 0.0 }
 0x125   :  { %v513_v25 = vpop.f32.mrf.mxu0  ;;  %v657_v26 = vpop.f32.mrf.mxu1 }
 0x126   :  { %v514_v27 = vadd.f32 %v1719_v9, %v513_v25  ;;  %v658_v30 = vadd.f32 %v1719_v9, %v657_v26 }
 0x127   :  { %v515_v31 = vpop.f32.mrf.mxu0  ;;  %v659_v32 = vpop.f32.mrf.mxu1 }
 0x128   :  { %v678_v34 = vmax.f32 %v514_v27, 0.0  ;;  %v714_v35 = vmax.f32 %v658_v30, 0.0 }
 0x129   :  { %v518_v36 = vpop.f32.mrf.mxu0  ;;  %v662_v37 = vpop.f32.mrf.mxu1 }
 0x12a   :  { %v721_v38 = vpack.c.bf16 %v678_v34, %v677_v33  ;;  %v1749_v39 = vpack.c.bf16 %v714_v35, %v713_v28  ;;  %v663_v40 = vadd.f32 %v1719_v9, %v662_v37  ;;  %v519_v43 = vadd.f32 %v1719_v9, %v518_v36 }
 0x12b   :  { %v520_v41 = vpop.f32.mrf.mxu0  ;;  %v664_v42 = vpop.f32.mrf.mxu1 }
 0x12c   :  { %1268 = vmatprep.mubr.bf16.mxu1 %v721_v38  ;;  %v715_v48 = vmax.f32 %v663_v40, 0.0  ;;  %v679_v52 = vmax.f32 %v519_v43, 0.0 }
 0x12d   :  { %v521_v44 = vpop.f32.mrf.mxu0  ;;  %v665_v45 = vpop.f32.mrf.mxu1 }
 0x12e   :  { %v522_v46 = vadd.f32 %v1719_v9, %v521_v44  ;;  %v666_v49 = vadd.f32 %v1719_v9, %v665_v45 }
 0x12f   :  { %v523_v50 = vpop.f32.mrf.mxu0  ;;  %v667_v51 = vpop.f32.mrf.mxu1 }
 0x130   :  { %v680_v53 = vmax.f32 %v522_v46, 0.0  ;;  %v716_v54 = vmax.f32 %v666_v49, 0.0 }
 0x131   :  { %v526_v55 = vpop.f32.mrf.mxu0 }
 0x132   :  { %v722_v56 = vpack.c.bf16 %v680_v53, %v679_v52  ;;  %v1755_v57 = vpack.c.bf16 %v716_v54, %v715_v48  ;;  %v527_v59 = vadd.f32 %v1719_v9, %v526_v55 }
 0x133   :  { %v528_v58 = vpop.f32.mrf.mxu0 }
 0x134   :  { %1269 = vmatmul.mubr.bf16.gmra.mxu1 %v722_v56  ;;  %v681_v63 = vmax.f32 %v527_v59, 0.0 }
 0x135   :  { %v529_v60 = vpop.f32.mrf.mxu0 }
 0x136   :  { %v530_v61 = vadd.f32 %v1719_v9, %v529_v60 }
 0x137   :  { %v531_v62 = vpop.f32.mrf.mxu0 }
 0x138   :  { %v682_v0 = vmax.f32 %v530_v61, 0.0 }
 0x139   :  { %v534_v2 = vpop.f32.mrf.mxu0 }
 0x13a   :  { %v723_v3 = vpack.c.bf16 %v682_v0, %v681_v63  ;;  %v535_v5 = vadd.f32 %v1719_v9, %v534_v2 }
 0x13b   :  { %v536_v4 = vpop.f32.mrf.mxu0 }
 0x13c   :  { %1272 = vmatprep.mubr.bf16.mxu1 %v723_v3  ;;  %v683_v10 = vmax.f32 %v535_v5, 0.0 }
 0x13d   :  { %v537_v6 = vpop.f32.mrf.mxu0 }
 0x13e   :  { %v538_v7 = vadd.f32 %v1719_v9, %v537_v6 }
 0x13f   :  { %v539_v8 = vpop.f32.mrf.mxu0 }
 0x140   :  { %v684_v11 = vmax.f32 %v538_v7, 0.0 }
 0x141   :  { %v542_v12 = vpop.f32.mrf.mxu0 }
 0x142   :  { %v724_v13 = vpack.c.bf16 %v684_v11, %v683_v10  ;;  %v543_v15 = vadd.f32 %v1719_v9, %v542_v12 }
 0x143   :  { %v544_v14 = vpop.f32.mrf.mxu0 }
 0x144   :  { %1273 = vmatmul.mubr.bf16.gmra.mxu1 %v724_v13  ;;  %v685_v19 = vmax.f32 %v543_v15, 0.0 }
 0x145   :  { %v545_v16 = vpop.f32.mrf.mxu0 }
 0x146   :  { %v546_v17 = vadd.f32 %v1719_v9, %v545_v16 }
 0x147   :  { %v547_v18 = vpop.f32.mrf.mxu0 }
 0x148   :  { %v686_v21 = vmax.f32 %v546_v17, 0.0 }
 0x149   :  { %v550_v22 = vpop.f32.mrf.mxu0 }
 0x14a   :  { %v725_v23 = vpack.c.bf16 %v686_v21, %v685_v19  ;;  %v551_v25 = vadd.f32 %v1719_v9, %v550_v22 }
 0x14b   :  { %v552_v24 = vpop.f32.mrf.mxu0 }
 0x14c   :  { %1276 = vmatprep.mubr.bf16.mxu1 %v725_v23  ;;  %v687_v30 = vmax.f32 %v551_v25, 0.0 }
 0x14d   :  { %v553_v26 = vpop.f32.mrf.mxu0 }
 0x14e   :  { %v554_v27 = vadd.f32 %v1719_v9, %v553_v26 }
 0x14f   :  { %v555_v28 = vpop.f32.mrf.mxu0 }
 0x150   :  { %v688_v31 = vmax.f32 %v554_v27, 0.0 }
 0x151   :  { %v558_v32 = vpop.f32.mrf.mxu0 }
 0x152   :  { %v726_v33 = vpack.c.bf16 %v688_v31, %v687_v30  ;;  %v559_v35 = vadd.f32 %v1719_v9, %v558_v32 }
 0x153   :  { %v560_v34 = vpop.f32.mrf.mxu0 }
 0x154   :  { %1277 = vmatmul.mubr.bf16.gmra.mxu1 %v726_v33  ;;  %v689_v40 = vmax.f32 %v559_v35, 0.0 }
 0x155   :  { %v561_v36 = vpop.f32.mrf.mxu0 }
 0x156   :  { %v562_v37 = vadd.f32 %v1719_v9, %v561_v36 }
 0x157   :  { %v563_v38 = vpop.f32.mrf.mxu0 }
 0x158   :  { %v690_v41 = vmax.f32 %v562_v37, 0.0 }
 0x159   :  { %v566_v42 = vpop.f32.mrf.mxu0 }
 0x15a   :  { %v727_v43 = vpack.c.bf16 %v690_v41, %v689_v40  ;;  %v567_v45 = vadd.f32 %v1719_v9, %v566_v42 }
 0x15b   :  { %v568_v44 = vpop.f32.mrf.mxu0 }
 0x15c   :  { %1280 = vmatprep.mubr.bf16.mxu1 %v727_v43  ;;  %v691_v50 = vmax.f32 %v567_v45, 0.0 }
 0x15d   :  { %v569_v46 = vpop.f32.mrf.mxu0 }
 0x15e   :  { %v570_v48 = vadd.f32 %v1719_v9, %v569_v46 }
 0x15f   :  { %v571_v49 = vpop.f32.mrf.mxu0 }
 0x160   :  { %v692_v51 = vmax.f32 %v570_v48, 0.0 }
 0x161   :  { %v574_v52 = vpop.f32.mrf.mxu0 }
 0x162   :  { %v728_v53 = vpack.c.bf16 %v692_v51, %v691_v50  ;;  %v575_v55 = vadd.f32 %v1719_v9, %v574_v52 }
 0x163   :  { %v576_v54 = vpop.f32.mrf.mxu0 }
 0x164   :  { %1281 = vmatmul.mubr.bf16.gmra.mxu1 %v728_v53  ;;  %v693_v60 = vmax.f32 %v575_v55, 0.0 }
 0x165   :  { %v577_v56 = vpop.f32.mrf.mxu0 }
 0x166   :  { %v578_v58 = vadd.f32 %v1719_v9, %v577_v56 }
 0x167   :  { %v579_v59 = vpop.f32.mrf.mxu0 }
 0x168   :  { %v694_v61 = vmax.f32 %v578_v58, 0.0 }
 0x169   :  { %v582_v62 = vpop.f32.mrf.mxu0 }
 0x16a   :  { %v729_v63 = vpack.c.bf16 %v694_v61, %v693_v60  ;;  %v583_v2 = vadd.f32 %v1719_v9, %v582_v62 }
 0x16b   :  { %v584_v0 = vpop.f32.mrf.mxu0 }
 0x16c   :  { %1284 = vmatprep.mubr.bf16.mxu1 %v729_v63  ;;  %v695_v6 = vmax.f32 %v583_v2, 0.0 }
 0x16d   :  { %v585_v3 = vpop.f32.mrf.mxu0 }
 0x16e   :  { %v586_v4 = vadd.f32 %v1719_v9, %v585_v3 }
 0x16f   :  { %v587_v5 = vpop.f32.mrf.mxu0 }
 0x170   :  { %v696_v7 = vmax.f32 %v586_v4, 0.0 }
 0x171   :  { %v590_v8 = vpop.f32.mrf.mxu0 }
 0x172   :  { %v730_v10 = vpack.c.bf16 %v696_v7, %v695_v6  ;;  %v591_v12 = vadd.f32 %v1719_v9, %v590_v8 }
 0x173   :  { %v592_v11 = vpop.f32.mrf.mxu0 }
 0x174   :  { %1285 = vmatmul.mubr.bf16.gmra.mxu1 %v730_v10  ;;  %v697_v16 = vmax.f32 %v591_v12, 0.0 }
 0x175   :  { %v593_v13 = vpop.f32.mrf.mxu0 }
 0x176   :  { %v594_v14 = vadd.f32 %v1719_v9, %v593_v13 }
 0x177   :  { %v595_v15 = vpop.f32.mrf.mxu0 }
 0x178   :  { %v698_v17 = vmax.f32 %v594_v14, 0.0 }
 0x179   :  { %v598_v18 = vpop.f32.mrf.mxu0 }
 0x17a   :  { %v731_v19 = vpack.c.bf16 %v698_v17, %v697_v16  ;;  %v599_v22 = vadd.f32 %v1719_v9, %v598_v18 }
 0x17b   :  { %v600_v21 = vpop.f32.mrf.mxu0 }
 0x17c   :  { %1288 = vmatprep.mubr.bf16.mxu1 %v731_v19  ;;  %v699_v26 = vmax.f32 %v599_v22, 0.0 }
 0x17d   :  { %v601_v23 = vpop.f32.mrf.mxu0 }
 0x17e   :  { %v602_v24 = vadd.f32 %v1719_v9, %v601_v23 }
 0x17f   :  { %v603_v25 = vpop.f32.mrf.mxu0 }
 0x180   :  { %v700_v27 = vmax.f32 %v602_v24, 0.0 }
 0x181   :  { %v606_v28 = vpop.f32.mrf.mxu0 }
 0x182   :  { %v732_v30 = vpack.c.bf16 %v700_v27, %v699_v26  ;;  %v607_v32 = vadd.f32 %v1719_v9, %v606_v28 }
 0x183   :  { %v608_v31 = vpop.f32.mrf.mxu0 }
 0x184   :  { %1289 = vmatmul.mubr.bf16.gmra.mxu1 %v732_v30  ;;  %v701_v36 = vmax.f32 %v607_v32, 0.0 }
 0x185   :  { %v609_v33 = vpop.f32.mrf.mxu0 }
 0x186   :  { %v610_v34 = vadd.f32 %v1719_v9, %v609_v33 }
 0x187   :  { %v611_v35 = vpop.f32.mrf.mxu0 }
 0x188   :  { %v702_v37 = vmax.f32 %v610_v34, 0.0 }
 0x189   :  { %v614_v38 = vpop.f32.mrf.mxu0 }
 0x18a   :  { %v733_v40 = vpack.c.bf16 %v702_v37, %v701_v36  ;;  %v615_v42 = vadd.f32 %v1719_v9, %v614_v38 }
 0x18b   :  { %v616_v41 = vpop.f32.mrf.mxu0 }
 0x18c   :  { %1292 = vmatprep.mubr.bf16.mxu1 %v733_v40  ;;  %v703_v46 = vmax.f32 %v615_v42, 0.0 }
 0x18d   :  { %v617_v43 = vpop.f32.mrf.mxu0 }
 0x18e   :  { %v618_v44 = vadd.f32 %v1719_v9, %v617_v43  ;;  %v1790_v9 = vld [vmem:[%s2036_s4] ss:$0 sm:$0xff] }
 0x18f   :  { %v619_v45 = vpop.f32.mrf.mxu0 }
 0x190   :  { %v704_v48 = vmax.f32 %v618_v44, 0.0 }
 0x192   :  { %v734_v49 = vpack.c.bf16 %v704_v48, %v703_v46 }
 0x194   :  { %1293 = vmatmul.mubr.bf16.gmra.mxu1 %v734_v49 }
 0x195   :  { %1296 = vmatprep.mubr.bf16.mxu1 %v1725_v29 }
 0x19c   :  { %1297 = vmatmul.mubr.bf16.gmra.mxu1 %v1731_v47 }
 0x19d   :  { %1300 = vmatprep.mubr.bf16.mxu1 %v1737_v1 }
 0x1a4   :  { %1301 = vmatmul.mubr.bf16.gmra.mxu1 %v1743_v20 }
 0x1a5   :  { %1304 = vmatprep.mubr.bf16.mxu1 %v1749_v39 }
 0x1ac   :  { %1305 = vmatmul.mubr.bf16.gmra.mxu1 %v1755_v57 }
 0x1d4   :  { %v1262_v50 = vpop.f32.mrf.mxu1 }
 0x1d5   :  { %v855_v51 = vadd.f32 %v1262_v50, %v1790_v9 }
 0x1d6   :  { %v846_v29 = vpop.f32.mrf.mxu1 }
 0x1d7   :  { %v1039_v52 = vmax.f32 %v855_v51, 0.0  ;;  %v847_v47 = vadd.f32 %v1790_v9, %v846_v29 }
 0x1d8   :  { %v1263_v1 = vpop.f32.mrf.mxu1 }
 0x1d9   :  { %1088 = vst.msk [vmem:[%s2037_s5 + $0x10] sm:$0xff] %vm1085_vm0, %v1039_v52  ;;  %v1037_v20 = vmax.f32 %v847_v47, 0.0  ;;  %v858_v39 = vadd.f32 %v1263_v1, %v1790_v9 }
 0x1da   :  { %v849_v57 = vpop.f32.mrf.mxu1 }
 0x1db   :  { %1086 = vst.msk [vmem:[%s2037_s5] sm:$0xff] %vm1085_vm0, %v1037_v20  ;;  %v1040_v53 = vmax.f32 %v858_v39, 0.0  ;;  %v850_v54 = vadd.f32 %v1790_v9, %v849_v57 }
 0x1dd   :  { %1089 = vst.msk [vmem:[%s2037_s5 + $0x18] sm:$0xff] %vm1085_vm0, %v1040_v53  ;;  %v1038_v55 = vmax.f32 %v850_v54, 0.0 }
 0x1df   :  { %1087 = vst.msk [vmem:[%s2037_s5 + $0x8] sm:$0xff] %vm1085_vm0, %v1038_v55 }
 0x1e4   :  { %v1266_v56 = vpop.f32.mrf.mxu1 }
 0x1e5   :  { %v871_v58 = vadd.f32 %v1266_v56, %v1790_v9 }
 0x1e6   :  { %v862_v59 = vpop.f32.mrf.mxu1 }
 0x1e7   :  { %v1043_v60 = vmax.f32 %v871_v58, 0.0  ;;  %v863_v61 = vadd.f32 %v1790_v9, %v862_v59 }
 0x1e8   :  { %v1267_v62 = vpop.f32.mrf.mxu1 }
 0x1e9   :  { %1092 = vst.msk [vmem:[%s2037_s5 + $0x30] sm:$0xff] %vm1085_vm0, %v1043_v60  ;;  %v1041_v63 = vmax.f32 %v863_v61, 0.0  ;;  %v874_v0 = vadd.f32 %v1267_v62, %v1790_v9 }
 0x1ea   :  { %v865_v2 = vpop.f32.mrf.mxu1 }
 0x1eb   :  { %1090 = vst.msk [vmem:[%s2037_s5 + $0x20] sm:$0xff] %vm1085_vm0, %v1041_v63  ;;  %v1044_v3 = vmax.f32 %v874_v0, 0.0  ;;  %v866_v4 = vadd.f32 %v1790_v9, %v865_v2 }
 0x1ed   :  { %1093 = vst.msk [vmem:[%s2037_s5 + $0x38] sm:$0xff] %vm1085_vm0, %v1044_v3  ;;  %v1042_v5 = vmax.f32 %v866_v4, 0.0 }
 0x1ef   :  { %1091 = vst.msk [vmem:[%s2037_s5 + $0x28] sm:$0xff] %vm1085_vm0, %v1042_v5 }
 0x1f4   :  { %v1270_v6 = vpop.f32.mrf.mxu1 }
 0x1f5   :  { %v887_v7 = vadd.f32 %v1270_v6, %v1790_v9 }
 0x1f6   :  { %v878_v8 = vpop.f32.mrf.mxu1 }
 0x1f7   :  { %v1047_v10 = vmax.f32 %v887_v7, 0.0  ;;  %v879_v11 = vadd.f32 %v1790_v9, %v878_v8 }
 0x1f8   :  { %v1271_v12 = vpop.f32.mrf.mxu1 }
 0x1f9   :  { %1096 = vst.msk [vmem:[%s2037_s5 + $0x50] sm:$0xff] %vm1085_vm0, %v1047_v10  ;;  %v1045_v13 = vmax.f32 %v879_v11, 0.0  ;;  %v890_v14 = vadd.f32 %v1271_v12, %v1790_v9 }
 0x1fa   :  { %v881_v15 = vpop.f32.mrf.mxu1 }
 0x1fb   :  { %1094 = vst.msk [vmem:[%s2037_s5 + $0x40] sm:$0xff] %vm1085_vm0, %v1045_v13  ;;  %v1048_v16 = vmax.f32 %v890_v14, 0.0  ;;  %v882_v17 = vadd.f32 %v1790_v9, %v881_v15 }
 0x1fd   :  { %1097 = vst.msk [vmem:[%s2037_s5 + $0x58] sm:$0xff] %vm1085_vm0, %v1048_v16  ;;  %v1046_v18 = vmax.f32 %v882_v17, 0.0 }
 0x1ff   :  { %1095 = vst.msk [vmem:[%s2037_s5 + $0x48] sm:$0xff] %vm1085_vm0, %v1046_v18 }
 0x204   :  { %v1274_v19 = vpop.f32.mrf.mxu1 }
 0x205   :  { %v903_v21 = vadd.f32 %v1274_v19, %v1790_v9 }
 0x206   :  { %v894_v22 = vpop.f32.mrf.mxu1 }
 0x207   :  { %v1051_v23 = vmax.f32 %v903_v21, 0.0  ;;  %v895_v24 = vadd.f32 %v1790_v9, %v894_v22 }
 0x208   :  { %v1275_v25 = vpop.f32.mrf.mxu1 }
 0x209   :  { %1100 = vst.msk [vmem:[%s2037_s5 + $0x70] sm:$0xff] %vm1085_vm0, %v1051_v23  ;;  %v1049_v26 = vmax.f32 %v895_v24, 0.0  ;;  %v906_v27 = vadd.f32 %v1275_v25, %v1790_v9 }
 0x20a   :  { %v897_v28 = vpop.f32.mrf.mxu1 }
 0x20b   :  { %1098 = vst.msk [vmem:[%s2037_s5 + $0x60] sm:$0xff] %vm1085_vm0, %v1049_v26  ;;  %v1052_v30 = vmax.f32 %v906_v27, 0.0  ;;  %v898_v31 = vadd.f32 %v1790_v9, %v897_v28 }
 0x20d   :  { %1101 = vst.msk [vmem:[%s2037_s5 + $0x78] sm:$0xff] %vm1085_vm0, %v1052_v30  ;;  %v1050_v32 = vmax.f32 %v898_v31, 0.0 }
 0x20f   :  { %1099 = vst.msk [vmem:[%s2037_s5 + $0x68] sm:$0xff] %vm1085_vm0, %v1050_v32 }
 0x214   :  { %v1278_v33 = vpop.f32.mrf.mxu1 }
 0x215   :  { %v919_v34 = vadd.f32 %v1278_v33, %v1790_v9 }
 0x216   :  { %v910_v35 = vpop.f32.mrf.mxu1 }
 0x217   :  { %v1055_v36 = vmax.f32 %v919_v34, 0.0  ;;  %v911_v37 = vadd.f32 %v1790_v9, %v910_v35 }
 0x218   :  { %v1279_v38 = vpop.f32.mrf.mxu1 }
 0x219   :  { %1104 = vst.msk [vmem:[%s2037_s5 + $0x90] sm:$0xff] %vm1085_vm0, %v1055_v36  ;;  %v1053_v40 = vmax.f32 %v911_v37, 0.0  ;;  %v922_v41 = vadd.f32 %v1279_v38, %v1790_v9 }
 0x21a   :  { %v913_v42 = vpop.f32.mrf.mxu1 }
 0x21b   :  { %1102 = vst.msk [vmem:[%s2037_s5 + $0x80] sm:$0xff] %vm1085_vm0, %v1053_v40  ;;  %v1056_v43 = vmax.f32 %v922_v41, 0.0  ;;  %v914_v44 = vadd.f32 %v1790_v9, %v913_v42 }
 0x21d   :  { %1105 = vst.msk [vmem:[%s2037_s5 + $0x98] sm:$0xff] %vm1085_vm0, %v1056_v43  ;;  %v1054_v45 = vmax.f32 %v914_v44, 0.0 }
 0x21f   :  { %1103 = vst.msk [vmem:[%s2037_s5 + $0x88] sm:$0xff] %vm1085_vm0, %v1054_v45 }
 0x224   :  { %v1282_v46 = vpop.f32.mrf.mxu1 }
 0x225   :  { %v935_v48 = vadd.f32 %v1282_v46, %v1790_v9 }
 0x226   :  { %v926_v49 = vpop.f32.mrf.mxu1 }
 0x227   :  { %v1059_v50 = vmax.f32 %v935_v48, 0.0  ;;  %v927_v51 = vadd.f32 %v1790_v9, %v926_v49 }
 0x228   :  { %v1283_v29 = vpop.f32.mrf.mxu1 }
 0x229   :  { %1108 = vst.msk [vmem:[%s2037_s5 + $0xb0] sm:$0xff] %vm1085_vm0, %v1059_v50  ;;  %v1057_v52 = vmax.f32 %v927_v51, 0.0  ;;  %v938_v47 = vadd.f32 %v1283_v29, %v1790_v9 }
 0x22a   :  { %v929_v1 = vpop.f32.mrf.mxu1 }
 0x22b   :  { %1106 = vst.msk [vmem:[%s2037_s5 + $0xa0] sm:$0xff] %vm1085_vm0, %v1057_v52  ;;  %v1060_v20 = vmax.f32 %v938_v47, 0.0  ;;  %v930_v39 = vadd.f32 %v1790_v9, %v929_v1 }
 0x22d   :  { %1109 = vst.msk [vmem:[%s2037_s5 + $0xb8] sm:$0xff] %vm1085_vm0, %v1060_v20  ;;  %v1058_v57 = vmax.f32 %v930_v39, 0.0 }
 0x22f   :  { %1107 = vst.msk [vmem:[%s2037_s5 + $0xa8] sm:$0xff] %vm1085_vm0, %v1058_v57 }
 0x234   :  { %v1286_v53 = vpop.f32.mrf.mxu1 }
 0x235   :  { %v951_v54 = vadd.f32 %v1286_v53, %v1790_v9 }
 0x236   :  { %v942_v55 = vpop.f32.mrf.mxu1 }
 0x237   :  { %v1063_v56 = vmax.f32 %v951_v54, 0.0  ;;  %v943_v58 = vadd.f32 %v1790_v9, %v942_v55 }
 0x238   :  { %v1287_v59 = vpop.f32.mrf.mxu1 }
 0x239   :  { %1112 = vst.msk [vmem:[%s2037_s5 + $0xd0] sm:$0xff] %vm1085_vm0, %v1063_v56  ;;  %v1061_v60 = vmax.f32 %v943_v58, 0.0  ;;  %v954_v61 = vadd.f32 %v1287_v59, %v1790_v9 }
 0x23a   :  { %v945_v62 = vpop.f32.mrf.mxu1 }
 0x23b   :  { %1110 = vst.msk [vmem:[%s2037_s5 + $0xc0] sm:$0xff] %vm1085_vm0, %v1061_v60  ;;  %v1064_v63 = vmax.f32 %v954_v61, 0.0  ;;  %v946_v0 = vadd.f32 %v1790_v9, %v945_v62 }
 0x23d   :  { %1113 = vst.msk [vmem:[%s2037_s5 + $0xd8] sm:$0xff] %vm1085_vm0, %v1064_v63  ;;  %v1062_v2 = vmax.f32 %v946_v0, 0.0 }
 0x23f   :  { %1111 = vst.msk [vmem:[%s2037_s5 + $0xc8] sm:$0xff] %vm1085_vm0, %v1062_v2 }
 0x244   :  { %v1290_v3 = vpop.f32.mrf.mxu1 }
 0x245   :  { %v967_v4 = vadd.f32 %v1290_v3, %v1790_v9 }
 0x246   :  { %v958_v5 = vpop.f32.mrf.mxu1 }
 0x247   :  { %v1067_v6 = vmax.f32 %v967_v4, 0.0  ;;  %v959_v7 = vadd.f32 %v1790_v9, %v958_v5 }
 0x248   :  { %v1291_v8 = vpop.f32.mrf.mxu1 }
 0x249   :  { %1116 = vst.msk [vmem:[%s2037_s5 + $0xf0] sm:$0xff] %vm1085_vm0, %v1067_v6  ;;  %v1065_v10 = vmax.f32 %v959_v7, 0.0  ;;  %v970_v11 = vadd.f32 %v1291_v8, %v1790_v9 }
 0x24a   :  { %v961_v12 = vpop.f32.mrf.mxu1 }
 0x24b   :  { %1114 = vst.msk [vmem:[%s2037_s5 + $0xe0] sm:$0xff] %vm1085_vm0, %v1065_v10  ;;  %v1068_v13 = vmax.f32 %v970_v11, 0.0  ;;  %v962_v14 = vadd.f32 %v1790_v9, %v961_v12 }
 0x24d   :  { %1117 = vst.msk [vmem:[%s2037_s5 + $0xf8] sm:$0xff] %vm1085_vm0, %v1068_v13  ;;  %v1066_v15 = vmax.f32 %v962_v14, 0.0 }
 0x24f   :  { %1115 = vst.msk [vmem:[%s2037_s5 + $0xe8] sm:$0xff] %vm1085_vm0, %v1066_v15 }
 0x254   :  { %v1294_v16 = vpop.f32.mrf.mxu1 }
 0x255   :  { %v983_v17 = vadd.f32 %v1294_v16, %v1790_v9 }
 0x256   :  { %v974_v18 = vpop.f32.mrf.mxu1 }
 0x257   :  { %v1071_v19 = vmax.f32 %v983_v17, 0.0  ;;  %v975_v21 = vadd.f32 %v1790_v9, %v974_v18 }
 0x258   :  { %v1295_v22 = vpop.f32.mrf.mxu1 }
 0x259   :  { %1120 = vst.msk [vmem:[%s2037_s5 + $0x110] sm:$0xff] %vm1085_vm0, %v1071_v19  ;;  %v1069_v23 = vmax.f32 %v975_v21, 0.0  ;;  %v986_v24 = vadd.f32 %v1295_v22, %v1790_v9 }
 0x25a   :  { %v977_v25 = vpop.f32.mrf.mxu1 }
 0x25b   :  { %1118 = vst.msk [vmem:[%s2037_s5 + $0x100] sm:$0xff] %vm1085_vm0, %v1069_v23  ;;  %v1072_v26 = vmax.f32 %v986_v24, 0.0  ;;  %v978_v27 = vadd.f32 %v1790_v9, %v977_v25 }
 0x25c   :  { %v1298_v28 = vpop.f32.mrf.mxu1 }
 0x25d   :  { %1121 = vst.msk [vmem:[%s2037_s5 + $0x118] sm:$0xff] %vm1085_vm0, %v1072_v26  ;;  %v1070_v30 = vmax.f32 %v978_v27, 0.0  ;;  %v999_v31 = vadd.f32 %v1298_v28, %v1790_v9 }
 0x25e   :  { %v990_v32 = vpop.f32.mrf.mxu1 }
 0x25f   :  { %1119 = vst.msk [vmem:[%s2037_s5 + $0x108] sm:$0xff] %vm1085_vm0, %v1070_v30  ;;  %v1075_v33 = vmax.f32 %v999_v31, 0.0  ;;  %v991_v34 = vadd.f32 %v1790_v9, %v990_v32 }
 0x260   :  { %v1299_v35 = vpop.f32.mrf.mxu1 }
 0x261   :  { %1124 = vst.msk [vmem:[%s2037_s5 + $0x130] sm:$0xff] %vm1085_vm0, %v1075_v33  ;;  %v1073_v36 = vmax.f32 %v991_v34, 0.0  ;;  %v1002_v37 = vadd.f32 %v1299_v35, %v1790_v9 }
 0x262   :  { %v993_v38 = vpop.f32.mrf.mxu1 }
 0x263   :  { %1122 = vst.msk [vmem:[%s2037_s5 + $0x120] sm:$0xff] %vm1085_vm0, %v1073_v36  ;;  %v1076_v40 = vmax.f32 %v1002_v37, 0.0  ;;  %v994_v41 = vadd.f32 %v1790_v9, %v993_v38 }
 0x264   :  { %v1302_v42 = vpop.f32.mrf.mxu1 }
 0x265   :  { %1125 = vst.msk [vmem:[%s2037_s5 + $0x138] sm:$0xff] %vm1085_vm0, %v1076_v40  ;;  %v1074_v43 = vmax.f32 %v994_v41, 0.0  ;;  %v1015_v44 = vadd.f32 %v1302_v42, %v1790_v9 }
 0x266   :  { %v1006_v45 = vpop.f32.mrf.mxu1 }
 0x267   :  { %1123 = vst.msk [vmem:[%s2037_s5 + $0x128] sm:$0xff] %vm1085_vm0, %v1074_v43  ;;  %v1079_v46 = vmax.f32 %v1015_v44, 0.0  ;;  %v1007_v48 = vadd.f32 %v1790_v9, %v1006_v45 }
 0x268   :  { %v1303_v49 = vpop.f32.mrf.mxu1 }
 0x269   :  { %1128 = vst.msk [vmem:[%s2037_s5 + $0x150] sm:$0xff] %vm1085_vm0, %v1079_v46  ;;  %v1077_v50 = vmax.f32 %v1007_v48, 0.0  ;;  %v1018_v51 = vadd.f32 %v1303_v49, %v1790_v9 }
 0x26a   :  { %v1009_v29 = vpop.f32.mrf.mxu1 }
 0x26b   :  { %1126 = vst.msk [vmem:[%s2037_s5 + $0x140] sm:$0xff] %vm1085_vm0, %v1077_v50  ;;  %v1080_v52 = vmax.f32 %v1018_v51, 0.0  ;;  %v1010_v47 = vadd.f32 %v1790_v9, %v1009_v29 }
 0x26c   :  { %v1306_v1 = vpop.f32.mrf.mxu1 }
 0x26d   :  { %1129 = vst.msk [vmem:[%s2037_s5 + $0x158] sm:$0xff] %vm1085_vm0, %v1080_v52  ;;  %v1078_v20 = vmax.f32 %v1010_v47, 0.0  ;;  %v1031_v39 = vadd.f32 %v1306_v1, %v1790_v9 }
 0x26e   :  { %v1022_v57 = vpop.f32.mrf.mxu1 }
 0x26f   :  { %1127 = vst.msk [vmem:[%s2037_s5 + $0x148] sm:$0xff] %vm1085_vm0, %v1078_v20  ;;  %v1083_v53 = vmax.f32 %v1031_v39, 0.0  ;;  %v1023_v54 = vadd.f32 %v1790_v9, %v1022_v57 }
 0x270   :  { %v1307_v55 = vpop.f32.mrf.mxu1 }
 0x271   :  { %1132 = vst.msk [vmem:[%s2037_s5 + $0x170] sm:$0xff] %vm1085_vm0, %v1083_v53  ;;  %v1081_v56 = vmax.f32 %v1023_v54, 0.0  ;;  %v1034_v58 = vadd.f32 %v1307_v55, %v1790_v9 }
 0x272   :  { %v1025_v59 = vpop.f32.mrf.mxu1 }
 0x273   :  { %1130 = vst.msk [vmem:[%s2037_s5 + $0x160] sm:$0xff] %vm1085_vm0, %v1081_v56  ;;  %v1084_v60 = vmax.f32 %v1034_v58, 0.0  ;;  %v1026_v61 = vadd.f32 %v1790_v9, %v1025_v59 }
 0x275   :  { %1133 = vst.msk [vmem:[%s2037_s5 + $0x178] sm:$0xff] %vm1085_vm0, %v1084_v60  ;;  %v1082_v62 = vmax.f32 %v1026_v61, 0.0 }
 0x277   :  { %1131 = vst.msk [vmem:[%s2037_s5 + $0x168] sm:$0xff] %vm1085_vm0, %v1082_v62 }

// kernel: srcnn1_forward.3
= control target key start
LH: loop header
LB: loop body
LE: loop exit
PB: predicated region body
PF: predicated region fallthrough
CT: control target
= control target key end

     0   :  { %v9969_v0 = vmov 0   ;;  %s9965_s1 = inlined_call_operand.vmem [shape: bf16[1664,128], index: 1, kind: input, shape index: {}]   ;;  %s9966_s0 = inlined_call_operand.vmem [shape: bf16[512,1664], index: 0, kind: input, shape index: {}]   ;;  %s9967_s2 = inlined_call_operand.vmem [shape: f32[1,128], index: 2, kind: input, shape index: {}]   ;;  %s9968_s3 = inlined_call_operand.vmem [shape: f32[512,128], index: 3, kind: output, shape index: {}]  }
   0x1   :  { %3414 = vmatprep.subr.bf16.mxu0 %v9969_v0  ;;  %6146 = vmatprep.subr.bf16.mxu1 %v9969_v0  ;;  %v6179_v1 = vld [vmem:[%s9965_s1 + $0x38] sm:$0xff]   ;;  %v6180_v2 = vld [vmem:[%s9965_s1 + $0x30] sm:$0xff]   ;;  %v6181_v3 = vld [vmem:[%s9965_s1 + $0x28] sm:$0xff]  }
   0x2   :  { %3415 = vmatpush1.bf16.msra.mxu0 %v6179_v1  ;;  %6162 = vmatpush1.bf16.msra.mxu1 %v6179_v1  ;;  %v6182_v4 = vld [vmem:[%s9965_s1 + $0x20] sm:$0xff]   ;;  %v6183_v5 = vld [vmem:[%s9965_s1 + $0x18] sm:$0xff]   ;;  %v6184_v7 = vld [vmem:[%s9965_s1 + $0x10] sm:$0xff]  }
   0x3   :  { %3416 = vmatprep.subr.bf16.mxu0 %v9969_v0  ;;  %6147 = vmatprep.subr.bf16.mxu1 %v9969_v0  ;;  %v6197_v6 = vld [vmem:[%s9966_s0 + $0x4] ss:$52 sps:$4 sm:$0xff]   ;;  %v6185_v9 = vld [vmem:[%s9965_s1 + $0x8] sm:$0xff]   ;;  %v6188_v12 = vld [vmem:[%s9965_s1 + $0x70] sm:$0xff]  }
   0x4   :  { %v6200_v8 = vld [vmem:[%s9966_s0 + $0x9c4] ss:$52 sps:$4 sm:$0xff]   ;;  %3446 = vmatprep.mubr.bf16.mxu0 %v6197_v6  ;;  %v6189_v13 = vld [vmem:[%s9965_s1 + $0x68] sm:$0xff]   ;;  %v6192_v16 = vld [vmem:[%s9965_s1 + $0x50] sm:$0xff]  }
   0x5   :  { %3638 = vmatprep.mubr.bf16.mxu1 %v6200_v8  ;;  %v6186_v10 = vld [vmem:[%s9965_s1] sm:$0xff]   ;;  %v6187_v11 = vld [vmem:[%s9965_s1 + $0x78] sm:$0xff]   ;;  %v6193_v17 = vld [vmem:[%s9965_s1 + $0x48] sm:$0xff]  }
   0x6   :  { %3417 = vmatpush1.bf16.msra.mxu0 %v6180_v2  ;;  %6163 = vmatpush1.bf16.msra.mxu1 %v6180_v2  ;;  %v6190_v14 = vld [vmem:[%s9965_s1 + $0x60] sm:$0xff]   ;;  %v6191_v15 = vld [vmem:[%s9965_s1 + $0x58] sm:$0xff]   ;;  %v6203_v25 = vld [vmem:[%s9965_s1 + $0xb0] sm:$0xff]  }
   0x7   :  { %3418 = vmatprep.subr.bf16.mxu0 %v9969_v0  ;;  %6148 = vmatprep.subr.bf16.mxu1 %v9969_v0  ;;  %v6194_v18 = vld [vmem:[%s9965_s1 + $0x40] sm:$0xff]   ;;  %v6201_v21 = vld [vmem:[%s9965_s1 + $0xb8] sm:$0xff]   ;;  %v6212_v26 = vld [vmem:[%s9965_s1 + $0x130] sm:$0xff]  }
   0x8   :  { %v6195_v19 = vld [vmem:[%s9966_s0] ss:$52 sps:$4 sm:$0xff]   ;;  %v6202_v22 = vld [vmem:[%s9965_s1 + $0x138] sm:$0xff]   ;;  %v6210_v29 = vld [vmem:[%s9965_s1 + $0xa8] sm:$0xff]  }
   0x9   :  { %v6198_v20 = vld [vmem:[%s9966_s0 + $0x9c0] ss:$52 sps:$4 sm:$0xff]   ;;  %v6208_v27 = vld [vmem:[%s9966_s0 + $0x68] ss:$52 sps:$4 sm:$0xff]   ;;  %v6217_v34 = vld [vmem:[%s9966_s0 + $0xd0] ss:$52 sps:$4 sm:$0xff]  }
   0xa   :  { %3419 = vmatpush1.bf16.msra.mxu0 %v6181_v3  ;;  %6164 = vmatpush1.bf16.msra.mxu1 %v6181_v3  ;;  %v6204_v23 = vld [vmem:[%s9966_s0 + $0x6c] ss:$52 sps:$4 sm:$0xff]   ;;  %v6209_v28 = vld [vmem:[%s9966_s0 + $0xa28] ss:$52 sps:$4 sm:$0xff]   ;;  %v6218_v35 = vld [vmem:[%s9966_s0 + $0xa90] ss:$52 sps:$4 sm:$0xff]  }
   0xb   :  { %3420 = vmatprep.subr.bf16.mxu0 %v9969_v0  ;;  %6149 = vmatprep.subr.bf16.mxu1 %v9969_v0  ;;  %v6206_v24 = vld [vmem:[%s9966_s0 + $0xa2c] ss:$52 sps:$4 sm:$0xff]   ;;  %v6213_v30 = vld [vmem:[%s9966_s0 + $0xd4] ss:$52 sps:$4 sm:$0xff]   ;;  %v6219_v37 = vld [vmem:[%s9965_s1 + $0x98] sm:$0xff]  }
   0xc   :  { %v6215_v31 = vld [vmem:[%s9966_s0 + $0xa94] ss:$52 sps:$4 sm:$0xff]   ;;  %v6211_v33 = vld [vmem:[%s9965_s1 + $0xa0] sm:$0xff]   ;;  %v6221_v38 = vld [vmem:[%s9966_s0 + $0x13c] ss:$52 sps:$4 sm:$0xff]  }
   0xd   :  { %v6228_v32 = vld [vmem:[%s9965_s1 + $0x128] sm:$0xff]   ;;  %v6238_v36 = vld [vmem:[%s9965_s1 + $0x120] sm:$0xff]   ;;  %v6223_v39 = vld [vmem:[%s9966_s0 + $0xafc] ss:$52 sps:$4 sm:$0xff]  }
   0xe   :  { %3421 = vmatpush1.bf16.msra.mxu0 %v6182_v4  ;;  %6165 = vmatpush1.bf16.msra.mxu1 %v6182_v4  ;;  %v6254_v40 = vld [vmem:[%s9965_s1 + $0x118] sm:$0xff]   ;;  %v6220_v41 = vld [vmem:[%s9965_s1 + $0x90] sm:$0xff]   ;;  %v6227_v44 = vld [vmem:[%s9965_s1 + $0x88] sm:$0xff]  }
   0xf   :  { %3422 = vmatprep.subr.bf16.mxu0 %v9969_v0  ;;  %6150 = vmatprep.subr.bf16.mxu1 %v9969_v0  ;;  %v6225_v42 = vld [vmem:[%s9966_s0 + $0x138] ss:$52 sps:$4 sm:$0xff]   ;;  %v6264_v47 = vld [vmem:[%s9965_s1 + $0x110] sm:$0xff]   ;;  %v6229_v48 = vld [vmem:[%s9965_s1 + $0x80] sm:$0xff]  }
  0x10   :  { %v6226_v43 = vld [vmem:[%s9966_s0 + $0xaf8] ss:$52 sps:$4 sm:$0xff]   ;;  %v6234_v49 = vld [vmem:[%s9966_s0 + $0x1a0] ss:$52 sps:$4 sm:$0xff]   ;;  %v6243_v57 = vld [vmem:[%s9966_s0 + $0x208] ss:$52 sps:$4 sm:$0xff]  }
  0x11   :  { %v6230_v45 = vld [vmem:[%s9966_s0 + $0x1a4] ss:$52 sps:$4 sm:$0xff]   ;;  %v6235_v50 = vld [vmem:[%s9966_s0 + $0xb60] ss:$52 sps:$4 sm:$0xff]   ;;  %v6278_v51 = vld [vmem:[%s9965_s1 + $0x108] sm:$0xff]  }
  0x12   :  { %3423 = vmatpush1.bf16.msra.mxu0 %v6183_v5  ;;  %6166 = vmatpush1.bf16.msra.mxu1 %v6183_v5  ;;  %v6232_v46 = vld [vmem:[%s9966_s0 + $0xb64] ss:$52 sps:$4 sm:$0xff]   ;;  %v6239_v53 = vld [vmem:[%s9966_s0 + $0x20c] ss:$52 sps:$4 sm:$0xff]   ;;  %v6237_v56 = vld [vmem:[%s9965_s1 + $0xf0] sm:$0xff]  }
  0x13   :  { %3424 = vmatprep.subr.bf16.mxu0 %v9969_v0  ;;  %6151 = vmatprep.subr.bf16.mxu1 %v9969_v0  ;;  %v6236_v52 = vld [vmem:[%s9965_s1 + $0xf8] sm:$0xff]   ;;  %v6241_v54 = vld [vmem:[%s9966_s0 + $0xbcc] ss:$52 sps:$4 sm:$0xff]   ;;  %v6247_v60 = vld [vmem:[%s9966_s0 + $0x274] ss:$52 sps:$4 sm:$0xff]  }
  0x14   :  { %v6286_v55 = vld [vmem:[%s9965_s1 + $0x100] sm:$0xff]   ;;  %v6244_v58 = vld [vmem:[%s9966_s0 + $0xbc8] ss:$52 sps:$4 sm:$0xff]   ;;  %v6307_v3 = vld [vmem:[%s9965_s1 + $0x170] sm:$0xff]  }
  0x15   :  { %v6245_v59 = vld [vmem:[%s9965_s1 + $0xe8] sm:$0xff]   ;;  %v6299_v62 = vld [vmem:[%s9965_s1 + $0x178] sm:$0xff]   ;;  %v6246_v63 = vld [vmem:[%s9965_s1 + $0xe0] sm:$0xff]  }
  0x16   :  { %3425 = vmatpush1.bf16.msra.mxu0 %v6184_v7  ;;  %6167 = vmatpush1.bf16.msra.mxu1 %v6184_v7  ;;  %v6249_v61 = vld [vmem:[%s9966_s0 + $0xc34] ss:$52 sps:$4 sm:$0xff]   ;;  %v6251_v1 = vld [vmem:[%s9966_s0 + $0x270] ss:$52 sps:$4 sm:$0xff]   ;;  %v6253_v4 = vld [vmem:[%s9965_s1 + $0xd8] sm:$0xff]  }
  0x17   :  { %3426 = vmatprep.subr.bf16.mxu0 %v9969_v0  ;;  %6152 = vmatprep.subr.bf16.mxu1 %v9969_v0  ;;  %v6252_v2 = vld [vmem:[%s9966_s0 + $0xc30] ss:$52 sps:$4 sm:$0xff]   ;;  %v6321_v7 = vld [vmem:[%s9965_s1 + $0x168] sm:$0xff]  }
  0x18   :  { %v6256_v5 = vld [vmem:[%s9966_s0 + $0x2dc] ss:$52 sps:$4 sm:$0xff]  }
  0x19   :  { %v6258_v6 = vld [vmem:[%s9966_s0 + $0xc9c] ss:$52 sps:$4 sm:$0xff]  }
  0x1a   :  { %3427 = vmatpush1.bf16.msra.mxu0 %v6185_v9  ;;  %6168 = vmatpush1.bf16.msra.mxu1 %v6185_v9  ;;  %v6255_v8 = vld [vmem:[%s9965_s1 + $0xd0] sm:$0xff]   ;;  %v6260_v9 = vld [vmem:[%s9966_s0 + $0x2d8] ss:$52 sps:$4 sm:$0xff]  }
  0x1b   :  { %3428 = vmatprep.subr.bf16.mxu0 %v9969_v0  ;;  %6153 = vmatprep.subr.bf16.mxu1 %v9969_v0 }
  0x1e   :  { %3429 = vmatpush1.bf16.msra.mxu0 %v6186_v10  ;;  %6169 = vmatpush1.bf16.msra.mxu1 %v6186_v10  ;;  %v6261_v10 = vld [vmem:[%s9966_s0 + $0xc98] ss:$52 sps:$4 sm:$0xff]  }
  0x1f   :  { %3430 = vmatprep.subr.bf16.mxu0 %v9969_v0  ;;  %6154 = vmatprep.subr.bf16.mxu1 %v9969_v0 }
  0x22   :  { %3431 = vmatpush2.bf16.msra.mxu0 %v6187_v11  ;;  %6170 = vmatpush2.bf16.msra.mxu1 %v6187_v11  ;;  %v6262_v11 = vld [vmem:[%s9965_s1 + $0xc8] sm:$0xff]  }
  0x23   :  { %3432 = vmatprep.subr.bf16.mxu0 %v9969_v0  ;;  %6155 = vmatprep.subr.bf16.mxu1 %v9969_v0 }
  0x26   :  { %3433 = vmatpush2.bf16.msra.mxu0 %v6188_v12  ;;  %6171 = vmatpush2.bf16.msra.mxu1 %v6188_v12  ;;  %v6265_v12 = vld [vmem:[%s9966_s0 + $0x344] ss:$52 sps:$4 sm:$0xff]  }
  0x27   :  { %3434 = vmatprep.subr.bf16.mxu0 %v9969_v0  ;;  %6156 = vmatprep.subr.bf16.mxu1 %v9969_v0 }
  0x2a   :  { %3435 = vmatpush2.bf16.msra.mxu0 %v6189_v13  ;;  %6172 = vmatpush2.bf16.msra.mxu1 %v6189_v13  ;;  %v6269_v13 = vld [vmem:[%s9966_s0 + $0xc] ss:$52 sps:$4 sm:$0xff]  }
  0x2b   :  { %3436 = vmatprep.subr.bf16.mxu0 %v9969_v0  ;;  %6157 = vmatprep.subr.bf16.mxu1 %v9969_v0 }
  0x2e   :  { %3437 = vmatpush2.bf16.msra.mxu0 %v6190_v14  ;;  %6173 = vmatpush2.bf16.msra.mxu1 %v6190_v14  ;;  %v6329_v14 = vld [vmem:[%s9965_s1 + $0x160] sm:$0xff]  }
  0x2f   :  { %3438 = vmatprep.subr.bf16.mxu0 %v9969_v0  ;;  %6158 = vmatprep.subr.bf16.mxu1 %v9969_v0 }
  0x32   :  { %3439 = vmatpush2.bf16.msra.mxu0 %v6191_v15  ;;  %6174 = vmatpush2.bf16.msra.mxu1 %v6191_v15  ;;  %v6263_v15 = vld [vmem:[%s9965_s1 + $0xc0] sm:$0xff]  }
  0x33   :  { %3440 = vmatprep.subr.bf16.mxu0 %v9969_v0  ;;  %6159 = vmatprep.subr.bf16.mxu1 %v9969_v0 }
  0x36   :  { %3441 = vmatpush2.bf16.msra.mxu0 %v6192_v16  ;;  %6175 = vmatpush2.bf16.msra.mxu1 %v6192_v16  ;;  %v6267_v16 = vld [vmem:[%s9966_s0 + $0x8] ss:$52 sps:$4 sm:$0xff]  }
  0x37   :  { %3442 = vmatprep.subr.bf16.mxu0 %v9969_v0  ;;  %6160 = vmatprep.subr.bf16.mxu1 %v9969_v0 }
  0x3a   :  { %3443 = vmatpush2.bf16.msra.mxu0 %v6193_v17  ;;  %6176 = vmatpush2.bf16.msra.mxu1 %v6193_v17  ;;  %v6270_v17 = vld [vmem:[%s9966_s0 + $0x340] ss:$52 sps:$4 sm:$0xff]  }
  0x3b   :  { %3444 = vmatprep.subr.bf16.mxu0 %v9969_v0  ;;  %6161 = vmatprep.subr.bf16.mxu1 %v9969_v0 }
  0x3e   :  { %3445 = vmatpush2.bf16.msra.mxu0 %v6194_v18  ;;  %6177 = vmatpush2.bf16.msra.mxu1 %v6194_v18  ;;  %v6342_v18 = vld [vmem:[%s9965_s1 + $0x158] sm:$0xff]  }
  0x3f   :  { %3703 = vmatprep.subr.bf16.mxu1 %v9969_v0  ;;  %3992 = vmatprep.subr.bf16.mxu0 %v9969_v0 }
  0x41   :  { %3447 = vmatmul.mubr.bf16.vlgmr.msra.gmra.mxu0 %v6195_v19  ;;  %3639 = vmatmul.mubr.bf16.vlgmr.msra.gmra.mxu1 %v6198_v20  ;;  %v6271_v19 = vld [vmem:[%s9965_s1 + $0x1b8] sm:$0xff]   ;;  %v6272_v20 = vld [vmem:[%s9966_s0 + $0x3ac] ss:$52 sps:$4 sm:$0xff]  }
  0x42   :  { %3704 = vmatpush1.bf16.msra.mxu1 %v6201_v21  ;;  %3993 = vmatpush1.bf16.msra.mxu0 %v6202_v22  ;;  %v6274_v21 = vld [vmem:[%s9966_s0 + $0x74] ss:$52 sps:$4 sm:$0xff]  }
  0x43   :  { %3705 = vmatprep.subr.bf16.mxu1 %v9969_v0  ;;  %3454 = vmatprep.mubr.bf16.mxu0 %v6204_v23  ;;  %v6350_v22 = vld [vmem:[%s9965_s1 + $0x150] sm:$0xff]  }
  0x44   :  { %3646 = vmatprep.mubr.bf16.mxu1 %v6206_v24  ;;  %3994 = vmatprep.subr.bf16.mxu0 %v9969_v0  ;;  %v6285_v23 = vld [vmem:[%s9965_s1 + $0x1b0] sm:$0xff]   ;;  %v6276_v24 = vld [vmem:[%s9966_s0 + $0x3a8] ss:$52 sps:$4 sm:$0xff]  }
  0x46   :  { %3706 = vmatpush1.bf16.msra.mxu1 %v6203_v25  ;;  %3995 = vmatpush1.bf16.msra.mxu0 %v6212_v26  ;;  %v6277_v25 = vld [vmem:[%s9966_s0 + $0x70] ss:$52 sps:$4 sm:$0xff]   ;;  %v6279_v26 = vld [vmem:[%s9966_s0 + $0x414] ss:$52 sps:$4 sm:$0xff]  }
  0x47   :  { %3707 = vmatprep.subr.bf16.mxu1 %v9969_v0  ;;  %3996 = vmatprep.subr.bf16.mxu0 %v9969_v0 }
  0x49   :  { %3455 = vmatmul.mubr.bf16.gmra.mxu0 %v6208_v27  ;;  %3647 = vmatmul.mubr.bf16.gmra.mxu1 %v6209_v28  ;;  %v6281_v27 = vld [vmem:[%s9966_s0 + $0xdc] ss:$52 sps:$4 sm:$0xff]   ;;  %v6300_v28 = vld [vmem:[%s9965_s1 + $0x1a8] sm:$0xff]  }
  0x4a   :  { %3708 = vmatpush1.bf16.msra.mxu1 %v6210_v29  ;;  %3462 = vmatprep.mubr.bf16.mxu0 %v6213_v30  ;;  %v6364_v29 = vld [vmem:[%s9965_s1 + $0x148] sm:$0xff]   ;;  %v6314_v30 = vld [vmem:[%s9965_s1 + $0x1a0] sm:$0xff]  }
  0x4b   :  { %3709 = vmatprep.subr.bf16.mxu1 %v9969_v0  ;;  %3654 = vmatprep.mubr.bf16.mxu1 %v6215_v31  ;;  %v6372_v31 = vld [vmem:[%s9965_s1 + $0x140] sm:$0xff]  }
  0x4c   :  { %3997 = vmatpush1.bf16.msra.mxu0 %v6228_v32  ;;  %v6283_v32 = vld [vmem:[%s9966_s0 + $0x410] ss:$52 sps:$4 sm:$0xff]  }
  0x4d   :  { %3998 = vmatprep.subr.bf16.mxu0 %v9969_v0 }
  0x4e   :  { %3710 = vmatpush1.bf16.msra.mxu1 %v6211_v33  ;;  %v6284_v33 = vld [vmem:[%s9966_s0 + $0xd8] ss:$52 sps:$4 sm:$0xff]  }
  0x4f   :  { %3711 = vmatprep.subr.bf16.mxu1 %v9969_v0 }
  0x50   :  { %3999 = vmatpush1.bf16.msra.mxu0 %v6238_v36  ;;  %v6328_v36 = vld [vmem:[%s9965_s1 + $0x198] sm:$0xff]  }
  0x51   :  { %3463 = vmatmul.mubr.bf16.gmra.mxu0 %v6217_v34  ;;  %3655 = vmatmul.mubr.bf16.gmra.mxu1 %v6218_v35  ;;  %v6287_v34 = vld [vmem:[%s9966_s0 + $0x47c] ss:$52 sps:$4 sm:$0xff]   ;;  %v6289_v35 = vld [vmem:[%s9966_s0 + $0x144] ss:$52 sps:$4 sm:$0xff]  }
  0x52   :  { %3712 = vmatpush1.bf16.msra.mxu1 %v6219_v37  ;;  %3470 = vmatprep.mubr.bf16.mxu0 %v6221_v38  ;;  %v6343_v37 = vld [vmem:[%s9965_s1 + $0x190] sm:$0xff]   ;;  %v6291_v38 = vld [vmem:[%s9966_s0 + $0x478] ss:$52 sps:$4 sm:$0xff]  }
  0x53   :  { %3713 = vmatprep.subr.bf16.mxu1 %v9969_v0  ;;  %3662 = vmatprep.mubr.bf16.mxu1 %v6223_v39  ;;  %v6292_v39 = vld [vmem:[%s9966_s0 + $0x140] ss:$52 sps:$4 sm:$0xff]  }
  0x54   :  { %4000 = vmatprep.subr.bf16.mxu0 %v9969_v0 }
  0x55   :  { %4001 = vmatpush1.bf16.msra.mxu0 %v6254_v40  ;;  %v6293_v40 = vld [vmem:[%s9966_s0 + $0x4e4] ss:$52 sps:$4 sm:$0xff]  }
  0x56   :  { %3714 = vmatpush1.bf16.msra.mxu1 %v6220_v41  ;;  %4002 = vmatprep.subr.bf16.mxu0 %v9969_v0  ;;  %v6295_v41 = vld [vmem:[%s9966_s0 + $0x1ac] ss:$52 sps:$4 sm:$0xff]  }
  0x57   :  { %3715 = vmatprep.subr.bf16.mxu1 %v9969_v0 }
  0x59   :  { %3471 = vmatmul.mubr.bf16.gmra.mxu0 %v6225_v42  ;;  %3663 = vmatmul.mubr.bf16.gmra.mxu1 %v6226_v43  ;;  %v6357_v42 = vld [vmem:[%s9965_s1 + $0x188] sm:$0xff]   ;;  %v6371_v43 = vld [vmem:[%s9965_s1 + $0x180] sm:$0xff]  }
  0x5a   :  { %3716 = vmatpush1.bf16.msra.mxu1 %v6227_v44  ;;  %3478 = vmatprep.mubr.bf16.mxu0 %v6230_v45  ;;  %v6297_v44 = vld [vmem:[%s9966_s0 + $0x4e0] ss:$52 sps:$4 sm:$0xff]   ;;  %v6298_v45 = vld [vmem:[%s9966_s0 + $0x1a8] ss:$52 sps:$4 sm:$0xff]  }
  0x5b   :  { %3717 = vmatprep.subr.bf16.mxu1 %v9969_v0  ;;  %3670 = vmatprep.mubr.bf16.mxu1 %v6232_v46  ;;  %v6301_v46 = vld [vmem:[%s9966_s0 + $0x54c] ss:$52 sps:$4 sm:$0xff]  }
  0x5c   :  { %4003 = vmatpush1.bf16.msra.mxu0 %v6264_v47  ;;  %v6303_v47 = vld [vmem:[%s9966_s0 + $0x214] ss:$52 sps:$4 sm:$0xff]  }
  0x5d   :  { %4004 = vmatprep.subr.bf16.mxu0 %v9969_v0 }
  0x5e   :  { %3718 = vmatpush1.bf16.msra.mxu1 %v6229_v48  ;;  %v6385_v48 = vld [vmem:[%s9965_s1 + $0x1f8] sm:$0xff]  }
  0x5f   :  { %3719 = vmatprep.subr.bf16.mxu1 %v9969_v0 }
  0x60   :  { %4005 = vmatpush1.bf16.msra.mxu0 %v6278_v51  ;;  %v6306_v51 = vld [vmem:[%s9966_s0 + $0x210] ss:$52 sps:$4 sm:$0xff]  }
  0x61   :  { %3479 = vmatmul.mubr.bf16.gmra.mxu0 %v6234_v49  ;;  %3671 = vmatmul.mubr.bf16.gmra.mxu1 %v6235_v50  ;;  %v6399_v49 = vld [vmem:[%s9965_s1 + $0x1f0] sm:$0xff]   ;;  %v6305_v50 = vld [vmem:[%s9966_s0 + $0x548] ss:$52 sps:$4 sm:$0xff]  }
  0x62   :  { %3720 = vmatpush2.bf16.msra.mxu1 %v6236_v52  ;;  %3486 = vmatprep.mubr.bf16.mxu0 %v6239_v53  ;;  %v6308_v52 = vld [vmem:[%s9966_s0 + $0x5b4] ss:$52 sps:$4 sm:$0xff]   ;;  %v6310_v53 = vld [vmem:[%s9966_s0 + $0x27c] ss:$52 sps:$4 sm:$0xff]  }
  0x63   :  { %3721 = vmatprep.subr.bf16.mxu1 %v9969_v0  ;;  %3678 = vmatprep.mubr.bf16.mxu1 %v6241_v54  ;;  %v6413_v54 = vld [vmem:[%s9965_s1 + $0x1e8] sm:$0xff]  }
  0x64   :  { %4006 = vmatprep.subr.bf16.mxu0 %v9969_v0 }
  0x65   :  { %4007 = vmatpush1.bf16.msra.mxu0 %v6286_v55  ;;  %v6312_v55 = vld [vmem:[%s9966_s0 + $0x5b0] ss:$52 sps:$4 sm:$0xff]  }
  0x66   :  { %3722 = vmatpush2.bf16.msra.mxu1 %v6237_v56  ;;  %4008 = vmatprep.subr.bf16.mxu0 %v9969_v0  ;;  %v6313_v56 = vld [vmem:[%s9966_s0 + $0x278] ss:$52 sps:$4 sm:$0xff]  }
  0x67   :  { %3723 = vmatprep.subr.bf16.mxu1 %v9969_v0 }
  0x69   :  { %3487 = vmatmul.mubr.bf16.gmra.mxu0 %v6243_v57  ;;  %3679 = vmatmul.mubr.bf16.gmra.mxu1 %v6244_v58  ;;  %v6315_v57 = vld [vmem:[%s9966_s0 + $0x61c] ss:$52 sps:$4 sm:$0xff]   ;;  %v6317_v58 = vld [vmem:[%s9966_s0 + $0x2e4] ss:$52 sps:$4 sm:$0xff]  }
  0x6a   :  { %3724 = vmatpush2.bf16.msra.mxu1 %v6245_v59  ;;  %3494 = vmatprep.mubr.bf16.mxu0 %v6247_v60  ;;  %v6427_v59 = vld [vmem:[%s9965_s1 + $0x1e0] sm:$0xff]   ;;  %v6319_v60 = vld [vmem:[%s9966_s0 + $0x618] ss:$52 sps:$4 sm:$0xff]  }
  0x6b   :  { %3725 = vmatprep.subr.bf16.mxu1 %v9969_v0  ;;  %3686 = vmatprep.mubr.bf16.mxu1 %v6249_v61  ;;  %v6320_v61 = vld [vmem:[%s9966_s0 + $0x2e0] ss:$52 sps:$4 sm:$0xff]  }
  0x6c   :  { %4009 = vmatpush2.bf16.msra.mxu0 %v6299_v62  ;;  %v6322_v62 = vld [vmem:[%s9966_s0 + $0x684] ss:$52 sps:$4 sm:$0xff]  }
  0x6d   :  { %4010 = vmatprep.subr.bf16.mxu0 %v9969_v0 }
  0x6e   :  { %3726 = vmatpush2.bf16.msra.mxu1 %v6246_v63  ;;  %v6324_v63 = vld [vmem:[%s9966_s0 + $0x34c] ss:$52 sps:$4 sm:$0xff]  }
  0x6f   :  { %3727 = vmatprep.subr.bf16.mxu1 %v9969_v0 }
  0x70   :  { %4011 = vmatpush2.bf16.msra.mxu0 %v6307_v3  ;;  %v6330_v3 = vld [vmem:[%s9966_s0 + $0x6ec] ss:$52 sps:$4 sm:$0xff]  }
  0x71   :  { %3495 = vmatmul.mubr.bf16.gmra.mxu0 %v6251_v1  ;;  %3687 = vmatmul.mubr.bf16.gmra.mxu1 %v6252_v2  ;;  %v6326_v1 = vld [vmem:[%s9966_s0 + $0x680] ss:$52 sps:$4 sm:$0xff]   ;;  %v6327_v2 = vld [vmem:[%s9966_s0 + $0x348] ss:$52 sps:$4 sm:$0xff]  }
  0x72   :  { %3728 = vmatpush2.bf16.msra.mxu1 %v6253_v4  ;;  %3502 = vmatprep.mubr.bf16.mxu0 %v6256_v5  ;;  %v6332_v4 = vld [vmem:[%s9966_s0 + $0x3b4] ss:$52 sps:$4 sm:$0xff]   ;;  %v6441_v5 = vld [vmem:[%s9965_s1 + $0x1d8] sm:$0xff]  }
  0x73   :  { %3729 = vmatprep.subr.bf16.mxu1 %v9969_v0  ;;  %3694 = vmatprep.mubr.bf16.mxu1 %v6258_v6  ;;  %v6334_v6 = vld [vmem:[%s9966_s0 + $0x6e8] ss:$52 sps:$4 sm:$0xff]  }
  0x74   :  { %4012 = vmatprep.subr.bf16.mxu0 %v9969_v0 }
  0x75   :  { %4013 = vmatpush2.bf16.msra.mxu0 %v6321_v7  ;;  %v6335_v7 = vld [vmem:[%s9966_s0 + $0x3b0] ss:$52 sps:$4 sm:$0xff]  }
  0x76   :  { %3730 = vmatpush2.bf16.msra.mxu1 %v6255_v8  ;;  %4014 = vmatprep.subr.bf16.mxu0 %v9969_v0  ;;  %v6336_v8 = vld [vmem:[%s9966_s0 + $0x754] ss:$52 sps:$4 sm:$0xff]  }
  0x77   :  { %3731 = vmatprep.subr.bf16.mxu1 %v9969_v0 }
  0x79   :  { %3503 = vmatmul.mubr.bf16.gmra.mxu0 %v6260_v9  ;;  %3695 = vmatmul.mubr.bf16.gmra.mxu1 %v6261_v10  ;;  %v6338_v9 = vld [vmem:[%s9966_s0 + $0x41c] ss:$52 sps:$4 sm:$0xff]  }
  0x7a   :  { %3732 = vmatpush2.bf16.msra.mxu1 %v6262_v11  ;;  %3510 = vmatprep.mubr.bf16.mxu0 %v6265_v12  ;;  %v6340_v10 = vld [vmem:[%s9966_s0 + $0x750] ss:$52 sps:$4 sm:$0xff]   ;;  %v6341_v11 = vld [vmem:[%s9966_s0 + $0x418] ss:$52 sps:$4 sm:$0xff]  }
  0x7b   :  { %3733 = vmatprep.subr.bf16.mxu1 %v9969_v0  ;;  %3735 = vmatprep.mubr.bf16.mxu1 %v6269_v13  ;;  %v6344_v12 = vld [vmem:[%s9966_s0 + $0x7bc] ss:$52 sps:$4 sm:$0xff]   ;;  %v6346_v13 = vld [vmem:[%s9966_s0 + $0x484] ss:$52 sps:$4 sm:$0xff]  }
  0x7c   :  { %4015 = vmatpush2.bf16.msra.mxu0 %v6329_v14  ;;  %v6455_v14 = vld [vmem:[%s9965_s1 + $0x1d0] sm:$0xff]  }
  0x7d   :  { %4016 = vmatprep.subr.bf16.mxu0 %v9969_v0 }
  0x7e   :  { %3734 = vmatpush2.bf16.msra.mxu1 %v6263_v15  ;;  %v6348_v15 = vld [vmem:[%s9966_s0 + $0x7b8] ss:$52 sps:$4 sm:$0xff]  }
  0x7f   :  { %4281 = vmatprep.subr.bf16.mxu1 %v9969_v0 }
  0x80   :  { %4017 = vmatpush2.bf16.msra.mxu0 %v6342_v18  ;;  %v6353_v18 = vld [vmem:[%s9966_s0 + $0x4ec] ss:$52 sps:$4 sm:$0xff]  }
  0x81   :  { %3511 = vmatmul.mubr.bf16.gmra.mxu0 %v6270_v17  ;;  %3736 = vmatmul.mubr.bf16.vlgmr.msra.gmra.mxu1 %v6267_v16  ;;  %v6349_v16 = vld [vmem:[%s9966_s0 + $0x480] ss:$52 sps:$4 sm:$0xff]   ;;  %v6351_v17 = vld [vmem:[%s9966_s0 + $0x824] ss:$52 sps:$4 sm:$0xff]  }
  0x82   :  { %4282 = vmatpush1.bf16.msra.mxu1 %v6271_v19  ;;  %3518 = vmatprep.mubr.bf16.mxu0 %v6272_v20  ;;  %v6355_v19 = vld [vmem:[%s9966_s0 + $0x820] ss:$52 sps:$4 sm:$0xff]   ;;  %v6356_v20 = vld [vmem:[%s9966_s0 + $0x4e8] ss:$52 sps:$4 sm:$0xff]  }
  0x83   :  { %3743 = vmatprep.mubr.bf16.mxu1 %v6274_v21  ;;  %4283 = vmatprep.subr.bf16.mxu1 %v9969_v0  ;;  %v6358_v21 = vld [vmem:[%s9966_s0 + $0x88c] ss:$52 sps:$4 sm:$0xff]  }
  0x84   :  { %4018 = vmatprep.subr.bf16.mxu0 %v9969_v0 }
  0x85   :  { %4019 = vmatpush2.bf16.msra.mxu0 %v6350_v22  ;;  %v6360_v22 = vld [vmem:[%s9966_s0 + $0x554] ss:$52 sps:$4 sm:$0xff]  }
  0x86   :  { %4284 = vmatpush1.bf16.msra.mxu1 %v6285_v23  ;;  %4020 = vmatprep.subr.bf16.mxu0 %v9969_v0  ;;  %v6469_v23 = vld [vmem:[%s9965_s1 + $0x1c8] sm:$0xff]  }
  0x87   :  { %4285 = vmatprep.subr.bf16.mxu1 %v9969_v0 }
  0x89   :  { %3519 = vmatmul.mubr.bf16.gmra.mxu0 %v6276_v24  ;;  %3744 = vmatmul.mubr.bf16.gmra.mxu1 %v6277_v25  ;;  %v6362_v24 = vld [vmem:[%s9966_s0 + $0x888] ss:$52 sps:$4 sm:$0xff]   ;;  %v6363_v25 = vld [vmem:[%s9966_s0 + $0x550] ss:$52 sps:$4 sm:$0xff]  }
  0x8a   :  { %3526 = vmatprep.mubr.bf16.mxu0 %v6279_v26  ;;  %3751 = vmatprep.mubr.bf16.mxu1 %v6281_v27  ;;  %v6365_v26 = vld [vmem:[%s9966_s0 + $0x8f4] ss:$52 sps:$4 sm:$0xff]   ;;  %v6367_v27 = vld [vmem:[%s9966_s0 + $0x5bc] ss:$52 sps:$4 sm:$0xff]  }
  0x8b   :  { %4286 = vmatpush1.bf16.msra.mxu1 %v6300_v28  ;;  %4021 = vmatpush2.bf16.msra.mxu0 %v6364_v29  ;;  %v6369_v28 = vld [vmem:[%s9966_s0 + $0x8f0] ss:$52 sps:$4 sm:$0xff]   ;;  %v6370_v29 = vld [vmem:[%s9966_s0 + $0x5b8] ss:$52 sps:$4 sm:$0xff]  }
  0x8c   :  { %4287 = vmatprep.subr.bf16.mxu1 %v9969_v0  ;;  %4022 = vmatprep.subr.bf16.mxu0 %v9969_v0 }
  0x8f   :  { %4288 = vmatpush1.bf16.msra.mxu1 %v6314_v30  ;;  %4023 = vmatpush2.bf16.msra.mxu0 %v6372_v31  ;;  %v6373_v30 = vld [vmem:[%s9966_s0 + $0x95c] ss:$52 sps:$4 sm:$0xff]   ;;  %v6375_v31 = vld [vmem:[%s9966_s0 + $0x624] ss:$52 sps:$4 sm:$0xff]  }
  0x90   :  { %4289 = vmatprep.subr.bf16.mxu1 %v9969_v0  ;;  %4570 = vmatprep.subr.bf16.mxu0 %v9969_v0 }
  0x91   :  { %3527 = vmatmul.mubr.bf16.gmra.mxu0 %v6283_v32  ;;  %3752 = vmatmul.mubr.bf16.gmra.mxu1 %v6284_v33  ;;  %v6483_v32 = vld [vmem:[%s9965_s1 + $0x1c0] sm:$0xff]   ;;  %v6377_v33 = vld [vmem:[%s9966_s0 + $0x958] ss:$52 sps:$4 sm:$0xff]  }
  0x92   :  { %3534 = vmatprep.mubr.bf16.mxu0 %v6287_v34  ;;  %3759 = vmatprep.mubr.bf16.mxu1 %v6289_v35  ;;  %v6378_v34 = vld [vmem:[%s9966_s0 + $0x620] ss:$52 sps:$4 sm:$0xff]  }
  0x93   :  { %4290 = vmatpush1.bf16.msra.mxu1 %v6328_v36  ;;  %v6379_v35 = vld [vmem:[%s9966_s0 + $0x68c] ss:$52 sps:$4 sm:$0xff]   ;;  %v6383_v36 = vld [vmem:[%s9966_s0 + $0x14] ss:$52 sps:$4 sm:$0xff]  }
  0x94   :  { %4291 = vmatprep.subr.bf16.mxu1 %v9969_v0 }
  0x97   :  { %4292 = vmatpush1.bf16.msra.mxu1 %v6343_v37  ;;  %v6381_v37 = vld [vmem:[%s9966_s0 + $0x10] ss:$52 sps:$4 sm:$0xff]  }
  0x98   :  { %4293 = vmatprep.subr.bf16.mxu1 %v9969_v0 }
  0x99   :  { %3535 = vmatmul.mubr.bf16.gmra.mxu0 %v6291_v38  ;;  %3760 = vmatmul.mubr.bf16.gmra.mxu1 %v6292_v39  ;;  %v6384_v38 = vld [vmem:[%s9966_s0 + $0x688] ss:$52 sps:$4 sm:$0xff]  }
  0x9a   :  { %3542 = vmatprep.mubr.bf16.mxu0 %v6293_v40  ;;  %3767 = vmatprep.mubr.bf16.mxu1 %v6295_v41  ;;  %v6386_v39 = vld [vmem:[%s9965_s1 + $0x238] sm:$0xff]   ;;  %v6387_v40 = vld [vmem:[%s9966_s0 + $0x6f4] ss:$52 sps:$4 sm:$0xff]  }
  0x9b   :  { %4294 = vmatpush1.bf16.msra.mxu1 %v6357_v42  ;;  %v6389_v41 = vld [vmem:[%s9966_s0 + $0x7c] ss:$52 sps:$4 sm:$0xff]  }
  0x9c   :  { %4295 = vmatprep.subr.bf16.mxu1 %v9969_v0 }
  0x9f   :  { %4296 = vmatpush1.bf16.msra.mxu1 %v6371_v43 }
  0xa0   :  { %4297 = vmatprep.subr.bf16.mxu1 %v9969_v0 }
  0xa1   :  { %3543 = vmatmul.mubr.bf16.gmra.mxu0 %v6297_v44  ;;  %3768 = vmatmul.mubr.bf16.gmra.mxu1 %v6298_v45  ;;  %v6400_v44 = vld [vmem:[%s9965_s1 + $0x230] sm:$0xff]  }
  0xa2   :  { %3550 = vmatprep.mubr.bf16.mxu0 %v6301_v46  ;;  %3775 = vmatprep.mubr.bf16.mxu1 %v6303_v47  ;;  %v6391_v47 = vld [vmem:[%s9966_s0 + $0x6f0] ss:$52 sps:$4 sm:$0xff]  }
  0xa3   :  { %4298 = vmatpush2.bf16.msra.mxu1 %v6385_v48  ;;  %v6392_v48 = vld [vmem:[%s9966_s0 + $0x78] ss:$52 sps:$4 sm:$0xff]  }
  0xa4   :  { %4299 = vmatprep.subr.bf16.mxu1 %v9969_v0 }
  0xa7   :  { %4300 = vmatpush2.bf16.msra.mxu1 %v6399_v49 }
  0xa8   :  { %4301 = vmatprep.subr.bf16.mxu1 %v9969_v0 }
  0xa9   :  { %3551 = vmatmul.mubr.bf16.gmra.mxu0 %v6305_v50  ;;  %3776 = vmatmul.mubr.bf16.gmra.mxu1 %v6306_v51  ;;  %v6393_v51 = vld [vmem:[%s9966_s0 + $0x75c] ss:$52 sps:$4 sm:$0xff]  }
  0xaa   :  { %3558 = vmatprep.mubr.bf16.mxu0 %v6308_v52  ;;  %3783 = vmatprep.mubr.bf16.mxu1 %v6310_v53  ;;  %v6395_v52 = vld [vmem:[%s9966_s0 + $0xe4] ss:$52 sps:$4 sm:$0xff]  }
  0xab   :  { %4302 = vmatpush2.bf16.msra.mxu1 %v6413_v54 }
  0xac   :  { %4303 = vmatprep.subr.bf16.mxu1 %v9969_v0 }
  0xaf   :  { %4304 = vmatpush2.bf16.msra.mxu1 %v6427_v59 }
  0xb0   :  { %4305 = vmatprep.subr.bf16.mxu1 %v9969_v0 }
  0xb1   :  { %3559 = vmatmul.mubr.bf16.gmra.mxu0 %v6312_v55  ;;  %3784 = vmatmul.mubr.bf16.gmra.mxu1 %v6313_v56  ;;  %v6414_v55 = vld [vmem:[%s9965_s1 + $0x228] sm:$0xff]  }
  0xb2   :  { %3566 = vmatprep.mubr.bf16.mxu0 %v6315_v57  ;;  %3791 = vmatprep.mubr.bf16.mxu1 %v6317_v58  ;;  %v6428_v58 = vld [vmem:[%s9965_s1 + $0x220] sm:$0xff]  }
  0xb3   :  { %4306 = vmatpush2.bf16.msra.mxu1 %v6441_v5 }
  0xb4   :  { %4307 = vmatprep.subr.bf16.mxu1 %v9969_v0 }
  0xb7   :  { %4308 = vmatpush2.bf16.msra.mxu1 %v6455_v14 }
  0xb8   :  { %4309 = vmatprep.subr.bf16.mxu1 %v9969_v0 }
  0xb9   :  { %3567 = vmatmul.mubr.bf16.gmra.mxu0 %v6319_v60  ;;  %3792 = vmatmul.mubr.bf16.gmra.mxu1 %v6320_v61  ;;  %v6397_v61 = vld [vmem:[%s9966_s0 + $0x758] ss:$52 sps:$4 sm:$0xff]  }
  0xba   :  { %3574 = vmatprep.mubr.bf16.mxu0 %v6322_v62  ;;  %3799 = vmatprep.mubr.bf16.mxu1 %v6324_v63  ;;  %v6398_v62 = vld [vmem:[%s9966_s0 + $0xe0] ss:$52 sps:$4 sm:$0xff]  }
  0xbb   :  { %4310 = vmatpush2.bf16.msra.mxu1 %v6469_v23  ;;  %v6484_v23 = vld [vmem:[%s9965_s1 + $0x200] sm:$0xff]  }
  0xbc   :  { %4311 = vmatprep.subr.bf16.mxu1 %v9969_v0 }
  0xbf   :  { %4312 = vmatpush2.bf16.msra.mxu1 %v6483_v32 }
  0xc0   :  { %4859 = vmatprep.subr.bf16.mxu1 %v9969_v0 }
  0xc1   :  { %3575 = vmatmul.mubr.bf16.gmra.mxu0 %v6326_v1  ;;  %3800 = vmatmul.mubr.bf16.gmra.mxu1 %v6327_v2  ;;  %v6401_v2 = vld [vmem:[%s9966_s0 + $0x7c4] ss:$52 sps:$4 sm:$0xff]  }
  0xc2   :  { %3582 = vmatprep.mubr.bf16.mxu0 %v6330_v3  ;;  %3807 = vmatprep.mubr.bf16.mxu1 %v6332_v4  ;;  %v6403_v3 = vld [vmem:[%s9966_s0 + $0x14c] ss:$52 sps:$4 sm:$0xff]  }
  0xc9   :  { %3583 = vmatmul.mubr.bf16.gmra.mxu0 %v6334_v6  ;;  %3808 = vmatmul.mubr.bf16.gmra.mxu1 %v6335_v7  ;;  %v6442_v6 = vld [vmem:[%s9965_s1 + $0x218] sm:$0xff]  }
  0xca   :  { %3590 = vmatprep.mubr.bf16.mxu0 %v6336_v8  ;;  %3815 = vmatprep.mubr.bf16.mxu1 %v6338_v9  ;;  %v6456_v9 = vld [vmem:[%s9965_s1 + $0x210] sm:$0xff]  }
  0xd1   :  { %3591 = vmatmul.mubr.bf16.gmra.mxu0 %v6340_v10  ;;  %3816 = vmatmul.mubr.bf16.gmra.mxu1 %v6341_v11 }
  0xd2   :  { %3598 = vmatprep.mubr.bf16.mxu0 %v6344_v12  ;;  %3823 = vmatprep.mubr.bf16.mxu1 %v6346_v13  ;;  %v6405_v12 = vld [vmem:[%s9966_s0 + $0x7c0] ss:$52 sps:$4 sm:$0xff]   ;;  %v6406_v13 = vld [vmem:[%s9966_s0 + $0x148] ss:$52 sps:$4 sm:$0xff]  }
  0xd9   :  { %3599 = vmatmul.mubr.bf16.gmra.mxu0 %v6348_v15  ;;  %3824 = vmatmul.mubr.bf16.gmra.mxu1 %v6349_v16  ;;  %v6409_v16 = vld [vmem:[%s9966_s0 + $0x82c] ss:$52 sps:$4 sm:$0xff]  }
  0xda   :  { %3606 = vmatprep.mubr.bf16.mxu0 %v6351_v17  ;;  %3831 = vmatprep.mubr.bf16.mxu1 %v6353_v18  ;;  %v6412_v17 = vld [vmem:[%s9966_s0 + $0x1b4] ss:$52 sps:$4 sm:$0xff]  }
  0xe1   :  { %3607 = vmatmul.mubr.bf16.gmra.mxu0 %v6355_v19  ;;  %3832 = vmatmul.mubr.bf16.gmra.mxu1 %v6356_v20  ;;  %v6470_v20 = vld [vmem:[%s9965_s1 + $0x208] sm:$0xff]  }
  0xe2   :  { %3614 = vmatprep.mubr.bf16.mxu0 %v6358_v21  ;;  %3839 = vmatprep.mubr.bf16.mxu1 %v6360_v22 }
  0xe9   :  { %3615 = vmatmul.mubr.bf16.gmra.mxu0 %v6362_v24  ;;  %3840 = vmatmul.mubr.bf16.gmra.mxu1 %v6363_v25 }
  0xea   :  { %3622 = vmatprep.mubr.bf16.mxu0 %v6365_v26  ;;  %3847 = vmatprep.mubr.bf16.mxu1 %v6367_v27  ;;  %v6407_v26 = vld [vmem:[%s9966_s0 + $0x828] ss:$52 sps:$4 sm:$0xff]   ;;  %v6410_v27 = vld [vmem:[%s9966_s0 + $0x1b0] ss:$52 sps:$4 sm:$0xff]  }
  0xf1   :  { %3623 = vmatmul.mubr.bf16.gmra.mxu0 %v6369_v28  ;;  %3848 = vmatmul.mubr.bf16.gmra.mxu1 %v6370_v29 }
  0xf2   :  { %3630 = vmatprep.mubr.bf16.mxu0 %v6373_v30  ;;  %3855 = vmatprep.mubr.bf16.mxu1 %v6375_v31  ;;  %v6417_v30 = vld [vmem:[%s9966_s0 + $0x894] ss:$52 sps:$4 sm:$0xff]   ;;  %v6420_v31 = vld [vmem:[%s9966_s0 + $0x21c] ss:$52 sps:$4 sm:$0xff]  }
  0xf9   :  { %3631 = vmatmul.mubr.bf16.gmra.mxu0 %v6377_v33  ;;  %3856 = vmatmul.mubr.bf16.gmra.mxu1 %v6378_v34  ;;  %v6497_v34 = vld [vmem:[%s9965_s1 + $0x278] sm:$0xff]  }
  0xfa   :  { %3863 = vmatprep.mubr.bf16.mxu1 %v6379_v35  ;;  %4024 = vmatprep.mubr.bf16.mxu0 %v6383_v36 }
 0x101   :  { %v7496_v42 = vpop.f32.mrf.mxu0  ;;  %v7498_v43 = vpop.f32.mrf.mxu1  ;;  %3864 = vmatmul.mubr.bf16.gmra.mxu1 %v6384_v38  ;;  %4025 = vmatmul.mubr.bf16.vlgmr.msra.gmra.mxu0 %v6381_v37  ;;  %v6511_v37 = vld [vmem:[%s9965_s1 + $0x270] sm:$0xff]  }
 0x102   :  { %4571 = vmatpush1.bf16.msra.mxu0 %v6386_v39  ;;  %3871 = vmatprep.mubr.bf16.mxu1 %v6387_v40  ;;  %v6415_v40 = vld [vmem:[%s9966_s0 + $0x890] ss:$52 sps:$4 sm:$0xff]  }
 0x103   :  { %v3450_v45 = vpop.f32.mrf.mxu0  ;;  %v3642_v46 = vpop.f32.mrf.mxu1  ;;  %4032 = vmatprep.mubr.bf16.mxu0 %v6389_v41  ;;  %4572 = vmatprep.subr.bf16.mxu0 %v9969_v0  ;;  %v6418_v41 = vld [vmem:[%s9966_s0 + $0x218] ss:$52 sps:$4 sm:$0xff]  }
 0x104   :  { %v6423_v46 = vld [vmem:[%s9966_s0 + $0x8fc] ss:$52 sps:$4 sm:$0xff]  }
 0x105   :  { %v7510_v49 = vpop.f32.mrf.mxu0  ;;  %v7512_v50 = vpop.f32.mrf.mxu1 }
 0x106   :  { %4573 = vmatpush1.bf16.msra.mxu0 %v6400_v44 }
 0x107   :  { %v3453_v53 = vpop.f32.mrf.mxu0  ;;  %v3645_v54 = vpop.f32.mrf.mxu1  ;;  %4574 = vmatprep.subr.bf16.mxu0 %v9969_v0 }
 0x109   :  { %v7524_v56 = vpop.f32.mrf.mxu0  ;;  %v7526_v57 = vpop.f32.mrf.mxu1  ;;  %3872 = vmatmul.mubr.bf16.gmra.mxu1 %v6391_v47  ;;  %4033 = vmatmul.mubr.bf16.gmra.mxu0 %v6392_v48  ;;  %v6426_v47 = vld [vmem:[%s9966_s0 + $0x284] ss:$52 sps:$4 sm:$0xff]  }
 0x10a   :  { %3879 = vmatprep.mubr.bf16.mxu1 %v6393_v51  ;;  %4040 = vmatprep.mubr.bf16.mxu0 %v6395_v52  ;;  %v6525_v52 = vld [vmem:[%s9965_s1 + $0x268] sm:$0xff]  }
 0x10b   :  { %v3458_v59 = vpop.f32.mrf.mxu0  ;;  %v3650_v60 = vpop.f32.mrf.mxu1  ;;  %4575 = vmatpush1.bf16.msra.mxu0 %v6414_v55 }
 0x10c   :  { %4576 = vmatprep.subr.bf16.mxu0 %v9969_v0  ;;  %v6421_v59 = vld [vmem:[%s9966_s0 + $0x8f8] ss:$52 sps:$4 sm:$0xff]   ;;  %v6424_v60 = vld [vmem:[%s9966_s0 + $0x280] ss:$52 sps:$4 sm:$0xff]  }
 0x10d   :  { %v7538_v63 = vpop.f32.mrf.mxu0  ;;  %v7540_v1 = vpop.f32.mrf.mxu1 }
 0x10f   :  { %v3461_v4 = vpop.f32.mrf.mxu0  ;;  %v3653_v5 = vpop.f32.mrf.mxu1  ;;  %4577 = vmatpush1.bf16.msra.mxu0 %v6428_v58 }
 0x110   :  { %4578 = vmatprep.subr.bf16.mxu0 %v9969_v0 }
 0x111   :  { %v7552_v7 = vpop.f32.mrf.mxu0  ;;  %v7554_v8 = vpop.f32.mrf.mxu1  ;;  %3880 = vmatmul.mubr.bf16.gmra.mxu1 %v6397_v61  ;;  %4041 = vmatmul.mubr.bf16.gmra.mxu0 %v6398_v62 }
 0x112   :  { %3887 = vmatprep.mubr.bf16.mxu1 %v6401_v2  ;;  %4048 = vmatprep.mubr.bf16.mxu0 %v6403_v3  ;;  %v6431_v2 = vld [vmem:[%s9966_s0 + $0x964] ss:$52 sps:$4 sm:$0xff]   ;;  %v6434_v3 = vld [vmem:[%s9966_s0 + $0x2ec] ss:$52 sps:$4 sm:$0xff]  }
 0x113   :  { %v3466_v10 = vpop.f32.mrf.mxu0  ;;  %v3658_v11 = vpop.f32.mrf.mxu1  ;;  %4579 = vmatpush1.bf16.msra.mxu0 %v6442_v6 }
 0x114   :  { %4580 = vmatprep.subr.bf16.mxu0 %v9969_v0  ;;  %v6539_v10 = vld [vmem:[%s9965_s1 + $0x260] sm:$0xff]  }
 0x115   :  { %v7566_v14 = vpop.f32.mrf.mxu0  ;;  %v7568_v15 = vpop.f32.mrf.mxu1 }
 0x117   :  { %v3469_v18 = vpop.f32.mrf.mxu0  ;;  %v3661_v19 = vpop.f32.mrf.mxu1  ;;  %4581 = vmatpush1.bf16.msra.mxu0 %v6456_v9 }
 0x118   :  { %4582 = vmatprep.subr.bf16.mxu0 %v9969_v0  ;;  %v6432_v18 = vld [vmem:[%s9966_s0 + $0x2e8] ss:$52 sps:$4 sm:$0xff]   ;;  %v6437_v19 = vld [vmem:[%s9966_s0 + $0x9cc] ss:$52 sps:$4 sm:$0xff]  }
 0x119   :  { %v7580_v21 = vpop.f32.mrf.mxu0  ;;  %v7582_v22 = vpop.f32.mrf.mxu1  ;;  %3888 = vmatmul.mubr.bf16.gmra.mxu1 %v6405_v12  ;;  %4049 = vmatmul.mubr.bf16.gmra.mxu0 %v6406_v13 }
 0x11a   :  { %3895 = vmatprep.mubr.bf16.mxu1 %v6409_v16  ;;  %4056 = vmatprep.mubr.bf16.mxu0 %v6412_v17  ;;  %v6429_v17 = vld [vmem:[%s9966_s0 + $0x960] ss:$52 sps:$4 sm:$0xff]  }
 0x11b   :  { %v3474_v24 = vpop.f32.mrf.mxu0  ;;  %v3666_v25 = vpop.f32.mrf.mxu1  ;;  %4583 = vmatpush1.bf16.msra.mxu0 %v6470_v20  ;;  %v6440_v20 = vld [vmem:[%s9966_s0 + $0x354] ss:$52 sps:$4 sm:$0xff]  }
 0x11c   :  { %4584 = vmatprep.subr.bf16.mxu0 %v9969_v0 }
 0x11d   :  { %v7594_v28 = vpop.f32.mrf.mxu0  ;;  %v7596_v29 = vpop.f32.mrf.mxu1 }
 0x11f   :  { %v3477_v32 = vpop.f32.mrf.mxu0  ;;  %v3669_v33 = vpop.f32.mrf.mxu1  ;;  %4585 = vmatpush1.bf16.msra.mxu0 %v6484_v23 }
 0x120   :  { %4586 = vmatprep.subr.bf16.mxu0 %v9969_v0 }
 0x121   :  { %v7608_v35 = vpop.f32.mrf.mxu0  ;;  %v7610_v36 = vpop.f32.mrf.mxu1  ;;  %3896 = vmatmul.mubr.bf16.gmra.mxu1 %v6407_v26  ;;  %4057 = vmatmul.mubr.bf16.gmra.mxu0 %v6410_v27 }
 0x122   :  { %9971 = vst [vmem:[#allocation2_spill] sm:$0xff] %v7610_v36  ;;  %3903 = vmatprep.mubr.bf16.mxu1 %v6417_v30  ;;  %4064 = vmatprep.mubr.bf16.mxu0 %v6420_v31  ;;  %v7688_v31 = vld [vmem:[%s9967_s2] ss:$0 sm:$0xff] }
 0x123   :  { %v3482_v38 = vpop.f32.mrf.mxu0  ;;  %v3674_v39 = vpop.f32.mrf.mxu1  ;;  %4587 = vmatpush2.bf16.msra.mxu0 %v6497_v34  ;;  %v6435_v34 = vld [vmem:[%s9966_s0 + $0x9c8] ss:$52 sps:$4 sm:$0xff]  }
 0x124   :  { %4588 = vmatprep.subr.bf16.mxu0 %v9969_v0  ;;  %v6445_v38 = vld [vmem:[%s9966_s0 + $0xa34] ss:$52 sps:$4 sm:$0xff]   ;;  %v6448_v39 = vld [vmem:[%s9966_s0 + $0x3bc] ss:$52 sps:$4 sm:$0xff]  }
 0x125   :  { %v7622_v44 = vpop.f32.mrf.mxu0  ;;  %v7624_v45 = vpop.f32.mrf.mxu1 }
 0x126   :  { %9972 = vst [vmem:[#allocation3_spill] sm:$0xff] %v7624_v45 }
 0x127   :  { %v3485_v48 = vpop.f32.mrf.mxu0  ;;  %v3677_v51 = vpop.f32.mrf.mxu1  ;;  %4589 = vmatpush2.bf16.msra.mxu0 %v6511_v37  ;;  %v6438_v37 = vld [vmem:[%s9966_s0 + $0x350] ss:$52 sps:$4 sm:$0xff]  }
 0x128   :  { %4590 = vmatprep.subr.bf16.mxu0 %v9969_v0 }
 0x129   :  { %v7636_v53 = vpop.f32.mrf.mxu0  ;;  %v7638_v54 = vpop.f32.mrf.mxu1  ;;  %3904 = vmatmul.mubr.bf16.gmra.mxu1 %v6415_v40  ;;  %4065 = vmatmul.mubr.bf16.gmra.mxu0 %v6418_v41 }
 0x12a   :  { %9973 = vst [vmem:[#allocation4_spill] sm:$0xff] %v7638_v54  ;;  %3911 = vmatprep.mubr.bf16.mxu1 %v6423_v46  ;;  %4072 = vmatprep.mubr.bf16.mxu0 %v6426_v47  ;;  %v3449_v46 = vadd.f32 %v7688_v31, %v7496_v42 }
 0x12b   :  { %v3490_v55 = vpop.f32.mrf.mxu0  ;;  %v3682_v58 = vpop.f32.mrf.mxu1  ;;  %4591 = vmatpush2.bf16.msra.mxu0 %v6525_v52  ;;  %v6553_v52 = vld [vmem:[%s9965_s1 + $0x258] sm:$0xff]  }
 0x12c   :  { %4592 = vmatprep.subr.bf16.mxu0 %v9969_v0 }
 0x12d   :  { %v7647_v61 = vpop.f32.mrf.mxu0  ;;  %v7649_v62 = vpop.f32.mrf.mxu1 }
 0x12e   :  { %9974 = vst [vmem:[#allocation5_spill] sm:$0xff] %v7649_v62 }
 0x12f   :  { %v3493_v4 = vpop.f32.mrf.mxu0  ;;  %v3685_v5 = vpop.f32.mrf.mxu1  ;;  %4593 = vmatpush2.bf16.msra.mxu0 %v6539_v10 }
 0x130   :  { %4594 = vmatprep.subr.bf16.mxu0 %v9969_v0  ;;  %v6454_v5 = vld [vmem:[%s9966_s0 + $0x424] ss:$52 sps:$4 sm:$0xff]  }
 0x131   :  { %v7657_v6 = vpop.f32.mrf.mxu0  ;;  %v7659_v9 = vpop.f32.mrf.mxu1  ;;  %3912 = vmatmul.mubr.bf16.gmra.mxu1 %v6421_v59  ;;  %4073 = vmatmul.mubr.bf16.gmra.mxu0 %v6424_v60  ;;  %v3452_v59 = vadd.f32 %v7688_v31, %v7510_v49  ;;  %v6451_v49 = vld [vmem:[%s9966_s0 + $0xa9c] ss:$52 sps:$4 sm:$0xff]  }
 0x132   :  { %9975 = vst [vmem:[#allocation6_spill] sm:$0xff] %v7659_v9  ;;  %3919 = vmatprep.mubr.bf16.mxu1 %v6431_v2  ;;  %4080 = vmatprep.mubr.bf16.mxu0 %v6434_v3  ;;  %v6443_v2 = vld [vmem:[%s9966_s0 + $0xa30] ss:$52 sps:$4 sm:$0xff]   ;;  %v6446_v3 = vld [vmem:[%s9966_s0 + $0x3b8] ss:$52 sps:$4 sm:$0xff]  }
 0x133   :  { %v3498_v11 = vpop.f32.mrf.mxu0  ;;  %v3690_v12 = vpop.f32.mrf.mxu1  ;;  %4595 = vmatpush2.bf16.msra.mxu0 %v6553_v52 }
 0x134   :  { %4596 = vmatprep.subr.bf16.mxu0 %v9969_v0  ;;  %v3457_v12 = vadd.f32 %v7688_v31, %v7524_v56  ;;  %v6449_v56 = vld [vmem:[%s9966_s0 + $0xa98] ss:$52 sps:$4 sm:$0xff]  }
 0x135   :  { %v7664_v13 = vpop.f32.mrf.mxu0  ;;  %v7666_v16 = vpop.f32.mrf.mxu1 }
 0x136   :  { %9976 = vst [vmem:[#allocation7_spill] sm:$0xff] %v7666_v16 }
 0x137   :  { %v3501_v23 = vpop.f32.mrf.mxu0  ;;  %v3693_v24 = vpop.f32.mrf.mxu1 }
 0x138   :  { %v3460_v24 = vadd.f32 %v7688_v31, %v7538_v63  ;;  %v6462_v63 = vld [vmem:[%s9966_s0 + $0x48c] ss:$52 sps:$4 sm:$0xff]  }
 0x139   :  { %v7681_v25 = vpop.f32.mrf.mxu0  ;;  %v7683_v26 = vpop.f32.mrf.mxu1  ;;  %3920 = vmatmul.mubr.bf16.gmra.mxu1 %v6429_v17  ;;  %4081 = vmatmul.mubr.bf16.gmra.mxu0 %v6432_v18 }
 0x13a   :  { %9977 = vst [vmem:[#allocation8_spill] sm:$0xff] %v7683_v26  ;;  %3927 = vmatprep.mubr.bf16.mxu1 %v6437_v19  ;;  %4088 = vmatprep.mubr.bf16.mxu0 %v6440_v20 }
 0x13b   :  { %v3506_v27 = vpop.f32.mrf.mxu0  ;;  %v3698_v30 = vpop.f32.mrf.mxu1 }
 0x13d   :  { %v7690_v32 = vpop.f32.mrf.mxu0  ;;  %v7692_v33 = vpop.f32.mrf.mxu1 }
 0x13e   :  { %9978 = vst [vmem:[#allocation9_spill] sm:$0xff] %v7692_v33 }
 0x13f   :  { %v3509_v40 = vpop.f32.mrf.mxu0  ;;  %v3701_v41 = vpop.f32.mrf.mxu1 }
 0x140   :  { %v3465_v41 = vadd.f32 %v7688_v31, %v7552_v7 }
 0x141   :  { %v7708_v47 = vpop.f32.mrf.mxu0  ;;  %v3737_v48 = vpop.f32.mrf.mxu1  ;;  %3928 = vmatmul.mubr.bf16.gmra.mxu1 %v6435_v34  ;;  %4089 = vmatmul.mubr.bf16.gmra.mxu0 %v6438_v37  ;;  %v6452_v34 = vld [vmem:[%s9966_s0 + $0x420] ss:$52 sps:$4 sm:$0xff]  }
 0x142   :  { %v7710_v51 = vadd.f32 %v3737_v48, %v3449_v46  ;;  %3935 = vmatprep.mubr.bf16.mxu1 %v6445_v38  ;;  %4096 = vmatprep.mubr.bf16.mxu0 %v6448_v39  ;;  %v6459_v38 = vld [vmem:[%s9966_s0 + $0xb04] ss:$52 sps:$4 sm:$0xff]  }
 0x143   :  { %v3514_v55 = vpop.f32.mrf.mxu0  ;;  %v3739_v58 = vpop.f32.mrf.mxu1 }
 0x144   :  { %v6567_v55 = vld [vmem:[%s9965_s1 + $0x250] sm:$0xff]  }
 0x145   :  { %v7717_v42 = vpop.f32.mrf.mxu0  ;;  %v3740_v60 = vpop.f32.mrf.mxu1  ;;  %4597 = vmatpush2.bf16.msra.mxu0 %v6567_v55 }
 0x146   :  { %v7726_v4 = vadd.f32 %v3740_v60, %v3452_v59  ;;  %v3468_v60 = vadd.f32 %v7688_v31, %v7566_v14  ;;  %4598 = vmatprep.subr.bf16.mxu0 %v9969_v0  ;;  %v6465_v14 = vld [vmem:[%s9966_s0 + $0xb6c] ss:$52 sps:$4 sm:$0xff]  }
 0x147   :  { %v3517_v10 = vpop.f32.mrf.mxu0  ;;  %v3742_v11 = vpop.f32.mrf.mxu1 }
 0x148   :  { %v6468_v10 = vld [vmem:[%s9966_s0 + $0x4f4] ss:$52 sps:$4 sm:$0xff]  }
 0x149   :  { %v7736_v17 = vpop.f32.mrf.mxu0  ;;  %v3745_v18 = vpop.f32.mrf.mxu1  ;;  %3936 = vmatmul.mubr.bf16.gmra.mxu1 %v6443_v2  ;;  %4097 = vmatmul.mubr.bf16.gmra.mxu0 %v6446_v3  ;;  %v6457_v3 = vld [vmem:[%s9966_s0 + $0xb00] ss:$52 sps:$4 sm:$0xff]  }
 0x14a   :  { %v7738_v19 = vadd.f32 %v3745_v18, %v3457_v12  ;;  %3943 = vmatprep.mubr.bf16.mxu1 %v6451_v49  ;;  %4104 = vmatprep.mubr.bf16.mxu0 %v6454_v5  ;;  %v6460_v49 = vld [vmem:[%s9966_s0 + $0x488] ss:$52 sps:$4 sm:$0xff]   ;;  %v3473_v18 = vadd.f32 %v7688_v31, %v7580_v21 }
 0x14b   :  { %v3522_v20 = vpop.f32.mrf.mxu0  ;;  %v3747_v23 = vpop.f32.mrf.mxu1  ;;  %v6463_v21 = vld [vmem:[%s9966_s0 + $0xb68] ss:$52 sps:$4 sm:$0xff]  }
 0x14d   :  { %v7742_v27 = vpop.f32.mrf.mxu0  ;;  %v3748_v30 = vpop.f32.mrf.mxu1 }
 0x14e   :  { %v7750_v37 = vadd.f32 %v3748_v30, %v3460_v24 }
 0x14f   :  { %v3525_v39 = vpop.f32.mrf.mxu0  ;;  %v3750_v40 = vpop.f32.mrf.mxu1 }
 0x150   :  { %v6466_v39 = vld [vmem:[%s9966_s0 + $0x4f0] ss:$52 sps:$4 sm:$0xff]  }
 0x151   :  { %v7760_v46 = vpop.f32.mrf.mxu0  ;;  %v3753_v48 = vpop.f32.mrf.mxu1  ;;  %3944 = vmatmul.mubr.bf16.gmra.mxu1 %v6449_v56  ;;  %4105 = vmatmul.mubr.bf16.gmra.mxu0 %v6452_v34  ;;  %v3476_v34 = vadd.f32 %v7688_v31, %v7594_v28  ;;  %v6476_v28 = vld [vmem:[%s9966_s0 + $0x55c] ss:$52 sps:$4 sm:$0xff]  }
 0x152   :  { %v7762_v52 = vadd.f32 %v3753_v48, %v3465_v41  ;;  %3951 = vmatprep.mubr.bf16.mxu1 %v6459_v38  ;;  %4112 = vmatprep.mubr.bf16.mxu0 %v6462_v63  ;;  %v6473_v41 = vld [vmem:[%s9966_s0 + $0xbd4] ss:$52 sps:$4 sm:$0xff]  }
 0x153   :  { %v3530_v58 = vpop.f32.mrf.mxu0  ;;  %v3755_v59 = vpop.f32.mrf.mxu1 }
 0x154   :  { %v3481_v58 = vadd.f32 %v7688_v31, %v7608_v35 }
 0x155   :  { %v7769_v7 = vpop.f32.mrf.mxu0  ;;  %v3756_v2 = vpop.f32.mrf.mxu1 }
 0x156   :  { %v7778_v5 = vadd.f32 %v3756_v2, %v3468_v60 }
 0x157   :  { %v3533_v11 = vpop.f32.mrf.mxu0  ;;  %v3758_v12 = vpop.f32.mrf.mxu1 }
 0x158   :  { %v6471_v12 = vld [vmem:[%s9966_s0 + $0xbd0] ss:$52 sps:$4 sm:$0xff]  }
 0x159   :  { %v7788_v20 = vpop.f32.mrf.mxu0  ;;  %v3761_v23 = vpop.f32.mrf.mxu1  ;;  %3952 = vmatmul.mubr.bf16.gmra.mxu1 %v6457_v3  ;;  %4113 = vmatmul.mubr.bf16.gmra.mxu0 %v6460_v49  ;;  %v6581_v3 = vld [vmem:[%s9965_s1 + $0x248] sm:$0xff]  }
 0x15a   :  { %v7790_v24 = vadd.f32 %v3761_v23, %v3473_v18  ;;  %3959 = vmatprep.mubr.bf16.mxu1 %v6465_v14  ;;  %4120 = vmatprep.mubr.bf16.mxu0 %v6468_v10  ;;  %v3484_v10 = vadd.f32 %v7688_v31, %v7622_v44  ;;  %v6474_v18 = vld [vmem:[%s9966_s0 + $0x558] ss:$52 sps:$4 sm:$0xff]   ;;  %v6479_v44 = vld [vmem:[%s9966_s0 + $0xc3c] ss:$52 sps:$4 sm:$0xff]  }
 0x15b   :  { %v3538_v30 = vpop.f32.mrf.mxu0  ;;  %v3763_v56 = vpop.f32.mrf.mxu1  ;;  %4599 = vmatpush2.bf16.msra.mxu0 %v6581_v3  ;;  %v6480_v3 = vld [vmem:[%s9966_s0 + $0x5c0] ss:$52 sps:$4 sm:$0xff]  }
 0x15c   :  { %4600 = vmatprep.subr.bf16.mxu0 %v9969_v0  ;;  %v6482_v30 = vld [vmem:[%s9966_s0 + $0x5c4] ss:$52 sps:$4 sm:$0xff]  }
 0x15d   :  { %v7794_v38 = vpop.f32.mrf.mxu0  ;;  %v3764_v63 = vpop.f32.mrf.mxu1 }
 0x15e   :  { %v7802_v40 = vadd.f32 %v3764_v63, %v3476_v34  ;;  %v3489_v63 = vadd.f32 %v7688_v31, %v7636_v53  ;;  %v6477_v53 = vld [vmem:[%s9966_s0 + $0xc38] ss:$52 sps:$4 sm:$0xff]  }
 0x15f   :  { %v3541_v48 = vpop.f32.mrf.mxu0  ;;  %v3766_v55 = vpop.f32.mrf.mxu1 }
 0x160   :  { %v3492_v55 = vadd.f32 %v7688_v31, %v7647_v61  ;;  %v6490_v61 = vld [vmem:[%s9966_s0 + $0x62c] ss:$52 sps:$4 sm:$0xff]  }
 0x161   :  { %v7812_v59 = vpop.f32.mrf.mxu0  ;;  %v3769_v60 = vpop.f32.mrf.mxu1  ;;  %3960 = vmatmul.mubr.bf16.gmra.mxu1 %v6463_v21  ;;  %4121 = vmatmul.mubr.bf16.gmra.mxu0 %v6466_v39 }
 0x162   :  { %v7814_v2 = vadd.f32 %v3769_v60, %v3481_v58  ;;  %3967 = vmatprep.mubr.bf16.mxu1 %v6473_v41  ;;  %4128 = vmatprep.mubr.bf16.mxu0 %v6476_v28 }
 0x163   :  { %v3546_v49 = vpop.f32.mrf.mxu0  ;;  %v3771_v14 = vpop.f32.mrf.mxu1 }
 0x164   :  { %v6487_v14 = vld [vmem:[%s9966_s0 + $0xca4] ss:$52 sps:$4 sm:$0xff]  }
 0x165   :  { %v7821_v35 = vpop.f32.mrf.mxu0  ;;  %v3772_v11 = vpop.f32.mrf.mxu1 }
 0x166   :  { %v7830_v23 = vadd.f32 %v3772_v11, %v3484_v10 }
 0x167   :  { %v3549_v56 = vpop.f32.mrf.mxu0  ;;  %v3774_v34 = vpop.f32.mrf.mxu1 }
 0x168   :  { %v6595_v56 = vld [vmem:[%s9965_s1 + $0x240] sm:$0xff]  }
 0x169   :  { %v7840_v21 = vpop.f32.mrf.mxu0  ;;  %v3777_v39 = vpop.f32.mrf.mxu1  ;;  %3968 = vmatmul.mubr.bf16.gmra.mxu1 %v6471_v12  ;;  %4129 = vmatmul.mubr.bf16.gmra.mxu0 %v6474_v18  ;;  %v3497_v12 = vadd.f32 %v7688_v31, %v7657_v6 }
 0x16a   :  { %v7842_v41 = vadd.f32 %v3777_v39, %v3489_v63  ;;  %3975 = vmatprep.mubr.bf16.mxu1 %v6479_v44  ;;  %4136 = vmatprep.mubr.bf16.mxu0 %v6482_v30  ;;  %v3500_v39 = vadd.f32 %v7688_v31, %v7664_v13  ;;  %v6496_v13 = vld [vmem:[%s9966_s0 + $0x1c] ss:$52 sps:$4 sm:$0xff]  }
 0x16b   :  { %v3554_v28 = vpop.f32.mrf.mxu0  ;;  %v3779_v48 = vpop.f32.mrf.mxu1  ;;  %4601 = vmatpush2.bf16.msra.mxu0 %v6595_v56 }
 0x16c   :  { %v6485_v48 = vld [vmem:[%s9966_s0 + $0xca0] ss:$52 sps:$4 sm:$0xff]  }
 0x16d   :  { %v7846_v58 = vpop.f32.mrf.mxu0  ;;  %v3780_v60 = vpop.f32.mrf.mxu1 }
 0x16e   :  { %v7854_v49 = vadd.f32 %v3780_v60, %v3492_v55  ;;  %v6488_v55 = vld [vmem:[%s9966_s0 + $0x628] ss:$52 sps:$4 sm:$0xff]  }
 0x16f   :  { %v3557_v10 = vpop.f32.mrf.mxu0  ;;  %v3782_v11 = vpop.f32.mrf.mxu1 }
 0x171   :  { %v7864_v18 = vpop.f32.mrf.mxu0  ;;  %v3785_v44 = vpop.f32.mrf.mxu1  ;;  %3976 = vmatmul.mubr.bf16.gmra.mxu1 %v6477_v53  ;;  %4137 = vmatmul.mubr.bf16.gmra.mxu0 %v6480_v3  ;;  %v6493_v53 = vld [vmem:[%s9966_s0 + $0x694] ss:$52 sps:$4 sm:$0xff]  }
 0x172   :  { %v7866_v30 = vadd.f32 %v3785_v44, %v3497_v12  ;;  %3983 = vmatprep.mubr.bf16.mxu1 %v6487_v14  ;;  %4144 = vmatprep.mubr.bf16.mxu0 %v6490_v61  ;;  %v3505_v61 = vadd.f32 %v7688_v31, %v7681_v25  ;;  %v6491_v25 = vld [vmem:[%s9966_s0 + $0x690] ss:$52 sps:$4 sm:$0xff]  }
 0x173   :  { %v3562_v34 = vpop.f32.mrf.mxu0  ;;  %v3787_v63 = vpop.f32.mrf.mxu1 }
 0x174   :  { %v3508_v34 = vadd.f32 %v7688_v31, %v7690_v32  ;;  %v6501_v32 = vld [vmem:[%s9966_s0 + $0x6fc] ss:$52 sps:$4 sm:$0xff]  }
 0x175   :  { %v7873_v6 = vpop.f32.mrf.mxu0  ;;  %v3788_v28 = vpop.f32.mrf.mxu1 }
 0x176   :  { %v7881_v60 = vadd.f32 %v3788_v28, %v3500_v39  ;;  %v6494_v28 = vld [vmem:[%s9966_s0 + $0x18] ss:$52 sps:$4 sm:$0xff]  }
 0x177   :  { %v3565_v3 = vpop.f32.mrf.mxu0  ;;  %v3790_v14 = vpop.f32.mrf.mxu1 }
 0x178   :  { %v6504_v3 = vld [vmem:[%s9966_s0 + $0x84] ss:$52 sps:$4 sm:$0xff]   ;;  %v3513_v14 = vadd.f32 %v7688_v31, %v7708_v47 }
 0x179   :  { %v7891_v10 = vpop.f32.mrf.mxu0  ;;  %v3793_v11 = vpop.f32.mrf.mxu1  ;;  %3984 = vmatmul.mubr.bf16.gmra.mxu1 %v6485_v48  ;;  %4145 = vmatmul.mubr.bf16.gmra.mxu0 %v6488_v55  ;;  %v6498_v55 = vld [vmem:[%s9965_s1 + $0x2b8] sm:$0xff]  }
 0x17a   :  { %v7893_v12 = vadd.f32 %v3793_v11, %v3505_v61  ;;  %4152 = vmatprep.mubr.bf16.mxu0 %v6493_v53  ;;  %4313 = vmatprep.mubr.bf16.mxu1 %v6496_v13 }
 0x17b   :  { %v3570_v44 = vpop.f32.mrf.mxu0  ;;  %v3795_v56 = vpop.f32.mrf.mxu1 }
 0x17c   :  { %v6512_v56 = vld [vmem:[%s9965_s1 + $0x2b0] sm:$0xff]  }
 0x17d   :  { %v7897_v63 = vpop.f32.mrf.mxu0  ;;  %v3796_v39 = vpop.f32.mrf.mxu1 }
 0x17e   :  { %v7905_v48 = vadd.f32 %v3796_v39, %v3508_v34  ;;  %v7928_v34 = vld [vmem:[%s9965_s1 + $0x338] sm:$0xff]  }
 0x17f   :  { %v3573_v53 = vpop.f32.mrf.mxu0  ;;  %v3798_v13 = vpop.f32.mrf.mxu1  ;;  %6066 = vmatprep.subr.bf16.mxu0 %v7928_v34 }
 0x180   :  { %v6502_v53 = vld [vmem:[%s9966_s0 + $0x80] ss:$52 sps:$4 sm:$0xff]  }
 0x181   :  { %v7918_v61 = vpop.f32.mrf.mxu0  ;;  %v3801_v11 = vpop.f32.mrf.mxu1  ;;  %4153 = vmatmul.mubr.bf16.gmra.mxu0 %v6491_v25  ;;  %4314 = vmatmul.mubr.bf16.vlgmr.msra.gmra.mxu1 %v6494_v28  ;;  %v3516_v25 = vadd.f32 %v7688_v31, %v7717_v42  ;;  %v6510_v42 = vld [vmem:[%s9966_s0 + $0xec] ss:$52 sps:$4 sm:$0xff]  }
 0x182   :  { %v7920_v44 = vadd.f32 %v3801_v11, %v3513_v14  ;;  %4860 = vmatpush1.bf16.msra.mxu1 %v6498_v55  ;;  %4160 = vmatprep.mubr.bf16.mxu0 %v6501_v32  ;;  %v6499_v32 = vld [vmem:[%s9966_s0 + $0x6f8] ss:$52 sps:$4 sm:$0xff]  }
 0x183   :  { %v3578_v39 = vpop.f32.mrf.mxu0  ;;  %v3803_v47 = vpop.f32.mrf.mxu1  ;;  %4321 = vmatprep.mubr.bf16.mxu1 %v6504_v3  ;;  %4861 = vmatprep.subr.bf16.mxu1 %v9969_v0  ;;  %v6507_v3 = vld [vmem:[%s9966_s0 + $0x764] ss:$52 sps:$4 sm:$0xff]  }
 0x184   :  { %v6526_v39 = vld [vmem:[%s9965_s1 + $0x2a8] sm:$0xff]   ;;  %v3521_v47 = vadd.f32 %v7688_v31, %v7736_v17  ;;  %v9979_v17 = vmov 0  }
 0x185   :  { %v7934_v28 = vpop.f32.mrf.mxu0  ;;  %v3804_v55 = vpop.f32.mrf.mxu1 }
 0x186   :  { %v7942_v13 = vadd.f32 %v3804_v55, %v3516_v25  ;;  %4862 = vmatpush1.bf16.msra.mxu1 %v6512_v56 }
 0x187   :  { %v3581_v14 = vpop.f32.mrf.mxu0  ;;  %v3806_v11 = vpop.f32.mrf.mxu1  ;;  %4863 = vmatprep.subr.bf16.mxu1 %v9969_v0  ;;  %v3524_v0 = vadd.f32 %v7688_v31, %v7742_v27  ;;  %v6518_v27 = vld [vmem:[%s9966_s0 + $0x154] ss:$52 sps:$4 sm:$0xff]  }
 0x188   :  { %v6540_v11 = vld [vmem:[%s9965_s1 + $0x2a0] sm:$0xff]  }
 0x189   :  { %v7956_v25 = vpop.f32.mrf.mxu0  ;;  %v3809_v55 = vpop.f32.mrf.mxu1  ;;  %4161 = vmatmul.mubr.bf16.gmra.mxu0 %v6499_v32  ;;  %4322 = vmatmul.mubr.bf16.gmra.mxu1 %v6502_v53  ;;  %v6505_v53 = vld [vmem:[%s9966_s0 + $0x760] ss:$52 sps:$4 sm:$0xff]  }
 0x18a   :  { %v7958_v33 = vadd.f32 %v3809_v55, %v3521_v47  ;;  %4168 = vmatprep.mubr.bf16.mxu0 %v6507_v3  ;;  %4329 = vmatprep.mubr.bf16.mxu1 %v6510_v42  ;;  %v6508_v3 = vld [vmem:[%s9966_s0 + $0xe8] ss:$52 sps:$4 sm:$0xff]  }
 0x18b   :  { %v3586_v56 = vpop.f32.mrf.mxu0  ;;  %v3811_v14 = vpop.f32.mrf.mxu1  ;;  %4864 = vmatpush1.bf16.msra.mxu1 %v6526_v39  ;;  %v6515_v39 = vld [vmem:[%s9966_s0 + $0x7cc] ss:$52 sps:$4 sm:$0xff]  }
 0x18c   :  { %4865 = vmatprep.subr.bf16.mxu1 %v9979_v17  ;;  %v6554_v56 = vld [vmem:[%s9965_s1 + $0x298] sm:$0xff]   ;;  %v3529_v14 = vadd.f32 %v7688_v31, %v7760_v46  ;;  %v3532_v46 = vadd.f32 %v7688_v31, %v7769_v7 }
 0x18d   :  { %v7966_v26 = vpop.f32.mrf.mxu0  ;;  %v3812_v32 = vpop.f32.mrf.mxu1  ;;  %v6524_v7 = vld [vmem:[%s9966_s0 + $0x1bc] ss:$52 sps:$4 sm:$0xff]  }
 0x18e   :  { %v7974_v42 = vadd.f32 %v3812_v32, %v3524_v0 }
 0x18f   :  { %v3589_v47 = vpop.f32.mrf.mxu0  ;;  %v3814_v55 = vpop.f32.mrf.mxu1  ;;  %4866 = vmatpush1.bf16.msra.mxu1 %v6540_v11 }
 0x190   :  { %4867 = vmatprep.subr.bf16.mxu1 %v9979_v17  ;;  %v6568_v55 = vld [vmem:[%s9965_s1 + $0x290] sm:$0xff]  }
 0x191   :  { %v7988_v0 = vpop.f32.mrf.mxu0  ;;  %v3817_v32 = vpop.f32.mrf.mxu1  ;;  %4169 = vmatmul.mubr.bf16.gmra.mxu0 %v6505_v53  ;;  %4330 = vmatmul.mubr.bf16.gmra.mxu1 %v6508_v3  ;;  %v6513_v3 = vld [vmem:[%s9966_s0 + $0x7c8] ss:$52 sps:$4 sm:$0xff]  }
 0x192   :  { %v7990_v16 = vadd.f32 %v3817_v32, %v3529_v14  ;;  %4176 = vmatprep.mubr.bf16.mxu0 %v6515_v39  ;;  %4337 = vmatprep.mubr.bf16.mxu1 %v6518_v27  ;;  %v6516_v39 = vld [vmem:[%s9966_s0 + $0x150] ss:$52 sps:$4 sm:$0xff]  }
 0x193   :  { %v3594_v47 = vpop.f32.mrf.mxu0  ;;  %v3819_v11 = vpop.f32.mrf.mxu1  ;;  %4868 = vmatpush1.bf16.msra.mxu1 %v6554_v56  ;;  %v6521_v56 = vld [vmem:[%s9966_s0 + $0x834] ss:$52 sps:$4 sm:$0xff]  }
 0x194   :  { %4869 = vmatprep.subr.bf16.mxu1 %v9979_v17  ;;  %v6582_v47 = vld [vmem:[%s9965_s1 + $0x288] sm:$0xff]   ;;  %v3537_v11 = vadd.f32 %v7688_v31, %v7788_v20  ;;  %v3540_v20 = vadd.f32 %v7688_v31, %v7794_v38  ;;  %v6532_v38 = vld [vmem:[%s9966_s0 + $0x224] ss:$52 sps:$4 sm:$0xff]  }
 0x195   :  { %v7998_v9 = vpop.f32.mrf.mxu0  ;;  %v3820_v53 = vpop.f32.mrf.mxu1 }
 0x196   :  { %v8006_v27 = vadd.f32 %v3820_v53, %v3532_v46 }
 0x197   :  { %v3597_v14 = vpop.f32.mrf.mxu0  ;;  %v3822_v32 = vpop.f32.mrf.mxu1  ;;  %4870 = vmatpush1.bf16.msra.mxu1 %v6568_v55 }
 0x198   :  { %4871 = vmatprep.subr.bf16.mxu1 %v9979_v17  ;;  %v6596_v32 = vld [vmem:[%s9965_s1 + $0x280] sm:$0xff]  }
 0x199   :  { %v8020_v46 = vpop.f32.mrf.mxu0  ;;  %v3825_v53 = vpop.f32.mrf.mxu1  ;;  %4177 = vmatmul.mubr.bf16.gmra.mxu0 %v6513_v3  ;;  %4338 = vmatmul.mubr.bf16.gmra.mxu1 %v6516_v39  ;;  %v6519_v39 = vld [vmem:[%s9966_s0 + $0x830] ss:$52 sps:$4 sm:$0xff]  }
 0x19a   :  { %v8022_v62 = vadd.f32 %v3825_v53, %v3537_v11  ;;  %4184 = vmatprep.mubr.bf16.mxu0 %v6521_v56  ;;  %4345 = vmatprep.mubr.bf16.mxu1 %v6524_v7  ;;  %v6522_v56 = vld [vmem:[%s9966_s0 + $0x1b8] ss:$52 sps:$4 sm:$0xff]  }
 0x19b   :  { %v3602_v14 = vpop.f32.mrf.mxu0  ;;  %v3827_v55 = vpop.f32.mrf.mxu1  ;;  %4872 = vmatpush1.bf16.msra.mxu1 %v6582_v47  ;;  %v6529_v47 = vld [vmem:[%s9966_s0 + $0x89c] ss:$52 sps:$4 sm:$0xff]  }
 0x19c   :  { %4873 = vmatprep.subr.bf16.mxu1 %v9979_v17  ;;  %v6610_v14 = vld [vmem:[%s9965_s1 + $0x2f8] sm:$0xff]   ;;  %v3545_v55 = vadd.f32 %v7688_v31, %v7812_v59  ;;  %v3548_v59 = vadd.f32 %v7688_v31, %v7821_v35  ;;  %v6538_v35 = vld [vmem:[%s9966_s0 + $0x28c] ss:$52 sps:$4 sm:$0xff]  }
 0x19d   :  { %v8030_v54 = vpop.f32.mrf.mxu0  ;;  %v3828_v3 = vpop.f32.mrf.mxu1 }
 0x19e   :  { %v8038_v7 = vadd.f32 %v3828_v3, %v3540_v20 }
 0x19f   :  { %v3605_v11 = vpop.f32.mrf.mxu0  ;;  %v3830_v53 = vpop.f32.mrf.mxu1  ;;  %4874 = vmatpush1.bf16.msra.mxu1 %v6596_v32 }
 0x1a0   :  { %9980 = vst [vmem:[#allocation10_spill] sm:$0xff] %v8038_v7  ;;  %4875 = vmatprep.subr.bf16.mxu1 %v9979_v17  ;;  %v6623_v53 = vld [vmem:[%s9965_s1 + $0x2f0] sm:$0xff]  }
 0x1a1   :  { %v8052_v20 = vpop.f32.mrf.mxu0  ;;  %v3833_v3 = vpop.f32.mrf.mxu1  ;;  %4185 = vmatmul.mubr.bf16.gmra.mxu0 %v6519_v39  ;;  %4346 = vmatmul.mubr.bf16.gmra.mxu1 %v6522_v56  ;;  %v6527_v56 = vld [vmem:[%s9966_s0 + $0x898] ss:$52 sps:$4 sm:$0xff]  }
 0x1a2   :  { %v8054_v45 = vadd.f32 %v3833_v3, %v3545_v55  ;;  %4192 = vmatprep.mubr.bf16.mxu0 %v6529_v47  ;;  %4353 = vmatprep.mubr.bf16.mxu1 %v6532_v38  ;;  %v6530_v47 = vld [vmem:[%s9966_s0 + $0x220] ss:$52 sps:$4 sm:$0xff]  }
 0x1a3   :  { %v3610_v11 = vpop.f32.mrf.mxu0  ;;  %v3835_v32 = vpop.f32.mrf.mxu1  ;;  %4876 = vmatpush2.bf16.msra.mxu1 %v6610_v14  ;;  %v6535_v14 = vld [vmem:[%s9966_s0 + $0x904] ss:$52 sps:$4 sm:$0xff]  }
 0x1a4   :  { %9981 = vst [vmem:[#allocation11_spill] sm:$0xff] %v8054_v45  ;;  %4877 = vmatprep.subr.bf16.mxu1 %v9979_v17  ;;  %v6637_v11 = vld [vmem:[%s9965_s1 + $0x2e8] sm:$0xff]   ;;  %v3553_v32 = vadd.f32 %v7688_v31, %v7840_v21 }
 0x1a5   :  { %v8062_v36 = vpop.f32.mrf.mxu0  ;;  %v3836_v39 = vpop.f32.mrf.mxu1 }
 0x1a6   :  { %v8070_v38 = vadd.f32 %v3836_v39, %v3548_v59 }
 0x1a7   :  { %v3613_v55 = vpop.f32.mrf.mxu0  ;;  %v3838_v3 = vpop.f32.mrf.mxu1  ;;  %4878 = vmatpush2.bf16.msra.mxu1 %v6623_v53 }
 0x1a8   :  { %9982 = vst [vmem:[#allocation12_spill] sm:$0xff] %v8070_v38  ;;  %4879 = vmatprep.subr.bf16.mxu1 %v9979_v17  ;;  %v3556_v3 = vadd.f32 %v7688_v31, %v7846_v58  ;;  %v6546_v58 = vld [vmem:[%s9966_s0 + $0x2f4] ss:$52 sps:$4 sm:$0xff]  }
 0x1a9   :  { %v8084_v59 = vpop.f32.mrf.mxu0  ;;  %v3841_v39 = vpop.f32.mrf.mxu1  ;;  %4193 = vmatmul.mubr.bf16.gmra.mxu0 %v6527_v56  ;;  %4354 = vmatmul.mubr.bf16.gmra.mxu1 %v6530_v47  ;;  %v6533_v56 = vld [vmem:[%s9966_s0 + $0x900] ss:$52 sps:$4 sm:$0xff]   ;;  %v6536_v47 = vld [vmem:[%s9966_s0 + $0x288] ss:$52 sps:$4 sm:$0xff]  }
 0x1aa   :  { %v8086_v38 = vadd.f32 %v3841_v39, %v3553_v32  ;;  %4200 = vmatprep.mubr.bf16.mxu0 %v6535_v14  ;;  %4361 = vmatprep.mubr.bf16.mxu1 %v6538_v35  ;;  %v6543_v35 = vld [vmem:[%s9966_s0 + $0x96c] ss:$52 sps:$4 sm:$0xff]   ;;  %v3561_v39 = vadd.f32 %v7688_v31, %v7864_v18 }
 0x1ab   :  { %v3618_v55 = vpop.f32.mrf.mxu0  ;;  %v3843_v53 = vpop.f32.mrf.mxu1  ;;  %4880 = vmatpush2.bf16.msra.mxu1 %v6637_v11 }
 0x1ac   :  { %9983 = vst [vmem:[#allocation13_spill] sm:$0xff] %v8086_v38  ;;  %4881 = vmatprep.subr.bf16.mxu1 %v9979_v17 }
 0x1ad   :  { %v8091_v21 = vpop.f32.mrf.mxu0  ;;  %v3844_v45 = vpop.f32.mrf.mxu1 }
 0x1ae   :  { %v8099_v14 = vadd.f32 %v3844_v45, %v3556_v3  ;;  %v6650_v3 = vld [vmem:[%s9965_s1 + $0x2e0] sm:$0xff]  }
 0x1af   :  { %v3621_v11 = vpop.f32.mrf.mxu0  ;;  %v3846_v32 = vpop.f32.mrf.mxu1  ;;  %4882 = vmatpush2.bf16.msra.mxu1 %v6650_v3 }
 0x1b0   :  { %9984 = vst [vmem:[#allocation14_spill] sm:$0xff] %v8099_v14  ;;  %v3564_v11 = vadd.f32 %v7688_v31, %v7873_v6  ;;  %4883 = vmatprep.subr.bf16.mxu1 %v9979_v17  ;;  %v6549_v6 = vld [vmem:[%s9966_s0 + $0x9d4] ss:$52 sps:$4 sm:$0xff]  }
 0x1b1   :  { %v8109_v55 = vpop.f32.mrf.mxu0  ;;  %v3849_v53 = vpop.f32.mrf.mxu1  ;;  %4201 = vmatmul.mubr.bf16.gmra.mxu0 %v6533_v56  ;;  %4362 = vmatmul.mubr.bf16.gmra.mxu1 %v6536_v47  ;;  %v6541_v56 = vld [vmem:[%s9966_s0 + $0x968] ss:$52 sps:$4 sm:$0xff]   ;;  %v6544_v47 = vld [vmem:[%s9966_s0 + $0x2f0] ss:$52 sps:$4 sm:$0xff]  }
 0x1b2   :  { %v8111_v45 = vadd.f32 %v3849_v53, %v3561_v39  ;;  %4208 = vmatprep.mubr.bf16.mxu0 %v6543_v35  ;;  %4369 = vmatprep.mubr.bf16.mxu1 %v6546_v58  ;;  %v3569_v39 = vadd.f32 %v7688_v31, %v7891_v10  ;;  %v6547_v10 = vld [vmem:[%s9966_s0 + $0x9d0] ss:$52 sps:$4 sm:$0xff]  }
 0x1b3   :  { %v3626_v14 = vpop.f32.mrf.mxu0  ;;  %v3851_v38 = vpop.f32.mrf.mxu1 }
 0x1b4   :  { %9985 = vst [vmem:[#allocation15_spill] sm:$0xff] %v8111_v45  ;;  %v6552_v38 = vld [vmem:[%s9966_s0 + $0x35c] ss:$52 sps:$4 sm:$0xff]   ;;  %v3572_v45 = vadd.f32 %v7688_v31, %v7897_v63  ;;  %v6560_v63 = vld [vmem:[%s9966_s0 + $0x3c4] ss:$52 sps:$4 sm:$0xff]  }
 0x1b5   :  { %v8118_v18 = vpop.f32.mrf.mxu0  ;;  %v3852_v32 = vpop.f32.mrf.mxu1 }
 0x1b6   :  { %v8127_v35 = vadd.f32 %v3852_v32, %v3564_v11 }
 0x1b7   :  { %v3629_v14 = vpop.f32.mrf.mxu0  ;;  %v3854_v58 = vpop.f32.mrf.mxu1 }
 0x1b8   :  { %9986 = vst [vmem:[#allocation16_spill] sm:$0xff] %v8127_v35  ;;  %v3577_v58 = vadd.f32 %v7688_v31, %v7918_v61  ;;  %v3580_v61 = vadd.f32 %v7688_v31, %v7934_v28  ;;  %v6563_v28 = vld [vmem:[%s9966_s0 + $0xaa4] ss:$52 sps:$4 sm:$0xff]  }
 0x1b9   :  { %v8137_v53 = vpop.f32.mrf.mxu0  ;;  %v3857_v3 = vpop.f32.mrf.mxu1  ;;  %4209 = vmatmul.mubr.bf16.gmra.mxu0 %v6541_v56  ;;  %4370 = vmatmul.mubr.bf16.gmra.mxu1 %v6544_v47  ;;  %v6550_v56 = vld [vmem:[%s9966_s0 + $0x358] ss:$52 sps:$4 sm:$0xff]  }
 0x1ba   :  { %v8139_v11 = vadd.f32 %v3857_v3, %v3569_v39  ;;  %4216 = vmatprep.mubr.bf16.mxu0 %v6549_v6  ;;  %4377 = vmatprep.mubr.bf16.mxu1 %v6552_v38 }
 0x1bb   :  { %v3634_v32 = vpop.f32.mrf.mxu0  ;;  %v3859_v35 = vpop.f32.mrf.mxu1 }
 0x1bc   :  { %v6557_v35 = vld [vmem:[%s9966_s0 + $0xa3c] ss:$52 sps:$4 sm:$0xff]  }
 0x1bd   :  { %v8143_v7 = vpop.f32.mrf.mxu0  ;;  %v3860_v14 = vpop.f32.mrf.mxu1 }
 0x1be   :  { %v8151_v47 = vadd.f32 %v3860_v14, %v3572_v45  ;;  %v6664_v14 = vld [vmem:[%s9965_s1 + $0x2d8] sm:$0xff]  }
 0x1bf   :  { %v3637_v6 = vpop.f32.mrf.mxu0  ;;  %v3862_v38 = vpop.f32.mrf.mxu1  ;;  %4884 = vmatpush2.bf16.msra.mxu1 %v6664_v14  ;;  %v3585_v14 = vadd.f32 %v7688_v31, %v7956_v25  ;;  %v6561_v25 = vld [vmem:[%s9966_s0 + $0xaa0] ss:$52 sps:$4 sm:$0xff]  }
 0x1c0   :  { %9987 = vst [vmem:[#allocation17_spill] sm:$0xff] %v8151_v47  ;;  %4885 = vmatprep.subr.bf16.mxu1 %v9979_v17 }
 0x1c1   :  { %v3865_v39 = vpop.f32.mrf.mxu1  ;;  %v4026_v3 = vpop.f32.mrf.mxu0  ;;  %4217 = vmatmul.mubr.bf16.gmra.mxu0 %v6547_v10  ;;  %4378 = vmatmul.mubr.bf16.gmra.mxu1 %v6550_v56  ;;  %v6555_v56 = vld [vmem:[%s9966_s0 + $0xa38] ss:$52 sps:$4 sm:$0xff]  }
 0x1c2   :  { %v8161_v32 = vadd.f32 %v3865_v39, %v3577_v58  ;;  %v8164_v45 = vadd.f32 %v4026_v3, %v7710_v51  ;;  %4224 = vmatprep.mubr.bf16.mxu0 %v6557_v35  ;;  %4385 = vmatprep.mubr.bf16.mxu1 %v6560_v63  ;;  %v6558_v51 = vld [vmem:[%s9966_s0 + $0x3c0] ss:$52 sps:$4 sm:$0xff]  }
 0x1c3   :  { %v3867_v6 = vpop.f32.mrf.mxu1  ;;  %v4028_v38 = vpop.f32.mrf.mxu0  ;;  %v6566_v58 = vld [vmem:[%s9966_s0 + $0x42c] ss:$52 sps:$4 sm:$0xff]  }
 0x1c5   :  { %v3868_v47 = vpop.f32.mrf.mxu1  ;;  %v4029_v10 = vpop.f32.mrf.mxu0 }
 0x1c6   :  { %v8178_v35 = vadd.f32 %v3868_v47, %v3580_v61  ;;  %v8181_v63 = vadd.f32 %v4029_v10, %v7726_v4 }
 0x1c7   :  { %v3870_v39 = vpop.f32.mrf.mxu1  ;;  %v4031_v3 = vpop.f32.mrf.mxu0 }
 0x1c8   :  { %9988 = vst [vmem:[#allocation18_spill] sm:$0xff] %v8181_v63  ;;  %v3588_v39 = vadd.f32 %v7688_v31, %v7966_v26  ;;  %v6574_v26 = vld [vmem:[%s9966_s0 + $0x494] ss:$52 sps:$4 sm:$0xff]  }
 0x1c9   :  { %v3873_v6 = vpop.f32.mrf.mxu1  ;;  %v4034_v38 = vpop.f32.mrf.mxu0  ;;  %4225 = vmatmul.mubr.bf16.gmra.mxu0 %v6555_v56  ;;  %4386 = vmatmul.mubr.bf16.gmra.mxu1 %v6558_v51  ;;  %v6564_v56 = vld [vmem:[%s9966_s0 + $0x428] ss:$52 sps:$4 sm:$0xff]  }
 0x1ca   :  { %v8191_v47 = vadd.f32 %v3873_v6, %v3585_v14  ;;  %v8194_v4 = vadd.f32 %v4034_v38, %v7738_v19  ;;  %4232 = vmatprep.mubr.bf16.mxu0 %v6563_v28  ;;  %4393 = vmatprep.mubr.bf16.mxu1 %v6566_v58  ;;  %v6571_v28 = vld [vmem:[%s9966_s0 + $0xb0c] ss:$52 sps:$4 sm:$0xff]   ;;  %v3593_v6 = vadd.f32 %v7688_v31, %v7988_v0 }
 0x1cb   :  { %v3875_v61 = vpop.f32.mrf.mxu1  ;;  %v4036_v10 = vpop.f32.mrf.mxu0  ;;  %v3596_v0 = vadd.f32 %v7688_v31, %v7998_v9  ;;  %v6577_v9 = vld [vmem:[%s9966_s0 + $0xb74] ss:$52 sps:$4 sm:$0xff]  }
 0x1cd   :  { %v3876_v3 = vpop.f32.mrf.mxu1  ;;  %v4037_v63 = vpop.f32.mrf.mxu0 }
 0x1ce   :  { %v8204_v51 = vadd.f32 %v3876_v3, %v3588_v39  ;;  %v8207_v19 = vadd.f32 %v4037_v63, %v7750_v37  ;;  %v6677_v63 = vld [vmem:[%s9965_s1 + $0x2d0] sm:$0xff]  }
 0x1cf   :  { %v3878_v58 = vpop.f32.mrf.mxu1  ;;  %v4039_v14 = vpop.f32.mrf.mxu0  ;;  %4886 = vmatpush2.bf16.msra.mxu1 %v6677_v63 }
 0x1d0   :  { %4887 = vmatprep.subr.bf16.mxu1 %v9979_v17  ;;  %v6580_v14 = vld [vmem:[%s9966_s0 + $0x4fc] ss:$52 sps:$4 sm:$0xff]  }
 0x1d1   :  { %v3881_v38 = vpop.f32.mrf.mxu1  ;;  %v4042_v61 = vpop.f32.mrf.mxu0  ;;  %4233 = vmatmul.mubr.bf16.gmra.mxu0 %v6561_v25  ;;  %4394 = vmatmul.mubr.bf16.gmra.mxu1 %v6564_v56  ;;  %v6569_v56 = vld [vmem:[%s9966_s0 + $0xb08] ss:$52 sps:$4 sm:$0xff]  }
 0x1d2   :  { %v8217_v10 = vadd.f32 %v3881_v38, %v3593_v6  ;;  %v8220_v37 = vadd.f32 %v4042_v61, %v7762_v52  ;;  %4240 = vmatprep.mubr.bf16.mxu0 %v6571_v28  ;;  %4401 = vmatprep.mubr.bf16.mxu1 %v6574_v26  ;;  %v6572_v52 = vld [vmem:[%s9966_s0 + $0x490] ss:$52 sps:$4 sm:$0xff]   ;;  %v3601_v61 = vadd.f32 %v7688_v31, %v8020_v46 }
 0x1d3   :  { %v3883_v39 = vpop.f32.mrf.mxu1  ;;  %v4044_v3 = vpop.f32.mrf.mxu0  ;;  %v6575_v46 = vld [vmem:[%s9966_s0 + $0xb70] ss:$52 sps:$4 sm:$0xff]  }
 0x1d5   :  { %v3884_v58 = vpop.f32.mrf.mxu1  ;;  %v4045_v25 = vpop.f32.mrf.mxu0 }
 0x1d6   :  { %v8234_v28 = vadd.f32 %v3884_v58, %v3596_v0  ;;  %v8237_v26 = vadd.f32 %v4045_v25, %v7778_v5  ;;  %v3604_v25 = vadd.f32 %v7688_v31, %v8030_v54  ;;  %v6588_v54 = vld [vmem:[%s9966_s0 + $0x564] ss:$52 sps:$4 sm:$0xff]  }
 0x1d7   :  { %v3886_v6 = vpop.f32.mrf.mxu1  ;;  %v4047_v38 = vpop.f32.mrf.mxu0 }
 0x1d9   :  { %v3889_v63 = vpop.f32.mrf.mxu1  ;;  %v4050_v39 = vpop.f32.mrf.mxu0  ;;  %4241 = vmatmul.mubr.bf16.gmra.mxu0 %v6569_v56  ;;  %4402 = vmatmul.mubr.bf16.gmra.mxu1 %v6572_v52  ;;  %v6578_v56 = vld [vmem:[%s9966_s0 + $0x4f8] ss:$52 sps:$4 sm:$0xff]  }
 0x1da   :  { %v8247_v3 = vadd.f32 %v3889_v63, %v3601_v61  ;;  %v8250_v5 = vadd.f32 %v4050_v39, %v7790_v24  ;;  %4248 = vmatprep.mubr.bf16.mxu0 %v6577_v9  ;;  %4409 = vmatprep.mubr.bf16.mxu1 %v6580_v14  ;;  %v6585_v9 = vld [vmem:[%s9966_s0 + $0xbdc] ss:$52 sps:$4 sm:$0xff]   ;;  %v3609_v63 = vadd.f32 %v7688_v31, %v8052_v20 }
 0x1db   :  { %v3891_v0 = vpop.f32.mrf.mxu1  ;;  %v4052_v58 = vpop.f32.mrf.mxu0  ;;  %v3612_v20 = vadd.f32 %v7688_v31, %v8062_v36  ;;  %v6591_v36 = vld [vmem:[%s9966_s0 + $0xc44] ss:$52 sps:$4 sm:$0xff]  }
 0x1dd   :  { %v3892_v6 = vpop.f32.mrf.mxu1  ;;  %v4053_v38 = vpop.f32.mrf.mxu0 }
 0x1de   :  { %v8260_v52 = vadd.f32 %v3892_v6, %v3604_v25  ;;  %v8263_v24 = vadd.f32 %v4053_v38, %v7802_v40  ;;  %v6691_v25 = vld [vmem:[%s9965_s1 + $0x2c8] sm:$0xff]  }
 0x1df   :  { %v3894_v14 = vpop.f32.mrf.mxu1  ;;  %v4055_v61 = vpop.f32.mrf.mxu0  ;;  %4888 = vmatpush2.bf16.msra.mxu1 %v6691_v25 }
 0x1e0   :  { %4889 = vmatprep.subr.bf16.mxu1 %v9979_v17  ;;  %v6594_v61 = vld [vmem:[%s9966_s0 + $0x5cc] ss:$52 sps:$4 sm:$0xff]  }
 0x1e1   :  { %v3897_v39 = vpop.f32.mrf.mxu1  ;;  %v4058_v0 = vpop.f32.mrf.mxu0  ;;  %4249 = vmatmul.mubr.bf16.gmra.mxu0 %v6575_v46  ;;  %4410 = vmatmul.mubr.bf16.gmra.mxu1 %v6578_v56  ;;  %v6583_v56 = vld [vmem:[%s9966_s0 + $0xbd8] ss:$52 sps:$4 sm:$0xff]  }
 0x1e2   :  { %v8273_v58 = vadd.f32 %v3897_v39, %v3609_v63  ;;  %v8276_v40 = vadd.f32 %v4058_v0, %v7814_v2  ;;  %4256 = vmatprep.mubr.bf16.mxu0 %v6585_v9  ;;  %4417 = vmatprep.mubr.bf16.mxu1 %v6588_v54  ;;  %v6586_v2 = vld [vmem:[%s9966_s0 + $0x560] ss:$52 sps:$4 sm:$0xff]   ;;  %v3617_v0 = vadd.f32 %v7688_v31, %v8084_v59 }
 0x1e3   :  { %v3899_v6 = vpop.f32.mrf.mxu1  ;;  %v4060_v38 = vpop.f32.mrf.mxu0  ;;  %v6589_v59 = vld [vmem:[%s9966_s0 + $0xc40] ss:$52 sps:$4 sm:$0xff]  }
 0x1e5   :  { %v3900_v14 = vpop.f32.mrf.mxu1  ;;  %v4061_v46 = vpop.f32.mrf.mxu0 }
 0x1e6   :  { %v8290_v9 = vadd.f32 %v3900_v14, %v3612_v20  ;;  %v8293_v54 = vadd.f32 %v4061_v46, %v7830_v23  ;;  %v3620_v14 = vadd.f32 %v7688_v31, %v8091_v21  ;;  %v6602_v31 = vld [vmem:[%s9966_s0 + $0x634] ss:$52 sps:$4 sm:$0xff]  }
 0x1e7   :  { %v3902_v63 = vpop.f32.mrf.mxu1  ;;  %v4063_v39 = vpop.f32.mrf.mxu0 }
 0x1e8   :  { %v8330_v39 = vld [vmem:[%s9967_s2] ss:$0 sm:$0xff] }
 0x1e9   :  { %v3905_v25 = vpop.f32.mrf.mxu1  ;;  %v4066_v17 = vpop.f32.mrf.mxu0  ;;  %4257 = vmatmul.mubr.bf16.gmra.mxu0 %v6583_v56  ;;  %4418 = vmatmul.mubr.bf16.gmra.mxu1 %v6586_v2  ;;  %v6592_v56 = vld [vmem:[%s9966_s0 + $0x5c8] ss:$52 sps:$4 sm:$0xff]  }
 0x1ea   :  { %v8303_v6 = vadd.f32 %v3905_v25, %v3617_v0  ;;  %v8306_v23 = vadd.f32 %v4066_v17, %v7842_v41  ;;  %4264 = vmatprep.mubr.bf16.mxu0 %v6591_v36  ;;  %4425 = vmatprep.mubr.bf16.mxu1 %v6594_v61  ;;  %v6599_v36 = vld [vmem:[%s9966_s0 + $0xcac] ss:$52 sps:$4 sm:$0xff]   ;;  %v3625_v0 = vadd.f32 %v8330_v39, %v8109_v55 }
 0x1eb   :  { %v3907_v38 = vpop.f32.mrf.mxu1  ;;  %v4068_v20 = vpop.f32.mrf.mxu0  ;;  %v3628_v55 = vadd.f32 %v8330_v39, %v8118_v18  ;;  %v6605_v18 = vld [vmem:[%s9966_s0 + $0x69c] ss:$52 sps:$4 sm:$0xff]  }
 0x1ec   :  { %v6704_v20 = vld [vmem:[%s9965_s1 + $0x2c0] sm:$0xff]  }
 0x1ed   :  { %v3908_v46 = vpop.f32.mrf.mxu1  ;;  %v4069_v63 = vpop.f32.mrf.mxu0  ;;  %4890 = vmatpush2.bf16.msra.mxu1 %v6704_v20 }
 0x1ee   :  { %v8316_v2 = vadd.f32 %v3908_v46, %v3620_v14  ;;  %v8319_v41 = vadd.f32 %v4069_v63, %v7854_v49 }
 0x1ef   :  { %v3910_v21 = vpop.f32.mrf.mxu1  ;;  %v4071_v61 = vpop.f32.mrf.mxu0 }
 0x1f0   :  { %v6608_v21 = vld [vmem:[%s9966_s0 + $0x24] ss:$52 sps:$4 sm:$0xff]  }
 0x1f1   :  { %v3913_v49 = vpop.f32.mrf.mxu1  ;;  %v4074_v25 = vpop.f32.mrf.mxu0  ;;  %4265 = vmatmul.mubr.bf16.gmra.mxu0 %v6589_v59  ;;  %4426 = vmatmul.mubr.bf16.gmra.mxu1 %v6592_v56  ;;  %v6597_v56 = vld [vmem:[%s9966_s0 + $0xca8] ss:$52 sps:$4 sm:$0xff]  }
 0x1f2   :  { %v8334_v17 = vadd.f32 %v3913_v49, %v3625_v0  ;;  %v8337_v38 = vadd.f32 %v4074_v25, %v7866_v30  ;;  %4272 = vmatprep.mubr.bf16.mxu0 %v6599_v36  ;;  %4433 = vmatprep.mubr.bf16.mxu1 %v6602_v31  ;;  %v6600_v30 = vld [vmem:[%s9966_s0 + $0x630] ss:$52 sps:$4 sm:$0xff]   ;;  %v3633_v49 = vadd.f32 %v8330_v39, %v8137_v53  ;;  %v6603_v53 = vld [vmem:[%s9966_s0 + $0x698] ss:$52 sps:$4 sm:$0xff]  }
 0x1f3   :  { %v3915_v14 = vpop.f32.mrf.mxu1  ;;  %v4076_v46 = vpop.f32.mrf.mxu0 }
 0x1f5   :  { %v3916_v63 = vpop.f32.mrf.mxu1  ;;  %v4077_v59 = vpop.f32.mrf.mxu0 }
 0x1f6   :  { %v8350_v36 = vadd.f32 %v3916_v63, %v3628_v55  ;;  %v8353_v31 = vadd.f32 %v4077_v59, %v7881_v60  ;;  %v3636_v63 = vadd.f32 %v8330_v39, %v8143_v7 }
 0x1f7   :  { %v3918_v61 = vpop.f32.mrf.mxu1  ;;  %v4079_v0 = vpop.f32.mrf.mxu0 }
 0x1f8   :  { %v6616_v0 = vld [vmem:[%s9966_s0 + $0x8c] ss:$52 sps:$4 sm:$0xff]  }
 0x1f9   :  { %v3921_v25 = vpop.f32.mrf.mxu1  ;;  %v4082_v20 = vpop.f32.mrf.mxu0  ;;  %4273 = vmatmul.mubr.bf16.gmra.mxu0 %v6597_v56  ;;  %4434 = vmatmul.mubr.bf16.gmra.mxu1 %v6600_v30  ;;  %v6606_v56 = vld [vmem:[%s9966_s0 + $0x20] ss:$52 sps:$4 sm:$0xff]  }
 0x1fa   :  { %v8363_v14 = vadd.f32 %v3921_v25, %v3633_v49  ;;  %v8366_v60 = vadd.f32 %v4082_v20, %v7893_v12  ;;  %4441 = vmatprep.mubr.bf16.mxu1 %v6605_v18  ;;  %4602 = vmatprep.mubr.bf16.mxu0 %v6608_v21  ;;  %v6613_v18 = vld [vmem:[%s9966_s0 + $0x704] ss:$52 sps:$4 sm:$0xff]   ;;  %v6636_v49 = vld [vmem:[%s9965_s1 + $0x330] sm:$0xff]   ;;  %v3641_v25 = vadd.f32 %v8330_v39, %v7498_v43  ;;  %v6663_v43 = vld [vmem:[%s9965_s1 + $0x328] sm:$0xff]  }
 0x1fb   :  { %v3923_v46 = vpop.f32.mrf.mxu1  ;;  %v4084_v55 = vpop.f32.mrf.mxu0 }
 0x1fd   :  { %v3924_v59 = vpop.f32.mrf.mxu1  ;;  %v4085_v61 = vpop.f32.mrf.mxu0 }
 0x1fe   :  { %v8376_v30 = vadd.f32 %v3924_v59, %v3636_v63  ;;  %v8379_v12 = vadd.f32 %v4085_v61, %v7905_v48  ;;  %v3644_v61 = vadd.f32 %v8330_v39, %v7512_v50  ;;  %v6622_v50 = vld [vmem:[%s9966_s0 + $0xf4] ss:$52 sps:$4 sm:$0xff]  }
 0x1ff   :  { %v3926_v7 = vpop.f32.mrf.mxu1  ;;  %v4087_v21 = vpop.f32.mrf.mxu0 }
 0x200   :  { %v6619_v21 = vld [vmem:[%s9966_s0 + $0x76c] ss:$52 sps:$4 sm:$0xff]  }
 0x201   :  { %v3929_v20 = vpop.f32.mrf.mxu1  ;;  %v4090_v48 = vpop.f32.mrf.mxu0  ;;  %4442 = vmatmul.mubr.bf16.gmra.mxu1 %v6603_v53  ;;  %4603 = vmatmul.mubr.bf16.vlgmr.msra.gmra.mxu0 %v6606_v56 }
 0x202   :  { %v8392_v46 = vadd.f32 %v3929_v20, %v3641_v25  ;;  %v8395_v55 = vadd.f32 %v4090_v48, %v7920_v44  ;;  %6067 = vmatpush3.bf16.msra.mxu0 %v7928_v34  ;;  %4449 = vmatprep.mubr.bf16.mxu1 %v6613_v18  ;;  %v6611_v44 = vld [vmem:[%s9966_s0 + $0x700] ss:$52 sps:$4 sm:$0xff]   ;;  %v6614_v34 = vld [vmem:[%s9966_s0 + $0x88] ss:$52 sps:$4 sm:$0xff]   ;;  %v3649_v20 = vadd.f32 %v8330_v39, %v7526_v57 }
 0x203   :  { %v3931_v63 = vpop.f32.mrf.mxu1  ;;  %v4092_v59 = vpop.f32.mrf.mxu0  ;;  %4610 = vmatprep.mubr.bf16.mxu0 %v6616_v0  ;;  %6068 = vmatprep.subr.bf16.mxu0 %v6636_v49  ;;  %v3652_v57 = vadd.f32 %v8330_v39, %v7540_v1  ;;  %v6626_v1 = vld [vmem:[%s9966_s0 + $0x7d4] ss:$52 sps:$4 sm:$0xff]  }
 0x205   :  { %v3932_v53 = vpop.f32.mrf.mxu1  ;;  %v4093_v56 = vpop.f32.mrf.mxu0 }
 0x206   :  { %v8409_v18 = vadd.f32 %v3932_v53, %v3644_v61  ;;  %v8412_v7 = vadd.f32 %v4093_v56, %v7942_v13  ;;  %6069 = vmatpush3.bf16.msra.mxu0 %v6636_v49  ;;  %v6690_v13 = vld [vmem:[%s9965_s1 + $0x320] sm:$0xff]   ;;  %v6717_v56 = vld [vmem:[%s9965_s1 + $0x318] sm:$0xff]  }
 0x207   :  { %v3934_v0 = vpop.f32.mrf.mxu1  ;;  %v4095_v25 = vpop.f32.mrf.mxu0  ;;  %6070 = vmatprep.subr.bf16.mxu0 %v6663_v43 }
 0x208   :  { %v6629_v0 = vld [vmem:[%s9966_s0 + $0x15c] ss:$52 sps:$4 sm:$0xff]  }
 0x209   :  { %v3937_v48 = vpop.f32.mrf.mxu1  ;;  %v4098_v63 = vpop.f32.mrf.mxu0  ;;  %4450 = vmatmul.mubr.bf16.gmra.mxu1 %v6611_v44  ;;  %4611 = vmatmul.mubr.bf16.gmra.mxu0 %v6614_v34 }
 0x20a   :  { %v8425_v59 = vadd.f32 %v3937_v48, %v3649_v20  ;;  %v8428_v61 = vadd.f32 %v4098_v63, %v7958_v33  ;;  %4457 = vmatprep.mubr.bf16.mxu1 %v6619_v21  ;;  %4618 = vmatprep.mubr.bf16.mxu0 %v6622_v50  ;;  %v6617_v33 = vld [vmem:[%s9966_s0 + $0x768] ss:$52 sps:$4 sm:$0xff]   ;;  %v6620_v21 = vld [vmem:[%s9966_s0 + $0xf0] ss:$52 sps:$4 sm:$0xff]   ;;  %v3657_v48 = vadd.f32 %v8330_v39, %v7554_v8 }
 0x20b   :  { %v3939_v49 = vpop.f32.mrf.mxu1  ;;  %v4100_v53 = vpop.f32.mrf.mxu0  ;;  %6071 = vmatpush3.bf16.msra.mxu0 %v6663_v43 }
 0x20c   :  { %6072 = vmatprep.subr.bf16.mxu0 %v6690_v13 }
 0x20d   :  { %v3940_v44 = vpop.f32.mrf.mxu1  ;;  %v4101_v34 = vpop.f32.mrf.mxu0 }
 0x20e   :  { %v8441_v50 = vadd.f32 %v3940_v44, %v3652_v57  ;;  %v8444_v43 = vadd.f32 %v4101_v34, %v7974_v42 }
 0x20f   :  { %v3942_v25 = vpop.f32.mrf.mxu1  ;;  %v4103_v20 = vpop.f32.mrf.mxu0  ;;  %6073 = vmatpush3.bf16.msra.mxu0 %v6690_v13  ;;  %v3660_v13 = vadd.f32 %v8330_v39, %v7568_v15  ;;  %v6635_v15 = vld [vmem:[%s9966_s0 + $0x1c4] ss:$52 sps:$4 sm:$0xff]  }
 0x210   :  { %6074 = vmatprep.subr.bf16.mxu0 %v6717_v56  ;;  %v3665_v20 = vadd.f32 %v8330_v39, %v7582_v22  ;;  %v6630_v22 = vld [vmem:[%s9966_s0 + $0x838] ss:$52 sps:$4 sm:$0xff]  }
 0x211   :  { %v3945_v63 = vpop.f32.mrf.mxu1  ;;  %v4106_v49 = vpop.f32.mrf.mxu0  ;;  %4458 = vmatmul.mubr.bf16.gmra.mxu1 %v6617_v33  ;;  %4619 = vmatmul.mubr.bf16.gmra.mxu0 %v6620_v21  ;;  %v6624_v33 = vld [vmem:[%s9966_s0 + $0x7d0] ss:$52 sps:$4 sm:$0xff]   ;;  %v6627_v21 = vld [vmem:[%s9966_s0 + $0x158] ss:$52 sps:$4 sm:$0xff]  }
 0x212   :  { %v8454_v42 = vadd.f32 %v3945_v63, %v3657_v48  ;;  %v8457_v53 = vadd.f32 %v4106_v49, %v7990_v16  ;;  %4465 = vmatprep.mubr.bf16.mxu1 %v6626_v1  ;;  %4626 = vmatprep.mubr.bf16.mxu0 %v6629_v0 }
 0x213   :  { %v3947_v57 = vpop.f32.mrf.mxu1  ;;  %v4108_v44 = vpop.f32.mrf.mxu0  ;;  %6075 = vmatpush3.bf16.msra.mxu0 %v6717_v56  ;;  %v6632_v56 = vld [vmem:[%s9966_s0 + $0x83c] ss:$52 sps:$4 sm:$0xff]  }
 0x215   :  { %v3948_v34 = vpop.f32.mrf.mxu1  ;;  %v4109_v8 = vpop.f32.mrf.mxu0 }
 0x216   :  { %v8467_v16 = vadd.f32 %v3948_v34, %v3660_v13  ;;  %v8470_v1 = vadd.f32 %v4109_v8, %v8006_v27  ;;  %v3668_v13 = vadd.f32 %v8330_v39, %v7596_v29  ;;  %v6643_v29 = vld [vmem:[%s9966_s0 + $0x22c] ss:$52 sps:$4 sm:$0xff]  }
 0x217   :  { %v3950_v0 = vpop.f32.mrf.mxu1  ;;  %v4111_v25 = vpop.f32.mrf.mxu0 }
 0x219   :  { %v3953_v48 = vpop.f32.mrf.mxu1  ;;  %v4114_v63 = vpop.f32.mrf.mxu0  ;;  %4466 = vmatmul.mubr.bf16.gmra.mxu1 %v6624_v33  ;;  %4627 = vmatmul.mubr.bf16.gmra.mxu0 %v6627_v21  ;;  %v6633_v33 = vld [vmem:[%s9966_s0 + $0x1c0] ss:$52 sps:$4 sm:$0xff]  }
 0x21a   :  { %v8480_v49 = vadd.f32 %v3953_v48, %v3665_v20  ;;  %v8483_v27 = vadd.f32 %v4114_v63, %v8022_v62  ;;  %4473 = vmatprep.mubr.bf16.mxu1 %v6632_v56  ;;  %4634 = vmatprep.mubr.bf16.mxu0 %v6635_v15  ;;  %v9990_v62 = vld [vmem:[#allocation10_spill] sm:$0xff] }
 0x21b   :  { %v3955_v57 = vpop.f32.mrf.mxu1  ;;  %v4116_v44 = vpop.f32.mrf.mxu0  ;;  %v6640_v15 = vld [vmem:[%s9966_s0 + $0x8a4] ss:$52 sps:$4 sm:$0xff]  }
 0x21c   :  { %v9992_v20 = vld [vmem:[#allocation2_spill] sm:$0xff] }
 0x21d   :  { %v3956_v34 = vpop.f32.mrf.mxu1  ;;  %v4117_v8 = vpop.f32.mrf.mxu0  ;;  %v3673_v48 = vadd.f32 %v8330_v39, %v9992_v20 }
 0x21e   :  { %v8493_v21 = vadd.f32 %v3956_v34, %v3668_v13  ;;  %v8496_v56 = vadd.f32 %v4117_v8, %v9990_v62  ;;  %v9994_v13 = vld [vmem:[#allocation11_spill] sm:$0xff]  ;;  %v6742_v8 = vld [vmem:[%s9965_s1 + $0x310] sm:$0xff]  }
 0x21f   :  { %v3958_v0 = vpop.f32.mrf.mxu1  ;;  %v4119_v25 = vpop.f32.mrf.mxu0  ;;  %6076 = vmatprep.subr.bf16.mxu0 %v6742_v8 }
 0x220   :  { %9989 = vst [vmem:[#allocation19_spill] sm:$0xff] %v8493_v21  ;;  %9991 = vst [vmem:[#allocation10_spill] sm:$0xff] %v8496_v56  ;;  %v9996_v25 = vld [vmem:[#allocation3_spill] sm:$0xff]  ;;  %6077 = vmatpush3.bf16.msra.mxu0 %v6742_v8 }
 0x221   :  { %v3961_v63 = vpop.f32.mrf.mxu1  ;;  %v4122_v57 = vpop.f32.mrf.mxu0  ;;  %4474 = vmatmul.mubr.bf16.gmra.mxu1 %v6630_v22  ;;  %4635 = vmatmul.mubr.bf16.gmra.mxu0 %v6633_v33  ;;  %v3676_v20 = vadd.f32 %v8330_v39, %v9996_v25  ;;  %v6638_v33 = vld [vmem:[%s9966_s0 + $0x8a0] ss:$52 sps:$4 sm:$0xff]  }
 0x222   :  { %v8506_v44 = vadd.f32 %v3961_v63, %v3673_v48  ;;  %v8509_v34 = vadd.f32 %v4122_v57, %v9994_v13  ;;  %4481 = vmatprep.mubr.bf16.mxu1 %v6640_v15  ;;  %4642 = vmatprep.mubr.bf16.mxu0 %v6643_v29  ;;  %v6641_v15 = vld [vmem:[%s9966_s0 + $0x228] ss:$52 sps:$4 sm:$0xff]   ;;  %v9998_v48 = vld [vmem:[#allocation12_spill] sm:$0xff]  ;;  %v6646_v57 = vld [vmem:[%s9966_s0 + $0x90c] ss:$52 sps:$4 sm:$0xff]  }
 0x223   :  { %v3963_v62 = vpop.f32.mrf.mxu1  ;;  %v4124_v0 = vpop.f32.mrf.mxu0  ;;  %v6649_v13 = vld [vmem:[%s9966_s0 + $0x294] ss:$52 sps:$4 sm:$0xff]  }
 0x224   :  { %9993 = vst [vmem:[#allocation2_spill] sm:$0xff] %v8506_v44  ;;  %9995 = vst [vmem:[#allocation11_spill] sm:$0xff] %v8509_v34  ;;  %v10000_v25 = vld [vmem:[#allocation4_spill] sm:$0xff] }
 0x225   :  { %v3964_v56 = vpop.f32.mrf.mxu1  ;;  %v4125_v22 = vpop.f32.mrf.mxu0  ;;  %v3681_v34 = vadd.f32 %v8330_v39, %v10000_v25  ;;  %v6644_v25 = vld [vmem:[%s9966_s0 + $0x908] ss:$52 sps:$4 sm:$0xff]  }
 0x226   :  { %v8522_v29 = vadd.f32 %v3964_v56, %v3676_v20  ;;  %v8525_v63 = vadd.f32 %v4125_v22, %v9998_v48  ;;  %v10002_v20 = vld [vmem:[#allocation13_spill] sm:$0xff] }
 0x227   :  { %v3966_v62 = vpop.f32.mrf.mxu1  ;;  %v4127_v0 = vpop.f32.mrf.mxu0 }
 0x228   :  { %9997 = vst [vmem:[#allocation3_spill] sm:$0xff] %v8522_v29  ;;  %9999 = vst [vmem:[#allocation12_spill] sm:$0xff] %v8525_v63  ;;  %v10004_v29 = vld [vmem:[#allocation5_spill] sm:$0xff] }
 0x229   :  { %v3969_v44 = vpop.f32.mrf.mxu1  ;;  %v4130_v8 = vpop.f32.mrf.mxu0  ;;  %4482 = vmatmul.mubr.bf16.gmra.mxu1 %v6638_v33  ;;  %4643 = vmatmul.mubr.bf16.gmra.mxu0 %v6641_v15  ;;  %v3684_v62 = vadd.f32 %v8330_v39, %v10004_v29  ;;  %v10006_v33 = vld [vmem:[#allocation14_spill] sm:$0xff]  ;;  %v6656_v29 = vld [vmem:[%s9966_s0 + $0x2fc] ss:$52 sps:$4 sm:$0xff]  }
 0x22a   :  { %v8535_v56 = vadd.f32 %v3969_v44, %v3681_v34  ;;  %v8538_v22 = vadd.f32 %v4130_v8, %v10002_v20  ;;  %4489 = vmatprep.mubr.bf16.mxu1 %v6646_v57  ;;  %4650 = vmatprep.mubr.bf16.mxu0 %v6649_v13  ;;  %v6647_v44 = vld [vmem:[%s9966_s0 + $0x290] ss:$52 sps:$4 sm:$0xff]  }
 0x22b   :  { %v3971_v48 = vpop.f32.mrf.mxu1  ;;  %v4132_v63 = vpop.f32.mrf.mxu0  ;;  %v10008_v8 = vld [vmem:[#allocation6_spill] sm:$0xff] }
 0x22c   :  { %10001 = vst [vmem:[#allocation4_spill] sm:$0xff] %v8535_v56  ;;  %10003 = vst [vmem:[#allocation13_spill] sm:$0xff] %v8538_v22  ;;  %v6653_v63 = vld [vmem:[%s9966_s0 + $0x974] ss:$52 sps:$4 sm:$0xff]   ;;  %v3689_v20 = vadd.f32 %v8330_v39, %v10008_v8  ;;  %v6651_v8 = vld [vmem:[%s9966_s0 + $0x970] ss:$52 sps:$4 sm:$0xff]  }
 0x22d   :  { %v3972_v0 = vpop.f32.mrf.mxu1  ;;  %v4133_v21 = vpop.f32.mrf.mxu0 }
 0x22e   :  { %v8548_v34 = vadd.f32 %v3972_v0, %v3684_v62  ;;  %v8551_v15 = vadd.f32 %v4133_v21, %v10006_v33  ;;  %v10009_v21 = vld [vmem:[#allocation15_spill] sm:$0xff] }
 0x22f   :  { %v3974_v57 = vpop.f32.mrf.mxu1  ;;  %v4135_v13 = vpop.f32.mrf.mxu0 }
 0x230   :  { %10005 = vst [vmem:[#allocation5_spill] sm:$0xff] %v8548_v34  ;;  %10007 = vst [vmem:[#allocation14_spill] sm:$0xff] %v8551_v15  ;;  %v10011_v34 = vld [vmem:[#allocation7_spill] sm:$0xff] }
 0x231   :  { %v3977_v48 = vpop.f32.mrf.mxu1  ;;  %v4138_v22 = vpop.f32.mrf.mxu0  ;;  %4490 = vmatmul.mubr.bf16.gmra.mxu1 %v6644_v25  ;;  %4651 = vmatmul.mubr.bf16.gmra.mxu0 %v6647_v44  ;;  %v3692_v57 = vadd.f32 %v8330_v39, %v10011_v34  ;;  %v6654_v25 = vld [vmem:[%s9966_s0 + $0x2f8] ss:$52 sps:$4 sm:$0xff]  }
 0x232   :  { %v8561_v62 = vadd.f32 %v3977_v48, %v3689_v20  ;;  %v8564_v0 = vadd.f32 %v4138_v22, %v10009_v21  ;;  %4497 = vmatprep.mubr.bf16.mxu1 %v6653_v63  ;;  %4658 = vmatprep.mubr.bf16.mxu0 %v6656_v29  ;;  %v10013_v22 = vld [vmem:[#allocation16_spill] sm:$0xff]  ;;  %v6662_v34 = vld [vmem:[%s9966_s0 + $0x364] ss:$52 sps:$4 sm:$0xff]  }
 0x233   :  { %v3979_v33 = vpop.f32.mrf.mxu1  ;;  %v4140_v15 = vpop.f32.mrf.mxu0  ;;  %v10015_v48 = vld [vmem:[#allocation8_spill] sm:$0xff] }
 0x234   :  { %10010 = vst [vmem:[#allocation6_spill] sm:$0xff] %v8564_v0  ;;  %v6659_v15 = vld [vmem:[%s9966_s0 + $0x9dc] ss:$52 sps:$4 sm:$0xff]   ;;  %v3697_v21 = vadd.f32 %v8330_v39, %v10015_v48  ;;  %v6657_v48 = vld [vmem:[%s9966_s0 + $0x9d8] ss:$52 sps:$4 sm:$0xff]  }
 0x235   :  { %v3980_v13 = vpop.f32.mrf.mxu1  ;;  %v4141_v56 = vpop.f32.mrf.mxu0 }
 0x236   :  { %v8574_v44 = vadd.f32 %v3980_v13, %v3692_v57  ;;  %v8577_v63 = vadd.f32 %v4141_v56, %v10013_v22 }
 0x237   :  { %v3982_v29 = vpop.f32.mrf.mxu1  ;;  %v4143_v20 = vpop.f32.mrf.mxu0 }
 0x238   :  { %10012 = vst [vmem:[#allocation15_spill] sm:$0xff] %v8574_v44  ;;  %10014 = vst [vmem:[#allocation7_spill] sm:$0xff] %v8577_v63  ;;  %v10016_v63 = vld [vmem:[#allocation9_spill] sm:$0xff] }
 0x239   :  { %v3985_v33 = vpop.f32.mrf.mxu1  ;;  %v4146_v0 = vpop.f32.mrf.mxu0  ;;  %4498 = vmatmul.mubr.bf16.gmra.mxu1 %v6651_v8  ;;  %4659 = vmatmul.mubr.bf16.gmra.mxu0 %v6654_v25  ;;  %v3700_v29 = vadd.f32 %v8330_v39, %v10016_v63  ;;  %v6660_v8 = vld [vmem:[%s9966_s0 + $0x360] ss:$52 sps:$4 sm:$0xff]  }
 0x23a   :  { %v8587_v57 = vadd.f32 %v3985_v33, %v3697_v21  ;;  %v8590_v56 = vadd.f32 %v4146_v0, %v8139_v11  ;;  %4505 = vmatprep.mubr.bf16.mxu1 %v6659_v15  ;;  %4666 = vmatprep.mubr.bf16.mxu0 %v6662_v34  ;;  %v10017_v11 = vld [vmem:[#allocation17_spill] sm:$0xff]  ;;  %v6670_v39 = vld [vmem:[%s9966_s0 + $0x3cc] ss:$52 sps:$4 sm:$0xff]  }
 0x23b   :  { %v3987_v13 = vpop.f32.mrf.mxu1  ;;  %v4148_v22 = vpop.f32.mrf.mxu0  ;;  %v6667_v15 = vld [vmem:[%s9966_s0 + $0xa44] ss:$52 sps:$4 sm:$0xff]  }
 0x23c   :  { %v6767_v22 = vld [vmem:[%s9965_s1 + $0x308] sm:$0xff]  }
 0x23d   :  { %v3988_v20 = vpop.f32.mrf.mxu1  ;;  %v4149_v44 = vpop.f32.mrf.mxu0  ;;  %6078 = vmatprep.subr.bf16.mxu0 %v6767_v22 }
 0x23e   :  { %v8600_v25 = vadd.f32 %v3988_v20, %v3700_v29  ;;  %v8603_v0 = vadd.f32 %v4149_v44, %v10017_v11  ;;  %6079 = vmatpush3.bf16.msra.mxu0 %v6767_v22 }
 0x23f   :  { %v3990_v63 = vpop.f32.mrf.mxu1  ;;  %v4151_v34 = vpop.f32.mrf.mxu0 }
 0x240   :  { %v6676_v34 = vld [vmem:[%s9966_s0 + $0x434] ss:$52 sps:$4 sm:$0xff]  }
 0x241   :  { %v4154_v21 = vpop.f32.mrf.mxu0  ;;  %v4315_v33 = vpop.f32.mrf.mxu1  ;;  %4506 = vmatmul.mubr.bf16.gmra.mxu1 %v6657_v48  ;;  %4667 = vmatmul.mubr.bf16.gmra.mxu0 %v6660_v8  ;;  %v6665_v48 = vld [vmem:[%s9966_s0 + $0xa40] ss:$52 sps:$4 sm:$0xff]  }
 0x242   :  { %v8612_v13 = vadd.f32 %v4154_v21, %v8161_v32  ;;  %v8615_v44 = vadd.f32 %v4315_v33, %v8164_v45  ;;  %4513 = vmatprep.mubr.bf16.mxu1 %v6667_v15  ;;  %4674 = vmatprep.mubr.bf16.mxu0 %v6670_v39  ;;  %v6668_v32 = vld [vmem:[%s9966_s0 + $0x3c8] ss:$52 sps:$4 sm:$0xff]   ;;  %v10018_v8 = vld [vmem:[#allocation18_spill] sm:$0xff] }
 0x243   :  { %v4156_v29 = vpop.f32.mrf.mxu0  ;;  %v4317_v20 = vpop.f32.mrf.mxu1  ;;  %v6673_v39 = vld [vmem:[%s9966_s0 + $0xaac] ss:$52 sps:$4 sm:$0xff]  }
 0x245   :  { %v4157_v11 = vpop.f32.mrf.mxu0  ;;  %v4318_v63 = vpop.f32.mrf.mxu1 }
 0x246   :  { %v8627_v45 = vadd.f32 %v4157_v11, %v8178_v35  ;;  %v8630_v15 = vadd.f32 %v4318_v63, %v10018_v8 }
 0x247   :  { %v4159_v21 = vpop.f32.mrf.mxu0  ;;  %v4320_v33 = vpop.f32.mrf.mxu1 }
 0x248   :  { %10019 = vst [vmem:[#allocation16_spill] sm:$0xff] %v8630_v15  ;;  %v6671_v21 = vld [vmem:[%s9966_s0 + $0xaa8] ss:$52 sps:$4 sm:$0xff]  }
 0x249   :  { %v4162_v29 = vpop.f32.mrf.mxu0  ;;  %v4323_v20 = vpop.f32.mrf.mxu1  ;;  %4514 = vmatmul.mubr.bf16.gmra.mxu1 %v6665_v48  ;;  %4675 = vmatmul.mubr.bf16.gmra.mxu0 %v6668_v32  ;;  %v6674_v48 = vld [vmem:[%s9966_s0 + $0x430] ss:$52 sps:$4 sm:$0xff]   ;;  %v6680_v32 = vld [vmem:[%s9966_s0 + $0xb14] ss:$52 sps:$4 sm:$0xff]  }
 0x24a   :  { %v8639_v35 = vadd.f32 %v4162_v29, %v8191_v47  ;;  %v8642_v22 = vadd.f32 %v4323_v20, %v8194_v4  ;;  %4521 = vmatprep.mubr.bf16.mxu1 %v6673_v39  ;;  %4682 = vmatprep.mubr.bf16.mxu0 %v6676_v34  ;;  %v6683_v39 = vld [vmem:[%s9966_s0 + $0x49c] ss:$52 sps:$4 sm:$0xff]  }
 0x24b   :  { %v4164_v11 = vpop.f32.mrf.mxu0  ;;  %v4325_v63 = vpop.f32.mrf.mxu1 }
 0x24d   :  { %v4165_v8 = vpop.f32.mrf.mxu0  ;;  %v4326_v15 = vpop.f32.mrf.mxu1 }
 0x24e   :  { %v8651_v47 = vadd.f32 %v4165_v8, %v8204_v51  ;;  %v8654_v4 = vadd.f32 %v4326_v15, %v8207_v19 }
 0x24f   :  { %v4167_v34 = vpop.f32.mrf.mxu0  ;;  %v4328_v33 = vpop.f32.mrf.mxu1 }
 0x250   :  { %v6678_v34 = vld [vmem:[%s9966_s0 + $0xb10] ss:$52 sps:$4 sm:$0xff]  }
 0x251   :  { %v4170_v29 = vpop.f32.mrf.mxu0  ;;  %v4331_v20 = vpop.f32.mrf.mxu1  ;;  %4522 = vmatmul.mubr.bf16.gmra.mxu1 %v6671_v21  ;;  %4683 = vmatmul.mubr.bf16.gmra.mxu0 %v6674_v48  ;;  %v6681_v21 = vld [vmem:[%s9966_s0 + $0x498] ss:$52 sps:$4 sm:$0xff]   ;;  %v6686_v48 = vld [vmem:[%s9966_s0 + $0xb7c] ss:$52 sps:$4 sm:$0xff]  }
 0x252   :  { %v8663_v51 = vadd.f32 %v4170_v29, %v8217_v10  ;;  %v8666_v19 = vadd.f32 %v4331_v20, %v8220_v37  ;;  %4529 = vmatprep.mubr.bf16.mxu1 %v6680_v32  ;;  %4690 = vmatprep.mubr.bf16.mxu0 %v6683_v39  ;;  %v6689_v32 = vld [vmem:[%s9966_s0 + $0x504] ss:$52 sps:$4 sm:$0xff]  }
 0x253   :  { %v4172_v15 = vpop.f32.mrf.mxu0  ;;  %v4333_v11 = vpop.f32.mrf.mxu1 }
 0x255   :  { %v4173_v63 = vpop.f32.mrf.mxu0  ;;  %v4334_v8 = vpop.f32.mrf.mxu1 }
 0x256   :  { %v8675_v10 = vadd.f32 %v4173_v63, %v8234_v28  ;;  %v8678_v37 = vadd.f32 %v4334_v8, %v8237_v26 }
 0x257   :  { %v4175_v39 = vpop.f32.mrf.mxu0  ;;  %v4336_v33 = vpop.f32.mrf.mxu1 }
 0x258   :  { %v6684_v39 = vld [vmem:[%s9966_s0 + $0xb78] ss:$52 sps:$4 sm:$0xff]  }
 0x259   :  { %v4178_v29 = vpop.f32.mrf.mxu0  ;;  %v4339_v20 = vpop.f32.mrf.mxu1  ;;  %4530 = vmatmul.mubr.bf16.gmra.mxu1 %v6678_v34  ;;  %4691 = vmatmul.mubr.bf16.gmra.mxu0 %v6681_v21  ;;  %v6687_v34 = vld [vmem:[%s9966_s0 + $0x500] ss:$52 sps:$4 sm:$0xff]   ;;  %v6694_v21 = vld [vmem:[%s9966_s0 + $0xbe4] ss:$52 sps:$4 sm:$0xff]  }
 0x25a   :  { %v8687_v28 = vadd.f32 %v4178_v29, %v8247_v3  ;;  %v8690_v26 = vadd.f32 %v4339_v20, %v8250_v5  ;;  %4537 = vmatprep.mubr.bf16.mxu1 %v6686_v48  ;;  %4698 = vmatprep.mubr.bf16.mxu0 %v6689_v32  ;;  %v6697_v48 = vld [vmem:[%s9966_s0 + $0x56c] ss:$52 sps:$4 sm:$0xff]  }
 0x25b   :  { %v4180_v15 = vpop.f32.mrf.mxu0  ;;  %v4341_v11 = vpop.f32.mrf.mxu1 }
 0x25c   :  { %v6792_v15 = vld [vmem:[%s9965_s1 + $0x300] sm:$0xff]  }
 0x25d   :  { %v4181_v63 = vpop.f32.mrf.mxu0  ;;  %v4342_v8 = vpop.f32.mrf.mxu1  ;;  %6080 = vmatprep.subr.bf16.mxu0 %v6792_v15 }
 0x25e   :  { %v8699_v3 = vadd.f32 %v4181_v63, %v8260_v52  ;;  %v8702_v5 = vadd.f32 %v4342_v8, %v8263_v24  ;;  %6081 = vmatpush3.bf16.msra.mxu0 %v6792_v15 }
 0x25f   :  { %v4183_v32 = vpop.f32.mrf.mxu0  ;;  %v4344_v33 = vpop.f32.mrf.mxu1 }
 0x261   :  { %v4186_v29 = vpop.f32.mrf.mxu0  ;;  %v4347_v20 = vpop.f32.mrf.mxu1  ;;  %4538 = vmatmul.mubr.bf16.gmra.mxu1 %v6684_v39  ;;  %4699 = vmatmul.mubr.bf16.gmra.mxu0 %v6687_v34  ;;  %v6692_v39 = vld [vmem:[%s9966_s0 + $0xbe0] ss:$52 sps:$4 sm:$0xff]  }
 0x262   :  { %v8711_v52 = vadd.f32 %v4186_v29, %v8273_v58  ;;  %v8714_v24 = vadd.f32 %v4347_v20, %v8276_v40  ;;  %4545 = vmatprep.mubr.bf16.mxu1 %v6694_v21  ;;  %4706 = vmatprep.mubr.bf16.mxu0 %v6697_v48  ;;  %v6695_v58 = vld [vmem:[%s9966_s0 + $0x568] ss:$52 sps:$4 sm:$0xff]   ;;  %v6700_v21 = vld [vmem:[%s9966_s0 + $0xc4c] ss:$52 sps:$4 sm:$0xff]  }
 0x263   :  { %v4188_v11 = vpop.f32.mrf.mxu0  ;;  %v4349_v63 = vpop.f32.mrf.mxu1  ;;  %v6703_v48 = vld [vmem:[%s9966_s0 + $0x5d4] ss:$52 sps:$4 sm:$0xff]  }
 0x265   :  { %v4189_v8 = vpop.f32.mrf.mxu0  ;;  %v4350_v32 = vpop.f32.mrf.mxu1 }
 0x266   :  { %v8726_v40 = vadd.f32 %v4189_v8, %v8290_v9  ;;  %v8729_v34 = vadd.f32 %v4350_v32, %v8293_v54 }
 0x267   :  { %v4191_v33 = vpop.f32.mrf.mxu0  ;;  %v4352_v29 = vpop.f32.mrf.mxu1 }
 0x268   :  { %v6698_v33 = vld [vmem:[%s9966_s0 + $0xc48] ss:$52 sps:$4 sm:$0xff]  }
 0x269   :  { %v4194_v20 = vpop.f32.mrf.mxu0  ;;  %v4355_v11 = vpop.f32.mrf.mxu1  ;;  %4546 = vmatmul.mubr.bf16.gmra.mxu1 %v6692_v39  ;;  %4707 = vmatmul.mubr.bf16.gmra.mxu0 %v6695_v58  ;;  %v6701_v39 = vld [vmem:[%s9966_s0 + $0x5d0] ss:$52 sps:$4 sm:$0xff]   ;;  %v6707_v58 = vld [vmem:[%s9966_s0 + $0xcb4] ss:$52 sps:$4 sm:$0xff]  }
 0x26a   :  { %v8738_v9 = vadd.f32 %v4194_v20, %v8303_v6  ;;  %v8741_v54 = vadd.f32 %v4355_v11, %v8306_v23  ;;  %4553 = vmatprep.mubr.bf16.mxu1 %v6700_v21  ;;  %4714 = vmatprep.mubr.bf16.mxu0 %v6703_v48  ;;  %v6710_v21 = vld [vmem:[%s9966_s0 + $0x63c] ss:$52 sps:$4 sm:$0xff]  }
 0x26b   :  { %v4196_v15 = vpop.f32.mrf.mxu0  ;;  %v4357_v63 = vpop.f32.mrf.mxu1 }
 0x26d   :  { %v4197_v8 = vpop.f32.mrf.mxu0  ;;  %v4358_v32 = vpop.f32.mrf.mxu1 }
 0x26e   :  { %v8750_v6 = vadd.f32 %v4197_v8, %v8316_v2  ;;  %v8753_v23 = vadd.f32 %v4358_v32, %v8319_v41 }
 0x26f   :  { %v4199_v48 = vpop.f32.mrf.mxu0  ;;  %v4360_v29 = vpop.f32.mrf.mxu1 }
 0x270   :  { %v6705_v48 = vld [vmem:[%s9966_s0 + $0xcb0] ss:$52 sps:$4 sm:$0xff]  }
 0x271   :  { %v4202_v20 = vpop.f32.mrf.mxu0  ;;  %v4363_v11 = vpop.f32.mrf.mxu1  ;;  %4554 = vmatmul.mubr.bf16.gmra.mxu1 %v6698_v33  ;;  %4715 = vmatmul.mubr.bf16.gmra.mxu0 %v6701_v39  ;;  %v6708_v33 = vld [vmem:[%s9966_s0 + $0x638] ss:$52 sps:$4 sm:$0xff]  }
 0x272   :  { %v8762_v2 = vadd.f32 %v4202_v20, %v8334_v17  ;;  %v8765_v41 = vadd.f32 %v4363_v11, %v8337_v38  ;;  %4561 = vmatprep.mubr.bf16.mxu1 %v6707_v58  ;;  %4722 = vmatprep.mubr.bf16.mxu0 %v6710_v21  ;;  %v6713_v39 = vld [vmem:[%s9966_s0 + $0x6a4] ss:$52 sps:$4 sm:$0xff]   ;;  %v6716_v58 = vld [vmem:[%s9966_s0 + $0x2c] ss:$52 sps:$4 sm:$0xff]  }
 0x273   :  { %v4204_v15 = vpop.f32.mrf.mxu0  ;;  %v4365_v63 = vpop.f32.mrf.mxu1 }
 0x275   :  { %v4205_v8 = vpop.f32.mrf.mxu0  ;;  %v4366_v32 = vpop.f32.mrf.mxu1 }
 0x276   :  { %v8774_v17 = vadd.f32 %v4205_v8, %v8350_v36  ;;  %v8777_v38 = vadd.f32 %v4366_v32, %v8353_v31 }
 0x277   :  { %v4207_v21 = vpop.f32.mrf.mxu0  ;;  %v4368_v29 = vpop.f32.mrf.mxu1 }
 0x278   :  { %v6711_v21 = vld [vmem:[%s9966_s0 + $0x6a0] ss:$52 sps:$4 sm:$0xff]  }
 0x279   :  { %v4210_v20 = vpop.f32.mrf.mxu0  ;;  %v4371_v11 = vpop.f32.mrf.mxu1  ;;  %4562 = vmatmul.mubr.bf16.gmra.mxu1 %v6705_v48  ;;  %4723 = vmatmul.mubr.bf16.gmra.mxu0 %v6708_v33  ;;  %v6714_v48 = vld [vmem:[%s9966_s0 + $0x28] ss:$52 sps:$4 sm:$0xff]   ;;  %v6720_v33 = vld [vmem:[%s9966_s0 + $0x70c] ss:$52 sps:$4 sm:$0xff]  }
 0x27a   :  { %v8786_v36 = vadd.f32 %v4210_v20, %v8363_v14  ;;  %v8789_v31 = vadd.f32 %v4371_v11, %v8366_v60  ;;  %4730 = vmatprep.mubr.bf16.mxu0 %v6713_v39  ;;  %4891 = vmatprep.mubr.bf16.mxu1 %v6716_v58  ;;  %v6723_v39 = vld [vmem:[%s9966_s0 + $0x94] ss:$52 sps:$4 sm:$0xff]  }
 0x27b   :  { %v4212_v15 = vpop.f32.mrf.mxu0  ;;  %v4373_v63 = vpop.f32.mrf.mxu1 }
 0x27d   :  { %v4213_v8 = vpop.f32.mrf.mxu0  ;;  %v4374_v32 = vpop.f32.mrf.mxu1 }
 0x27e   :  { %v8798_v14 = vadd.f32 %v4213_v8, %v8376_v30  ;;  %v8801_v60 = vadd.f32 %v4374_v32, %v8379_v12 }
 0x27f   :  { %v4215_v58 = vpop.f32.mrf.mxu0  ;;  %v4376_v29 = vpop.f32.mrf.mxu1 }
 0x280   :  { %v6718_v58 = vld [vmem:[%s9966_s0 + $0x708] ss:$52 sps:$4 sm:$0xff]  }
 0x281   :  { %v4218_v20 = vpop.f32.mrf.mxu0  ;;  %v4379_v11 = vpop.f32.mrf.mxu1  ;;  %4731 = vmatmul.mubr.bf16.gmra.mxu0 %v6711_v21  ;;  %4892 = vmatmul.mubr.bf16.vlgmr.msra.gmra.mxu1 %v6714_v48  ;;  %v6721_v21 = vld [vmem:[%s9966_s0 + $0x90] ss:$52 sps:$4 sm:$0xff]   ;;  %v6726_v48 = vld [vmem:[%s9966_s0 + $0x774] ss:$52 sps:$4 sm:$0xff]  }
 0x282   :  { %v8810_v30 = vadd.f32 %v4218_v20, %v8392_v46  ;;  %v8813_v12 = vadd.f32 %v4379_v11, %v8395_v55  ;;  %4738 = vmatprep.mubr.bf16.mxu0 %v6720_v33  ;;  %4899 = vmatprep.mubr.bf16.mxu1 %v6723_v39  ;;  %v6729_v33 = vld [vmem:[%s9966_s0 + $0xfc] ss:$52 sps:$4 sm:$0xff]  }
 0x283   :  { %v4220_v15 = vpop.f32.mrf.mxu0  ;;  %v4381_v63 = vpop.f32.mrf.mxu1 }
 0x285   :  { %v4221_v8 = vpop.f32.mrf.mxu0  ;;  %v4382_v32 = vpop.f32.mrf.mxu1 }
 0x286   :  { %v8822_v46 = vadd.f32 %v4221_v8, %v8409_v18  ;;  %v8825_v55 = vadd.f32 %v4382_v32, %v8412_v7 }
 0x287   :  { %v4223_v39 = vpop.f32.mrf.mxu0  ;;  %v4384_v29 = vpop.f32.mrf.mxu1 }
 0x288   :  { %v6724_v39 = vld [vmem:[%s9966_s0 + $0x770] ss:$52 sps:$4 sm:$0xff]  }
 0x289   :  { %v4226_v20 = vpop.f32.mrf.mxu0  ;;  %v4387_v11 = vpop.f32.mrf.mxu1  ;;  %4739 = vmatmul.mubr.bf16.gmra.mxu0 %v6718_v58  ;;  %4900 = vmatmul.mubr.bf16.gmra.mxu1 %v6721_v21  ;;  %v6727_v58 = vld [vmem:[%s9966_s0 + $0xf8] ss:$52 sps:$4 sm:$0xff]   ;;  %v6732_v21 = vld [vmem:[%s9966_s0 + $0x7dc] ss:$52 sps:$4 sm:$0xff]  }
 0x28a   :  { %v8834_v18 = vadd.f32 %v4226_v20, %v8425_v59  ;;  %v8837_v7 = vadd.f32 %v4387_v11, %v8428_v61  ;;  %4746 = vmatprep.mubr.bf16.mxu0 %v6726_v48  ;;  %4907 = vmatprep.mubr.bf16.mxu1 %v6729_v33  ;;  %v6735_v48 = vld [vmem:[%s9966_s0 + $0x164] ss:$52 sps:$4 sm:$0xff]  }
 0x28b   :  { %v4228_v15 = vpop.f32.mrf.mxu0  ;;  %v4389_v63 = vpop.f32.mrf.mxu1 }
 0x28d   :  { %v4229_v8 = vpop.f32.mrf.mxu0  ;;  %v4390_v32 = vpop.f32.mrf.mxu1 }
 0x28e   :  { %v8846_v59 = vadd.f32 %v4229_v8, %v8441_v50  ;;  %v8849_v61 = vadd.f32 %v4390_v32, %v8444_v43 }
 0x28f   :  { %v4231_v33 = vpop.f32.mrf.mxu0  ;;  %v4392_v29 = vpop.f32.mrf.mxu1 }
 0x290   :  { %v6730_v33 = vld [vmem:[%s9966_s0 + $0x7d8] ss:$52 sps:$4 sm:$0xff]  }
 0x291   :  { %v4234_v20 = vpop.f32.mrf.mxu0  ;;  %v4395_v11 = vpop.f32.mrf.mxu1  ;;  %4747 = vmatmul.mubr.bf16.gmra.mxu0 %v6724_v39  ;;  %4908 = vmatmul.mubr.bf16.gmra.mxu1 %v6727_v58  ;;  %v6733_v39 = vld [vmem:[%s9966_s0 + $0x160] ss:$52 sps:$4 sm:$0xff]   ;;  %v6738_v58 = vld [vmem:[%s9966_s0 + $0x844] ss:$52 sps:$4 sm:$0xff]  }
 0x292   :  { %v8858_v50 = vadd.f32 %v4234_v20, %v8454_v42  ;;  %v8861_v43 = vadd.f32 %v4395_v11, %v8457_v53  ;;  %4754 = vmatprep.mubr.bf16.mxu0 %v6732_v21  ;;  %4915 = vmatprep.mubr.bf16.mxu1 %v6735_v48  ;;  %v6741_v21 = vld [vmem:[%s9966_s0 + $0x1cc] ss:$52 sps:$4 sm:$0xff]  }
 0x293   :  { %v4236_v15 = vpop.f32.mrf.mxu0  ;;  %v4397_v63 = vpop.f32.mrf.mxu1 }
 0x295   :  { %v4237_v8 = vpop.f32.mrf.mxu0  ;;  %v4398_v32 = vpop.f32.mrf.mxu1 }
 0x296   :  { %v8870_v42 = vadd.f32 %v4237_v8, %v8467_v16  ;;  %v8873_v53 = vadd.f32 %v4398_v32, %v8470_v1 }
 0x297   :  { %v4239_v48 = vpop.f32.mrf.mxu0  ;;  %v4400_v29 = vpop.f32.mrf.mxu1 }
 0x298   :  { %v6736_v48 = vld [vmem:[%s9966_s0 + $0x840] ss:$52 sps:$4 sm:$0xff]  }
 0x299   :  { %v4242_v20 = vpop.f32.mrf.mxu0  ;;  %v4403_v11 = vpop.f32.mrf.mxu1  ;;  %4755 = vmatmul.mubr.bf16.gmra.mxu0 %v6730_v33  ;;  %4916 = vmatmul.mubr.bf16.gmra.mxu1 %v6733_v39  ;;  %v6739_v33 = vld [vmem:[%s9966_s0 + $0x1c8] ss:$52 sps:$4 sm:$0xff]   ;;  %v10024_v29 = vld [vmem:[#allocation10_spill] sm:$0xff] }
 0x29a   :  { %v8882_v16 = vadd.f32 %v4242_v20, %v8480_v49  ;;  %v8885_v1 = vadd.f32 %v4403_v11, %v8483_v27  ;;  %4762 = vmatprep.mubr.bf16.mxu0 %v6738_v58  ;;  %4923 = vmatprep.mubr.bf16.mxu1 %v6741_v21  ;;  %v10022_v39 = vld [vmem:[#allocation19_spill] sm:$0xff] }
 0x29b   :  { %v4244_v15 = vpop.f32.mrf.mxu0  ;;  %v4405_v63 = vpop.f32.mrf.mxu1  ;;  %v6745_v58 = vld [vmem:[%s9966_s0 + $0x8ac] ss:$52 sps:$4 sm:$0xff]   ;;  %v6748_v21 = vld [vmem:[%s9966_s0 + $0x234] ss:$52 sps:$4 sm:$0xff]  }
 0x29c   :  { %10020 = vst [vmem:[#allocation8_spill] sm:$0xff] %v8882_v16  ;;  %10021 = vst [vmem:[#allocation9_spill] sm:$0xff] %v8885_v1  ;;  %v10026_v1 = vld [vmem:[#allocation2_spill] sm:$0xff] }
 0x29d   :  { %v4245_v8 = vpop.f32.mrf.mxu0  ;;  %v4406_v32 = vpop.f32.mrf.mxu1 }
 0x29e   :  { %v8894_v49 = vadd.f32 %v4245_v8, %v10022_v39  ;;  %v8897_v27 = vadd.f32 %v4406_v32, %v10024_v29  ;;  %v10028_v39 = vld [vmem:[#allocation11_spill] sm:$0xff] }
 0x29f   :  { %v4247_v20 = vpop.f32.mrf.mxu0  ;;  %v4408_v11 = vpop.f32.mrf.mxu1 }
 0x2a0   :  { %10023 = vst [vmem:[#allocation17_spill] sm:$0xff] %v8894_v49  ;;  %10025 = vst [vmem:[#allocation18_spill] sm:$0xff] %v8897_v27  ;;  %v6743_v20 = vld [vmem:[%s9966_s0 + $0x8a8] ss:$52 sps:$4 sm:$0xff]   ;;  %v10032_v11 = vld [vmem:[#allocation12_spill] sm:$0xff] }
 0x2a1   :  { %v4250_v15 = vpop.f32.mrf.mxu0  ;;  %v4411_v63 = vpop.f32.mrf.mxu1  ;;  %4763 = vmatmul.mubr.bf16.gmra.mxu0 %v6736_v48  ;;  %4924 = vmatmul.mubr.bf16.gmra.mxu1 %v6739_v33  ;;  %v6746_v48 = vld [vmem:[%s9966_s0 + $0x230] ss:$52 sps:$4 sm:$0xff]   ;;  %v10030_v33 = vld [vmem:[#allocation3_spill] sm:$0xff] }
 0x2a2   :  { %v8906_v8 = vadd.f32 %v4250_v15, %v10026_v1  ;;  %v8909_v32 = vadd.f32 %v4411_v63, %v10028_v39  ;;  %4770 = vmatprep.mubr.bf16.mxu0 %v6745_v58  ;;  %4931 = vmatprep.mubr.bf16.mxu1 %v6748_v21  ;;  %v6754_v58 = vld [vmem:[%s9966_s0 + $0x29c] ss:$52 sps:$4 sm:$0xff]  }
 0x2a3   :  { %v4252_v29 = vpop.f32.mrf.mxu0  ;;  %v4413_v27 = vpop.f32.mrf.mxu1 }
 0x2a4   :  { %10027 = vst [vmem:[#allocation19_spill] sm:$0xff] %v8906_v8  ;;  %10029 = vst [vmem:[#allocation10_spill] sm:$0xff] %v8909_v32  ;;  %v6751_v27 = vld [vmem:[%s9966_s0 + $0x914] ss:$52 sps:$4 sm:$0xff]  }
 0x2a5   :  { %v4253_v49 = vpop.f32.mrf.mxu0  ;;  %v4414_v16 = vpop.f32.mrf.mxu1  ;;  %v10034_v32 = vld [vmem:[#allocation4_spill] sm:$0xff] }
 0x2a6   :  { %v8918_v1 = vadd.f32 %v4253_v49, %v10030_v33  ;;  %v8921_v15 = vadd.f32 %v4414_v16, %v10032_v11  ;;  %v10035_v33 = vld [vmem:[#allocation13_spill] sm:$0xff] }
 0x2a7   :  { %v4255_v21 = vpop.f32.mrf.mxu0  ;;  %v4416_v63 = vpop.f32.mrf.mxu1 }
 0x2a8   :  { %10031 = vst [vmem:[#allocation2_spill] sm:$0xff] %v8918_v1  ;;  %10033 = vst [vmem:[#allocation11_spill] sm:$0xff] %v8921_v15  ;;  %v6749_v21 = vld [vmem:[%s9966_s0 + $0x910] ss:$52 sps:$4 sm:$0xff]  }
 0x2a9   :  { %v4258_v39 = vpop.f32.mrf.mxu0  ;;  %v4419_v29 = vpop.f32.mrf.mxu1  ;;  %4771 = vmatmul.mubr.bf16.gmra.mxu0 %v6743_v20  ;;  %4932 = vmatmul.mubr.bf16.gmra.mxu1 %v6746_v48  ;;  %v6752_v20 = vld [vmem:[%s9966_s0 + $0x298] ss:$52 sps:$4 sm:$0xff]   ;;  %v10039_v63 = vld [vmem:[#allocation14_spill] sm:$0xff] }
 0x2aa   :  { %v8930_v49 = vadd.f32 %v4258_v39, %v10034_v32  ;;  %v8933_v16 = vadd.f32 %v4419_v29, %v10035_v33  ;;  %4778 = vmatprep.mubr.bf16.mxu0 %v6751_v27  ;;  %4939 = vmatprep.mubr.bf16.mxu1 %v6754_v58  ;;  %v10037_v48 = vld [vmem:[#allocation5_spill] sm:$0xff] }
 0x2ab   :  { %v4260_v11 = vpop.f32.mrf.mxu0  ;;  %v4421_v15 = vpop.f32.mrf.mxu1  ;;  %v6760_v27 = vld [vmem:[%s9966_s0 + $0x304] ss:$52 sps:$4 sm:$0xff]  }
 0x2ac   :  { %10036 = vst [vmem:[#allocation3_spill] sm:$0xff] %v8933_v16  ;;  %v6757_v15 = vld [vmem:[%s9966_s0 + $0x97c] ss:$52 sps:$4 sm:$0xff]  }
 0x2ad   :  { %v4261_v1 = vpop.f32.mrf.mxu0  ;;  %v4422_v8 = vpop.f32.mrf.mxu1 }
 0x2ae   :  { %v8942_v32 = vadd.f32 %v4261_v1, %v10037_v48  ;;  %v8945_v39 = vadd.f32 %v4422_v8, %v10039_v63  ;;  %v10041_v48 = vld [vmem:[#allocation6_spill] sm:$0xff] }
 0x2af   :  { %v4263_v58 = vpop.f32.mrf.mxu0  ;;  %v4424_v29 = vpop.f32.mrf.mxu1 }
 0x2b0   :  { %10038 = vst [vmem:[#allocation12_spill] sm:$0xff] %v8942_v32  ;;  %10040 = vst [vmem:[#allocation4_spill] sm:$0xff] %v8945_v39  ;;  %v6755_v58 = vld [vmem:[%s9966_s0 + $0x978] ss:$52 sps:$4 sm:$0xff]  }
 0x2b1   :  { %v4266_v33 = vpop.f32.mrf.mxu0  ;;  %v4427_v11 = vpop.f32.mrf.mxu1  ;;  %4779 = vmatmul.mubr.bf16.gmra.mxu0 %v6749_v21  ;;  %4940 = vmatmul.mubr.bf16.gmra.mxu1 %v6752_v20  ;;  %v6758_v21 = vld [vmem:[%s9966_s0 + $0x300] ss:$52 sps:$4 sm:$0xff]   ;;  %v10042_v20 = vld [vmem:[#allocation15_spill] sm:$0xff] }
 0x2b2   :  { %v8954_v1 = vadd.f32 %v4266_v33, %v8561_v62  ;;  %v8957_v8 = vadd.f32 %v4427_v11, %v10041_v48  ;;  %4786 = vmatprep.mubr.bf16.mxu0 %v6757_v15  ;;  %4947 = vmatprep.mubr.bf16.mxu1 %v6760_v27  ;;  %v10044_v29 = vld [vmem:[#allocation7_spill] sm:$0xff] }
 0x2b3   :  { %v4268_v63 = vpop.f32.mrf.mxu0  ;;  %v4429_v39 = vpop.f32.mrf.mxu1  ;;  %v6766_v15 = vld [vmem:[%s9966_s0 + $0x36c] ss:$52 sps:$4 sm:$0xff]  }
 0x2b4   :  { %v6763_v39 = vld [vmem:[%s9966_s0 + $0x9e4] ss:$52 sps:$4 sm:$0xff]  }
 0x2b5   :  { %v4269_v32 = vpop.f32.mrf.mxu0  ;;  %v4430_v16 = vpop.f32.mrf.mxu1 }
 0x2b6   :  { %v8966_v62 = vadd.f32 %v4269_v32, %v10042_v20  ;;  %v8969_v33 = vadd.f32 %v4430_v16, %v10044_v29 }
 0x2b7   :  { %v4271_v27 = vpop.f32.mrf.mxu0  ;;  %v4432_v11 = vpop.f32.mrf.mxu1 }
 0x2b8   :  { %10043 = vst [vmem:[#allocation13_spill] sm:$0xff] %v8966_v62  ;;  %10045 = vst [vmem:[#allocation5_spill] sm:$0xff] %v8969_v33  ;;  %v6761_v27 = vld [vmem:[%s9966_s0 + $0x9e0] ss:$52 sps:$4 sm:$0xff]  }
 0x2b9   :  { %v4274_v48 = vpop.f32.mrf.mxu0  ;;  %v4435_v63 = vpop.f32.mrf.mxu1  ;;  %4787 = vmatmul.mubr.bf16.gmra.mxu0 %v6755_v58  ;;  %4948 = vmatmul.mubr.bf16.gmra.mxu1 %v6758_v21  ;;  %v6764_v58 = vld [vmem:[%s9966_s0 + $0x368] ss:$52 sps:$4 sm:$0xff]   ;;  %v6770_v21 = vld [vmem:[%s9966_s0 + $0xa4c] ss:$52 sps:$4 sm:$0xff]  }
 0x2ba   :  { %v8978_v32 = vadd.f32 %v4274_v48, %v8587_v57  ;;  %v8981_v16 = vadd.f32 %v4435_v63, %v8590_v56  ;;  %4794 = vmatprep.mubr.bf16.mxu0 %v6763_v39  ;;  %4955 = vmatprep.mubr.bf16.mxu1 %v6766_v15  ;;  %v6773_v39 = vld [vmem:[%s9966_s0 + $0x3d4] ss:$52 sps:$4 sm:$0xff]  }
 0x2bb   :  { %v4276_v20 = vpop.f32.mrf.mxu0  ;;  %v4437_v29 = vpop.f32.mrf.mxu1 }
 0x2bd   :  { %v4277_v33 = vpop.f32.mrf.mxu0  ;;  %v4438_v62 = vpop.f32.mrf.mxu1 }
 0x2be   :  { %v8990_v57 = vadd.f32 %v4277_v33, %v8600_v25  ;;  %v8993_v56 = vadd.f32 %v4438_v62, %v8603_v0 }
 0x2bf   :  { %v4279_v15 = vpop.f32.mrf.mxu0  ;;  %v4440_v11 = vpop.f32.mrf.mxu1 }
 0x2c0   :  { %v6768_v15 = vld [vmem:[%s9966_s0 + $0xa48] ss:$52 sps:$4 sm:$0xff]  }
 0x2c1   :  { %v4443_v48 = vpop.f32.mrf.mxu1  ;;  %v4604_v63 = vpop.f32.mrf.mxu0  ;;  %4795 = vmatmul.mubr.bf16.gmra.mxu0 %v6761_v27  ;;  %4956 = vmatmul.mubr.bf16.gmra.mxu1 %v6764_v58  ;;  %v6771_v27 = vld [vmem:[%s9966_s0 + $0x3d0] ss:$52 sps:$4 sm:$0xff]  }
 0x2c2   :  { %v9002_v25 = vadd.f32 %v4443_v48, %v8612_v13  ;;  %v9005_v0 = vadd.f32 %v4604_v63, %v8615_v44  ;;  %4802 = vmatprep.mubr.bf16.mxu0 %v6770_v21  ;;  %4963 = vmatprep.mubr.bf16.mxu1 %v6773_v39  ;;  %v10046_v58 = vld [vmem:[#allocation16_spill] sm:$0xff] }
 0x2c3   :  { %v4445_v62 = vpop.f32.mrf.mxu1  ;;  %v4606_v33 = vpop.f32.mrf.mxu0  ;;  %v6776_v21 = vld [vmem:[%s9966_s0 + $0xab4] ss:$52 sps:$4 sm:$0xff]   ;;  %v6779_v39 = vld [vmem:[%s9966_s0 + $0x43c] ss:$52 sps:$4 sm:$0xff]  }
 0x2c5   :  { %v4446_v20 = vpop.f32.mrf.mxu1  ;;  %v4607_v29 = vpop.f32.mrf.mxu0 }
 0x2c6   :  { %v9014_v13 = vadd.f32 %v4446_v20, %v8627_v45  ;;  %v9017_v44 = vadd.f32 %v4607_v29, %v10046_v58 }
 0x2c7   :  { %v4448_v11 = vpop.f32.mrf.mxu1  ;;  %v4609_v48 = vpop.f32.mrf.mxu0 }
 0x2c8   :  { %10047 = vst [vmem:[#allocation14_spill] sm:$0xff] %v9017_v44  ;;  %v6774_v11 = vld [vmem:[%s9966_s0 + $0xab0] ss:$52 sps:$4 sm:$0xff]  }
 0x2c9   :  { %v4451_v63 = vpop.f32.mrf.mxu1  ;;  %v4612_v62 = vpop.f32.mrf.mxu0  ;;  %4803 = vmatmul.mubr.bf16.gmra.mxu0 %v6768_v15  ;;  %4964 = vmatmul.mubr.bf16.gmra.mxu1 %v6771_v27  ;;  %v6777_v15 = vld [vmem:[%s9966_s0 + $0x438] ss:$52 sps:$4 sm:$0xff]   ;;  %v6782_v27 = vld [vmem:[%s9966_s0 + $0xb1c] ss:$52 sps:$4 sm:$0xff]  }
 0x2ca   :  { %v9026_v45 = vadd.f32 %v4451_v63, %v8639_v35  ;;  %v9029_v33 = vadd.f32 %v4612_v62, %v8642_v22  ;;  %4810 = vmatprep.mubr.bf16.mxu0 %v6776_v21  ;;  %4971 = vmatprep.mubr.bf16.mxu1 %v6779_v39  ;;  %v6785_v21 = vld [vmem:[%s9966_s0 + $0x4a4] ss:$52 sps:$4 sm:$0xff]  }
 0x2cb   :  { %v4453_v20 = vpop.f32.mrf.mxu1  ;;  %v4614_v29 = vpop.f32.mrf.mxu0 }
 0x2cd   :  { %v4454_v58 = vpop.f32.mrf.mxu1  ;;  %v4615_v44 = vpop.f32.mrf.mxu0 }
 0x2ce   :  { %v9038_v35 = vadd.f32 %v4454_v58, %v8651_v47  ;;  %v9041_v22 = vadd.f32 %v4615_v44, %v8654_v4 }
 0x2cf   :  { %v4456_v39 = vpop.f32.mrf.mxu1  ;;  %v4617_v48 = vpop.f32.mrf.mxu0 }
 0x2d0   :  { %v6780_v39 = vld [vmem:[%s9966_s0 + $0xb18] ss:$52 sps:$4 sm:$0xff]  }
 0x2d1   :  { %v4459_v63 = vpop.f32.mrf.mxu1  ;;  %v4620_v62 = vpop.f32.mrf.mxu0  ;;  %4811 = vmatmul.mubr.bf16.gmra.mxu0 %v6774_v11  ;;  %4972 = vmatmul.mubr.bf16.gmra.mxu1 %v6777_v15  ;;  %v6783_v11 = vld [vmem:[%s9966_s0 + $0x4a0] ss:$52 sps:$4 sm:$0xff]   ;;  %v6788_v15 = vld [vmem:[%s9966_s0 + $0xb84] ss:$52 sps:$4 sm:$0xff]  }
 0x2d2   :  { %v9050_v47 = vadd.f32 %v4459_v63, %v8663_v51  ;;  %v9053_v4 = vadd.f32 %v4620_v62, %v8666_v19  ;;  %4818 = vmatprep.mubr.bf16.mxu0 %v6782_v27  ;;  %4979 = vmatprep.mubr.bf16.mxu1 %v6785_v21  ;;  %v6791_v27 = vld [vmem:[%s9966_s0 + $0x50c] ss:$52 sps:$4 sm:$0xff]  }
 0x2d3   :  { %v4461_v44 = vpop.f32.mrf.mxu1  ;;  %v4622_v20 = vpop.f32.mrf.mxu0 }
 0x2d5   :  { %v4462_v29 = vpop.f32.mrf.mxu1  ;;  %v4623_v58 = vpop.f32.mrf.mxu0 }
 0x2d6   :  { %v9062_v51 = vadd.f32 %v4462_v29, %v8675_v10  ;;  %v9065_v19 = vadd.f32 %v4623_v58, %v8678_v37 }
 0x2d7   :  { %v4464_v21 = vpop.f32.mrf.mxu1  ;;  %v4625_v48 = vpop.f32.mrf.mxu0 }
 0x2d8   :  { %v6786_v21 = vld [vmem:[%s9966_s0 + $0xb80] ss:$52 sps:$4 sm:$0xff]  }
 0x2d9   :  { %v4467_v63 = vpop.f32.mrf.mxu1  ;;  %v4628_v62 = vpop.f32.mrf.mxu0  ;;  %4819 = vmatmul.mubr.bf16.gmra.mxu0 %v6780_v39  ;;  %4980 = vmatmul.mubr.bf16.gmra.mxu1 %v6783_v11  ;;  %v6789_v39 = vld [vmem:[%s9966_s0 + $0x508] ss:$52 sps:$4 sm:$0xff]   ;;  %v6795_v11 = vld [vmem:[%s9966_s0 + $0xbec] ss:$52 sps:$4 sm:$0xff]  }
 0x2da   :  { %v9074_v10 = vadd.f32 %v4467_v63, %v8687_v28  ;;  %v9077_v37 = vadd.f32 %v4628_v62, %v8690_v26  ;;  %4826 = vmatprep.mubr.bf16.mxu0 %v6788_v15  ;;  %4987 = vmatprep.mubr.bf16.mxu1 %v6791_v27  ;;  %v6798_v15 = vld [vmem:[%s9966_s0 + $0x574] ss:$52 sps:$4 sm:$0xff]  }
 0x2db   :  { %v4469_v44 = vpop.f32.mrf.mxu1  ;;  %v4630_v20 = vpop.f32.mrf.mxu0 }
 0x2dd   :  { %v4470_v29 = vpop.f32.mrf.mxu1  ;;  %v4631_v58 = vpop.f32.mrf.mxu0 }
 0x2de   :  { %v9086_v28 = vadd.f32 %v4470_v29, %v8699_v3  ;;  %v9089_v26 = vadd.f32 %v4631_v58, %v8702_v5 }
 0x2df   :  { %v4472_v27 = vpop.f32.mrf.mxu1  ;;  %v4633_v48 = vpop.f32.mrf.mxu0 }
 0x2e0   :  { %v6793_v27 = vld [vmem:[%s9966_s0 + $0xbe8] ss:$52 sps:$4 sm:$0xff]  }
 0x2e1   :  { %v4475_v63 = vpop.f32.mrf.mxu1  ;;  %v4636_v62 = vpop.f32.mrf.mxu0  ;;  %4827 = vmatmul.mubr.bf16.gmra.mxu0 %v6786_v21  ;;  %4988 = vmatmul.mubr.bf16.gmra.mxu1 %v6789_v39  ;;  %v6796_v21 = vld [vmem:[%s9966_s0 + $0x570] ss:$52 sps:$4 sm:$0xff]   ;;  %v6801_v39 = vld [vmem:[%s9966_s0 + $0xc54] ss:$52 sps:$4 sm:$0xff]  }
 0x2e2   :  { %v9098_v3 = vadd.f32 %v4475_v63, %v8711_v52  ;;  %v9101_v5 = vadd.f32 %v4636_v62, %v8714_v24  ;;  %4834 = vmatprep.mubr.bf16.mxu0 %v6795_v11  ;;  %4995 = vmatprep.mubr.bf16.mxu1 %v6798_v15  ;;  %v6804_v11 = vld [vmem:[%s9966_s0 + $0x5dc] ss:$52 sps:$4 sm:$0xff]  }
 0x2e3   :  { %v4477_v44 = vpop.f32.mrf.mxu1  ;;  %v4638_v20 = vpop.f32.mrf.mxu0 }
 0x2e5   :  { %v4478_v29 = vpop.f32.mrf.mxu1  ;;  %v4639_v58 = vpop.f32.mrf.mxu0 }
 0x2e6   :  { %v9110_v52 = vadd.f32 %v4478_v29, %v8726_v40  ;;  %v9113_v24 = vadd.f32 %v4639_v58, %v8729_v34 }
 0x2e7   :  { %v4480_v15 = vpop.f32.mrf.mxu1  ;;  %v4641_v48 = vpop.f32.mrf.mxu0 }
 0x2e8   :  { %v6799_v15 = vld [vmem:[%s9966_s0 + $0xc50] ss:$52 sps:$4 sm:$0xff]  }
 0x2e9   :  { %v4483_v63 = vpop.f32.mrf.mxu1  ;;  %v4644_v62 = vpop.f32.mrf.mxu0  ;;  %4835 = vmatmul.mubr.bf16.gmra.mxu0 %v6793_v27  ;;  %4996 = vmatmul.mubr.bf16.gmra.mxu1 %v6796_v21  ;;  %v6802_v27 = vld [vmem:[%s9966_s0 + $0x5d8] ss:$52 sps:$4 sm:$0xff]   ;;  %v6807_v21 = vld [vmem:[%s9966_s0 + $0xcbc] ss:$52 sps:$4 sm:$0xff]  }
 0x2ea   :  { %v9122_v40 = vadd.f32 %v4483_v63, %v8738_v9  ;;  %v9125_v34 = vadd.f32 %v4644_v62, %v8741_v54  ;;  %4842 = vmatprep.mubr.bf16.mxu0 %v6801_v39  ;;  %5003 = vmatprep.mubr.bf16.mxu1 %v6804_v11  ;;  %v6810_v39 = vld [vmem:[%s9966_s0 + $0x644] ss:$52 sps:$4 sm:$0xff]  }
 0x2eb   :  { %v4485_v44 = vpop.f32.mrf.mxu1  ;;  %v4646_v20 = vpop.f32.mrf.mxu0 }
 0x2ed   :  { %v4486_v29 = vpop.f32.mrf.mxu1  ;;  %v4647_v58 = vpop.f32.mrf.mxu0 }
 0x2ee   :  { %v9134_v9 = vadd.f32 %v4486_v29, %v8750_v6  ;;  %v9137_v54 = vadd.f32 %v4647_v58, %v8753_v23 }
 0x2ef   :  { %v4488_v11 = vpop.f32.mrf.mxu1  ;;  %v4649_v48 = vpop.f32.mrf.mxu0 }
 0x2f0   :  { %v6805_v11 = vld [vmem:[%s9966_s0 + $0xcb8] ss:$52 sps:$4 sm:$0xff]  }
 0x2f1   :  { %v4491_v63 = vpop.f32.mrf.mxu1  ;;  %v4652_v62 = vpop.f32.mrf.mxu0  ;;  %4843 = vmatmul.mubr.bf16.gmra.mxu0 %v6799_v15  ;;  %5004 = vmatmul.mubr.bf16.gmra.mxu1 %v6802_v27  ;;  %v6808_v15 = vld [vmem:[%s9966_s0 + $0x640] ss:$52 sps:$4 sm:$0xff]  }
 0x2f2   :  { %v9146_v6 = vadd.f32 %v4491_v63, %v8762_v2  ;;  %v9149_v23 = vadd.f32 %v4652_v62, %v8765_v41  ;;  %4850 = vmatprep.mubr.bf16.mxu0 %v6807_v21  ;;  %5011 = vmatprep.mubr.bf16.mxu1 %v6810_v39  ;;  %v6813_v27 = vld [vmem:[%s9966_s0 + $0x6ac] ss:$52 sps:$4 sm:$0xff]   ;;  %v6814_v21 = vld [vmem:[%s9966_s0 + $0x30] ss:$52 sps:$4 sm:$0xff]  }
 0x2f3   :  { %v4493_v44 = vpop.f32.mrf.mxu1  ;;  %v4654_v20 = vpop.f32.mrf.mxu0 }
 0x2f5   :  { %v4494_v29 = vpop.f32.mrf.mxu1  ;;  %v4655_v58 = vpop.f32.mrf.mxu0 }
 0x2f6   :  { %v9158_v2 = vadd.f32 %v4494_v29, %v8774_v17  ;;  %v9161_v41 = vadd.f32 %v4655_v58, %v8777_v38 }
 0x2f7   :  { %v4496_v39 = vpop.f32.mrf.mxu1  ;;  %v4657_v48 = vpop.f32.mrf.mxu0 }
 0x2f8   :  { %v6811_v39 = vld [vmem:[%s9966_s0 + $0x6a8] ss:$52 sps:$4 sm:$0xff]  }
 0x2f9   :  { %v4499_v63 = vpop.f32.mrf.mxu1  ;;  %v4660_v62 = vpop.f32.mrf.mxu0  ;;  %4851 = vmatmul.mubr.bf16.gmra.mxu0 %v6805_v11  ;;  %5012 = vmatmul.mubr.bf16.gmra.mxu1 %v6808_v15  ;;  %v6815_v11 = vld [vmem:[%s9966_s0 + $0x98] ss:$52 sps:$4 sm:$0xff]   ;;  %v6818_v15 = vld [vmem:[%s9966_s0 + $0x714] ss:$52 sps:$4 sm:$0xff]  }
 0x2fa   :  { %v9170_v17 = vadd.f32 %v4499_v63, %v8786_v36  ;;  %v9173_v38 = vadd.f32 %v4660_v62, %v8789_v31  ;;  %5019 = vmatprep.mubr.bf16.mxu1 %v6813_v27  ;;  %6082 = vmatprep.mubr.bf16.mxu0 %v6814_v21  ;;  %v6819_v27 = vld [vmem:[%s9966_s0 + $0x100] ss:$52 sps:$4 sm:$0xff]  }
 0x2fb   :  { %v4501_v44 = vpop.f32.mrf.mxu1  ;;  %v4662_v20 = vpop.f32.mrf.mxu0 }
 0x2fd   :  { %v4502_v29 = vpop.f32.mrf.mxu1  ;;  %v4663_v58 = vpop.f32.mrf.mxu0 }
 0x2fe   :  { %v9182_v36 = vadd.f32 %v4502_v29, %v8798_v14  ;;  %v9185_v31 = vadd.f32 %v4663_v58, %v8801_v60 }
 0x2ff   :  { %v4504_v21 = vpop.f32.mrf.mxu1  ;;  %v4665_v48 = vpop.f32.mrf.mxu0 }
 0x300   :  { %v6816_v21 = vld [vmem:[%s9966_s0 + $0x710] ss:$52 sps:$4 sm:$0xff]  }
 0x301   :  { %v4507_v63 = vpop.f32.mrf.mxu1  ;;  %v4668_v62 = vpop.f32.mrf.mxu0  ;;  %5020 = vmatmul.mubr.bf16.gmra.mxu1 %v6811_v39  ;;  %6083 = vmatmul.mubr.bf16.vlgmr.msra.gmra.mxu0 %v6815_v11  ;;  %v6820_v39 = vld [vmem:[%s9966_s0 + $0x168] ss:$52 sps:$4 sm:$0xff]  }
 0x302   :  { %v9194_v14 = vadd.f32 %v4507_v63, %v8810_v30  ;;  %v9197_v60 = vadd.f32 %v4668_v62, %v8813_v12  ;;  %5027 = vmatprep.mubr.bf16.mxu1 %v6818_v15  ;;  %6086 = vmatprep.mubr.bf16.mxu0 %v6819_v27  ;;  %v6823_v11 = vld [vmem:[%s9966_s0 + $0x77c] ss:$52 sps:$4 sm:$0xff]  }
 0x303   :  { %v4509_v44 = vpop.f32.mrf.mxu1  ;;  %v4670_v20 = vpop.f32.mrf.mxu0  ;;  %v6824_v15 = vld [vmem:[%s9966_s0 + $0x1d0] ss:$52 sps:$4 sm:$0xff]  }
 0x305   :  { %v4510_v29 = vpop.f32.mrf.mxu1  ;;  %v4671_v58 = vpop.f32.mrf.mxu0 }
 0x306   :  { %v9206_v30 = vadd.f32 %v4510_v29, %v8822_v46  ;;  %v9209_v12 = vadd.f32 %v4671_v58, %v8825_v55 }
 0x307   :  { %v4512_v27 = vpop.f32.mrf.mxu1  ;;  %v4673_v48 = vpop.f32.mrf.mxu0 }
 0x308   :  { %v6821_v27 = vld [vmem:[%s9966_s0 + $0x778] ss:$52 sps:$4 sm:$0xff]  }
 0x309   :  { %v4515_v63 = vpop.f32.mrf.mxu1  ;;  %v4676_v62 = vpop.f32.mrf.mxu0  ;;  %5028 = vmatmul.mubr.bf16.gmra.mxu1 %v6816_v21  ;;  %6087 = vmatmul.mubr.bf16.gmra.mxu0 %v6820_v39  ;;  %v6825_v21 = vld [vmem:[%s9966_s0 + $0x238] ss:$52 sps:$4 sm:$0xff]  }
 0x30a   :  { %v9218_v46 = vadd.f32 %v4515_v63, %v8834_v18  ;;  %v9221_v55 = vadd.f32 %v4676_v62, %v8837_v7  ;;  %5035 = vmatprep.mubr.bf16.mxu1 %v6823_v11  ;;  %6090 = vmatprep.mubr.bf16.mxu0 %v6824_v15  ;;  %v6828_v39 = vld [vmem:[%s9966_s0 + $0x7e4] ss:$52 sps:$4 sm:$0xff]   ;;  %v6829_v11 = vld [vmem:[%s9966_s0 + $0x2a0] ss:$52 sps:$4 sm:$0xff]  }
 0x30b   :  { %v4517_v44 = vpop.f32.mrf.mxu1  ;;  %v4678_v20 = vpop.f32.mrf.mxu0 }
 0x30d   :  { %v4518_v29 = vpop.f32.mrf.mxu1  ;;  %v4679_v58 = vpop.f32.mrf.mxu0 }
 0x30e   :  { %v9230_v18 = vadd.f32 %v4518_v29, %v8846_v59  ;;  %v9233_v7 = vadd.f32 %v4679_v58, %v8849_v61 }
 0x30f   :  { %v4520_v15 = vpop.f32.mrf.mxu1  ;;  %v4681_v48 = vpop.f32.mrf.mxu0 }
 0x310   :  { %v6826_v15 = vld [vmem:[%s9966_s0 + $0x7e0] ss:$52 sps:$4 sm:$0xff]  }
 0x311   :  { %v4523_v63 = vpop.f32.mrf.mxu1  ;;  %v4684_v62 = vpop.f32.mrf.mxu0  ;;  %5036 = vmatmul.mubr.bf16.gmra.mxu1 %v6821_v27  ;;  %6091 = vmatmul.mubr.bf16.gmra.mxu0 %v6825_v21  ;;  %v6830_v27 = vld [vmem:[%s9966_s0 + $0x308] ss:$52 sps:$4 sm:$0xff]   ;;  %v6833_v21 = vld [vmem:[%s9966_s0 + $0x84c] ss:$52 sps:$4 sm:$0xff]  }
 0x312   :  { %v9242_v59 = vadd.f32 %v4523_v63, %v8858_v50  ;;  %v9245_v61 = vadd.f32 %v4684_v62, %v8861_v43  ;;  %5043 = vmatprep.mubr.bf16.mxu1 %v6828_v39  ;;  %6094 = vmatprep.mubr.bf16.mxu0 %v6829_v11  ;;  %v6834_v39 = vld [vmem:[%s9966_s0 + $0x370] ss:$52 sps:$4 sm:$0xff]  }
 0x313   :  { %v4525_v44 = vpop.f32.mrf.mxu1  ;;  %v4686_v20 = vpop.f32.mrf.mxu0 }
 0x314   :  { %v10050_v44 = vld [vmem:[#allocation8_spill] sm:$0xff]  ;;  %v10052_v20 = vld [vmem:[#allocation9_spill] sm:$0xff] }
 0x315   :  { %v4526_v29 = vpop.f32.mrf.mxu1  ;;  %v4687_v58 = vpop.f32.mrf.mxu0 }
 0x316   :  { %v9254_v50 = vadd.f32 %v4526_v29, %v8870_v42  ;;  %v9257_v43 = vadd.f32 %v4687_v58, %v8873_v53 }
 0x317   :  { %v4528_v11 = vpop.f32.mrf.mxu1  ;;  %v4689_v48 = vpop.f32.mrf.mxu0 }
 0x318   :  { %10048 = vst [vmem:[#allocation6_spill] sm:$0xff] %v9254_v50  ;;  %10049 = vst [vmem:[#allocation15_spill] sm:$0xff] %v9257_v43  ;;  %v6831_v11 = vld [vmem:[%s9966_s0 + $0x848] ss:$52 sps:$4 sm:$0xff]  }
 0x319   :  { %v4531_v63 = vpop.f32.mrf.mxu1  ;;  %v4692_v62 = vpop.f32.mrf.mxu0  ;;  %5044 = vmatmul.mubr.bf16.gmra.mxu1 %v6826_v15  ;;  %6095 = vmatmul.mubr.bf16.gmra.mxu0 %v6830_v27  ;;  %v6835_v15 = vld [vmem:[%s9966_s0 + $0x3d8] ss:$52 sps:$4 sm:$0xff]  }
 0x31a   :  { %v9266_v42 = vadd.f32 %v4531_v63, %v10050_v44  ;;  %v9269_v53 = vadd.f32 %v4692_v62, %v10052_v20  ;;  %5051 = vmatprep.mubr.bf16.mxu1 %v6833_v21  ;;  %6098 = vmatprep.mubr.bf16.mxu0 %v6834_v39  ;;  %v10054_v27 = vld [vmem:[#allocation17_spill] sm:$0xff]  ;;  %v10056_v63 = vld [vmem:[#allocation18_spill] sm:$0xff]  ;;  %v6838_v21 = vld [vmem:[%s9966_s0 + $0x8b4] ss:$52 sps:$4 sm:$0xff]  }
 0x31b   :  { %v4533_v29 = vpop.f32.mrf.mxu1  ;;  %v4694_v58 = vpop.f32.mrf.mxu0  ;;  %v6839_v39 = vld [vmem:[%s9966_s0 + $0x440] ss:$52 sps:$4 sm:$0xff]  }
 0x31c   :  { %10051 = vst [vmem:[#allocation7_spill] sm:$0xff] %v9266_v42  ;;  %10053 = vst [vmem:[#allocation16_spill] sm:$0xff] %v9269_v53  ;;  %v10058_v53 = vld [vmem:[#allocation19_spill] sm:$0xff] }
 0x31d   :  { %v4534_v43 = vpop.f32.mrf.mxu1  ;;  %v4695_v50 = vpop.f32.mrf.mxu0 }
 0x31e   :  { %v9278_v48 = vadd.f32 %v4534_v43, %v10054_v27  ;;  %v9281_v62 = vadd.f32 %v4695_v50, %v10056_v63  ;;  %v10059_v27 = vld [vmem:[#allocation10_spill] sm:$0xff] }
 0x31f   :  { %v4536_v44 = vpop.f32.mrf.mxu1  ;;  %v4697_v20 = vpop.f32.mrf.mxu0 }
 0x320   :  { %10055 = vst [vmem:[#allocation8_spill] sm:$0xff] %v9278_v48  ;;  %10057 = vst [vmem:[#allocation9_spill] sm:$0xff] %v9281_v62  ;;  %v6836_v44 = vld [vmem:[%s9966_s0 + $0x8b0] ss:$52 sps:$4 sm:$0xff]   ;;  %v10063_v20 = vld [vmem:[#allocation11_spill] sm:$0xff] }
 0x321   :  { %v4539_v29 = vpop.f32.mrf.mxu1  ;;  %v4700_v58 = vpop.f32.mrf.mxu0  ;;  %5052 = vmatmul.mubr.bf16.gmra.mxu1 %v6831_v11  ;;  %6099 = vmatmul.mubr.bf16.gmra.mxu0 %v6835_v15  ;;  %v6840_v11 = vld [vmem:[%s9966_s0 + $0x4a8] ss:$52 sps:$4 sm:$0xff]   ;;  %v10061_v15 = vld [vmem:[#allocation2_spill] sm:$0xff] }
 0x322   :  { %v9290_v43 = vadd.f32 %v4539_v29, %v10058_v53  ;;  %v9293_v50 = vadd.f32 %v4700_v58, %v10059_v27  ;;  %5059 = vmatprep.mubr.bf16.mxu1 %v6838_v21  ;;  %6102 = vmatprep.mubr.bf16.mxu0 %v6839_v39  ;;  %v6844_v21 = vld [vmem:[%s9966_s0 + $0x510] ss:$52 sps:$4 sm:$0xff]  }
 0x323   :  { %v4541_v63 = vpop.f32.mrf.mxu1  ;;  %v4702_v62 = vpop.f32.mrf.mxu0 }
 0x324   :  { %10060 = vst [vmem:[#allocation17_spill] sm:$0xff] %v9293_v50  ;;  %v6843_v62 = vld [vmem:[%s9966_s0 + $0x91c] ss:$52 sps:$4 sm:$0xff]  }
 0x325   :  { %v4542_v48 = vpop.f32.mrf.mxu1  ;;  %v4703_v42 = vpop.f32.mrf.mxu0 }
 0x326   :  { %v9302_v53 = vadd.f32 %v4542_v48, %v10061_v15  ;;  %v9305_v29 = vadd.f32 %v4703_v42, %v10063_v20  ;;  %v10065_v15 = vld [vmem:[#allocation3_spill] sm:$0xff] }
 0x327   :  { %v4544_v39 = vpop.f32.mrf.mxu1  ;;  %v4705_v58 = vpop.f32.mrf.mxu0 }
 0x328   :  { %10062 = vst [vmem:[#allocation18_spill] sm:$0xff] %v9302_v53  ;;  %10064 = vst [vmem:[#allocation19_spill] sm:$0xff] %v9305_v29  ;;  %v6841_v39 = vld [vmem:[%s9966_s0 + $0x918] ss:$52 sps:$4 sm:$0xff]   ;;  %v10068_v58 = vld [vmem:[#allocation4_spill] sm:$0xff] }
 0x329   :  { %v4547_v27 = vpop.f32.mrf.mxu1  ;;  %v4708_v63 = vpop.f32.mrf.mxu0  ;;  %5060 = vmatmul.mubr.bf16.gmra.mxu1 %v6836_v44  ;;  %6103 = vmatmul.mubr.bf16.gmra.mxu0 %v6840_v11  ;;  %v6845_v44 = vld [vmem:[%s9966_s0 + $0x578] ss:$52 sps:$4 sm:$0xff]   ;;  %v10066_v11 = vld [vmem:[#allocation12_spill] sm:$0xff] }
 0x32a   :  { %v9314_v48 = vadd.f32 %v4547_v27, %v8930_v49  ;;  %v9317_v42 = vadd.f32 %v4708_v63, %v10065_v15  ;;  %5067 = vmatprep.mubr.bf16.mxu1 %v6843_v62  ;;  %6106 = vmatprep.mubr.bf16.mxu0 %v6844_v21  ;;  %v6849_v62 = vld [vmem:[%s9966_s0 + $0x5e0] ss:$52 sps:$4 sm:$0xff]  }
 0x32b   :  { %v4549_v20 = vpop.f32.mrf.mxu1  ;;  %v4710_v29 = vpop.f32.mrf.mxu0 }
 0x32c   :  { %v6848_v29 = vld [vmem:[%s9966_s0 + $0x984] ss:$52 sps:$4 sm:$0xff]  }
 0x32d   :  { %v4550_v53 = vpop.f32.mrf.mxu1  ;;  %v4711_v50 = vpop.f32.mrf.mxu0 }
 0x32e   :  { %v9326_v49 = vadd.f32 %v4550_v53, %v10066_v11  ;;  %v9329_v27 = vadd.f32 %v4711_v50, %v10068_v58 }
 0x32f   :  { %v4552_v21 = vpop.f32.mrf.mxu1  ;;  %v4713_v63 = vpop.f32.mrf.mxu0 }
 0x330   :  { %10067 = vst [vmem:[#allocation10_spill] sm:$0xff] %v9326_v49  ;;  %10069 = vst [vmem:[#allocation2_spill] sm:$0xff] %v9329_v27  ;;  %v6846_v21 = vld [vmem:[%s9966_s0 + $0x980] ss:$52 sps:$4 sm:$0xff]   ;;  %v10072_v63 = vld [vmem:[#allocation5_spill] sm:$0xff] }
 0x331   :  { %v4555_v15 = vpop.f32.mrf.mxu1  ;;  %v4716_v20 = vpop.f32.mrf.mxu0  ;;  %5068 = vmatmul.mubr.bf16.gmra.mxu1 %v6841_v39  ;;  %6107 = vmatmul.mubr.bf16.gmra.mxu0 %v6845_v44  ;;  %v6850_v39 = vld [vmem:[%s9966_s0 + $0x648] ss:$52 sps:$4 sm:$0xff]  }
 0x332   :  { %v9338_v53 = vadd.f32 %v4555_v15, %v8954_v1  ;;  %v9341_v50 = vadd.f32 %v4716_v20, %v8957_v8  ;;  %5075 = vmatprep.mubr.bf16.mxu1 %v6848_v29  ;;  %6110 = vmatprep.mubr.bf16.mxu0 %v6849_v62  ;;  %v10070_v44 = vld [vmem:[#allocation13_spill] sm:$0xff]  ;;  %v6853_v29 = vld [vmem:[%s9966_s0 + $0x9ec] ss:$52 sps:$4 sm:$0xff]   ;;  %v6854_v62 = vld [vmem:[%s9966_s0 + $0x6b0] ss:$52 sps:$4 sm:$0xff]  }
 0x333   :  { %v4557_v11 = vpop.f32.mrf.mxu1  ;;  %v4718_v58 = vpop.f32.mrf.mxu0 }
 0x335   :  { %v4558_v27 = vpop.f32.mrf.mxu1  ;;  %v4719_v49 = vpop.f32.mrf.mxu0 }
 0x336   :  { %v9350_v1 = vadd.f32 %v4558_v27, %v10070_v44  ;;  %v9353_v8 = vadd.f32 %v4719_v49, %v10072_v63 }
 0x337   :  { %v4560_v15 = vpop.f32.mrf.mxu1  ;;  %v4721_v20 = vpop.f32.mrf.mxu0 }
 0x338   :  { %10071 = vst [vmem:[#allocation11_spill] sm:$0xff] %v9350_v1  ;;  %10073 = vst [vmem:[#allocation3_spill] sm:$0xff] %v9353_v8  ;;  %v6851_v15 = vld [vmem:[%s9966_s0 + $0x9e8] ss:$52 sps:$4 sm:$0xff]  }
 0x339   :  { %v4563_v11 = vpop.f32.mrf.mxu1  ;;  %v4724_v58 = vpop.f32.mrf.mxu0  ;;  %5076 = vmatmul.mubr.bf16.gmra.mxu1 %v6846_v21  ;;  %6111 = vmatmul.mubr.bf16.gmra.mxu0 %v6850_v39  ;;  %v6855_v21 = vld [vmem:[%s9966_s0 + $0x718] ss:$52 sps:$4 sm:$0xff]   ;;  %v6858_v39 = vld [vmem:[%s9966_s0 + $0xa54] ss:$52 sps:$4 sm:$0xff]  }
 0x33a   :  { %v9362_v27 = vadd.f32 %v4563_v11, %v8978_v32  ;;  %v9365_v49 = vadd.f32 %v4724_v58, %v8981_v16  ;;  %5083 = vmatprep.mubr.bf16.mxu1 %v6853_v29  ;;  %6114 = vmatprep.mubr.bf16.mxu0 %v6854_v62  ;;  %v6859_v29 = vld [vmem:[%s9966_s0 + $0x780] ss:$52 sps:$4 sm:$0xff]  }
 0x33b   :  { %v4565_v44 = vpop.f32.mrf.mxu1  ;;  %v4726_v63 = vpop.f32.mrf.mxu0 }
 0x33d   :  { %v4566_v8 = vpop.f32.mrf.mxu1  ;;  %v4727_v1 = vpop.f32.mrf.mxu0 }
 0x33e   :  { %v9374_v32 = vadd.f32 %v4566_v8, %v8990_v57  ;;  %v9377_v16 = vadd.f32 %v4727_v1, %v8993_v56 }
 0x33f   :  { %v4568_v62 = vpop.f32.mrf.mxu1  ;;  %v4729_v20 = vpop.f32.mrf.mxu0 }
 0x340   :  { %10074 = vst [vmem:[#allocation12_spill] sm:$0xff] %v9377_v16  ;;  %v6856_v62 = vld [vmem:[%s9966_s0 + $0xa50] ss:$52 sps:$4 sm:$0xff]  }
 0x341   :  { %v4732_v11 = vpop.f32.mrf.mxu0  ;;  %v4893_v58 = vpop.f32.mrf.mxu1  ;;  %5084 = vmatmul.mubr.bf16.gmra.mxu1 %v6851_v15  ;;  %6115 = vmatmul.mubr.bf16.gmra.mxu0 %v6855_v21  ;;  %v6860_v15 = vld [vmem:[%s9966_s0 + $0x7e8] ss:$52 sps:$4 sm:$0xff]   ;;  %v10075_v21 = vld [vmem:[#allocation14_spill] sm:$0xff] }
 0x342   :  { %v9386_v57 = vadd.f32 %v4732_v11, %v9002_v25  ;;  %v9389_v56 = vadd.f32 %v4893_v58, %v9005_v0  ;;  %5091 = vmatprep.mubr.bf16.mxu1 %v6858_v39  ;;  %6118 = vmatprep.mubr.bf16.mxu0 %v6859_v29  ;;  %v6863_v39 = vld [vmem:[%s9966_s0 + $0xabc] ss:$52 sps:$4 sm:$0xff]  }
 0x343   :  { %v4734_v1 = vpop.f32.mrf.mxu0  ;;  %v4895_v8 = vpop.f32.mrf.mxu1  ;;  %v6864_v29 = vld [vmem:[%s9966_s0 + $0x850] ss:$52 sps:$4 sm:$0xff]  }
 0x345   :  { %v4735_v44 = vpop.f32.mrf.mxu0  ;;  %v4896_v63 = vpop.f32.mrf.mxu1 }
 0x346   :  { %v9398_v25 = vadd.f32 %v4735_v44, %v9014_v13  ;;  %v9401_v0 = vadd.f32 %v4896_v63, %v10075_v21 }
 0x347   :  { %v4737_v20 = vpop.f32.mrf.mxu0  ;;  %v4898_v11 = vpop.f32.mrf.mxu1 }
 0x348   :  { %v6861_v20 = vld [vmem:[%s9966_s0 + $0xab8] ss:$52 sps:$4 sm:$0xff]  }
 0x349   :  { %v4740_v58 = vpop.f32.mrf.mxu0  ;;  %v4901_v1 = vpop.f32.mrf.mxu1  ;;  %5092 = vmatmul.mubr.bf16.gmra.mxu1 %v6856_v62  ;;  %6119 = vmatmul.mubr.bf16.gmra.mxu0 %v6860_v15  ;;  %v6865_v62 = vld [vmem:[%s9966_s0 + $0x8b8] ss:$52 sps:$4 sm:$0xff]  }
 0x34a   :  { %v9410_v13 = vadd.f32 %v4740_v58, %v9026_v45  ;;  %v9413_v8 = vadd.f32 %v4901_v1, %v9029_v33  ;;  %5099 = vmatprep.mubr.bf16.mxu1 %v6863_v39  ;;  %6122 = vmatprep.mubr.bf16.mxu0 %v6864_v29  ;;  %v6868_v15 = vld [vmem:[%s9966_s0 + $0xb24] ss:$52 sps:$4 sm:$0xff]   ;;  %v6869_v39 = vld [vmem:[%s9966_s0 + $0x920] ss:$52 sps:$4 sm:$0xff]  }
 0x34b   :  { %v4742_v44 = vpop.f32.mrf.mxu0  ;;  %v4903_v63 = vpop.f32.mrf.mxu1 }
 0x34d   :  { %v4743_v21 = vpop.f32.mrf.mxu0  ;;  %v4904_v16 = vpop.f32.mrf.mxu1 }
 0x34e   :  { %v9422_v45 = vadd.f32 %v4743_v21, %v9038_v35  ;;  %v9425_v33 = vadd.f32 %v4904_v16, %v9041_v22 }
 0x34f   :  { %v4745_v29 = vpop.f32.mrf.mxu0  ;;  %v4906_v11 = vpop.f32.mrf.mxu1 }
 0x350   :  { %v6866_v29 = vld [vmem:[%s9966_s0 + $0xb20] ss:$52 sps:$4 sm:$0xff]  }
 0x351   :  { %v4748_v58 = vpop.f32.mrf.mxu0  ;;  %v4909_v1 = vpop.f32.mrf.mxu1  ;;  %5100 = vmatmul.mubr.bf16.gmra.mxu1 %v6861_v20  ;;  %6123 = vmatmul.mubr.bf16.gmra.mxu0 %v6865_v62  ;;  %v6870_v20 = vld [vmem:[%s9966_s0 + $0x988] ss:$52 sps:$4 sm:$0xff]   ;;  %v6873_v62 = vld [vmem:[%s9966_s0 + $0xb8c] ss:$52 sps:$4 sm:$0xff]  }
 0x352   :  { %v9434_v35 = vadd.f32 %v4748_v58, %v9050_v47  ;;  %v9437_v22 = vadd.f32 %v4909_v1, %v9053_v4  ;;  %5107 = vmatprep.mubr.bf16.mxu1 %v6868_v15  ;;  %6126 = vmatprep.mubr.bf16.mxu0 %v6869_v39  ;;  %v6874_v15 = vld [vmem:[%s9966_s0 + $0x9f0] ss:$52 sps:$4 sm:$0xff]  }
 0x353   :  { %v4750_v16 = vpop.f32.mrf.mxu0  ;;  %v4911_v44 = vpop.f32.mrf.mxu1 }
 0x355   :  { %v4751_v63 = vpop.f32.mrf.mxu0  ;;  %v4912_v21 = vpop.f32.mrf.mxu1 }
 0x356   :  { %v9446_v47 = vadd.f32 %v4751_v63, %v9062_v51  ;;  %v9449_v4 = vadd.f32 %v4912_v21, %v9065_v19 }
 0x357   :  { %v4753_v39 = vpop.f32.mrf.mxu0  ;;  %v4914_v11 = vpop.f32.mrf.mxu1 }
 0x358   :  { %v6871_v39 = vld [vmem:[%s9966_s0 + $0xb88] ss:$52 sps:$4 sm:$0xff]  }
 0x359   :  { %v4756_v58 = vpop.f32.mrf.mxu0  ;;  %v4917_v1 = vpop.f32.mrf.mxu1  ;;  %5108 = vmatmul.mubr.bf16.gmra.mxu1 %v6866_v29  ;;  %6127 = vmatmul.mubr.bf16.gmra.mxu0 %v6870_v20  ;;  %v6875_v29 = vld [vmem:[%s9966_s0 + $0xa58] ss:$52 sps:$4 sm:$0xff]   ;;  %v6878_v20 = vld [vmem:[%s9966_s0 + $0xbf4] ss:$52 sps:$4 sm:$0xff]  }
 0x35a   :  { %v9458_v51 = vadd.f32 %v4756_v58, %v9074_v10  ;;  %v9461_v19 = vadd.f32 %v4917_v1, %v9077_v37  ;;  %5115 = vmatprep.mubr.bf16.mxu1 %v6873_v62  ;;  %6130 = vmatprep.mubr.bf16.mxu0 %v6874_v15  ;;  %v6879_v62 = vld [vmem:[%s9966_s0 + $0xac0] ss:$52 sps:$4 sm:$0xff]  }
 0x35b   :  { %v4758_v16 = vpop.f32.mrf.mxu0  ;;  %v4919_v44 = vpop.f32.mrf.mxu1 }
 0x35d   :  { %v4759_v63 = vpop.f32.mrf.mxu0  ;;  %v4920_v21 = vpop.f32.mrf.mxu1 }
 0x35e   :  { %v9470_v10 = vadd.f32 %v4759_v63, %v9086_v28  ;;  %v9473_v37 = vadd.f32 %v4920_v21, %v9089_v26 }
 0x35f   :  { %v4761_v15 = vpop.f32.mrf.mxu0  ;;  %v4922_v11 = vpop.f32.mrf.mxu1 }
 0x360   :  { %v6876_v15 = vld [vmem:[%s9966_s0 + $0xbf0] ss:$52 sps:$4 sm:$0xff]  }
 0x361   :  { %v4764_v58 = vpop.f32.mrf.mxu0  ;;  %v4925_v1 = vpop.f32.mrf.mxu1  ;;  %5116 = vmatmul.mubr.bf16.gmra.mxu1 %v6871_v39  ;;  %6131 = vmatmul.mubr.bf16.gmra.mxu0 %v6875_v29  ;;  %v6880_v39 = vld [vmem:[%s9966_s0 + $0xb28] ss:$52 sps:$4 sm:$0xff]  }
 0x362   :  { %v9482_v28 = vadd.f32 %v4764_v58, %v9098_v3  ;;  %v9485_v26 = vadd.f32 %v4925_v1, %v9101_v5  ;;  %5123 = vmatprep.mubr.bf16.mxu1 %v6878_v20  ;;  %6134 = vmatprep.mubr.bf16.mxu0 %v6879_v62  ;;  %v6883_v29 = vld [vmem:[%s9966_s0 + $0xc5c] ss:$52 sps:$4 sm:$0xff]  }
 0x363   :  { %v4766_v16 = vpop.f32.mrf.mxu0  ;;  %v4927_v44 = vpop.f32.mrf.mxu1  ;;  %v6884_v20 = vld [vmem:[%s9966_s0 + $0xb90] ss:$52 sps:$4 sm:$0xff]  }
 0x365   :  { %v4767_v63 = vpop.f32.mrf.mxu0  ;;  %v4928_v21 = vpop.f32.mrf.mxu1 }
 0x366   :  { %v9494_v3 = vadd.f32 %v4767_v63, %v9110_v52  ;;  %v9497_v5 = vadd.f32 %v4928_v21, %v9113_v24 }
 0x367   :  { %v4769_v62 = vpop.f32.mrf.mxu0  ;;  %v4930_v11 = vpop.f32.mrf.mxu1 }
 0x368   :  { %v6881_v62 = vld [vmem:[%s9966_s0 + $0xc58] ss:$52 sps:$4 sm:$0xff]  }
 0x369   :  { %v4772_v58 = vpop.f32.mrf.mxu0  ;;  %v4933_v1 = vpop.f32.mrf.mxu1  ;;  %5124 = vmatmul.mubr.bf16.gmra.mxu1 %v6876_v15  ;;  %6135 = vmatmul.mubr.bf16.gmra.mxu0 %v6880_v39  ;;  %v6885_v15 = vld [vmem:[%s9966_s0 + $0xbf8] ss:$52 sps:$4 sm:$0xff]  }
 0x36a   :  { %v9506_v52 = vadd.f32 %v4772_v58, %v9122_v40  ;;  %v9509_v24 = vadd.f32 %v4933_v1, %v9125_v34  ;;  %5131 = vmatprep.mubr.bf16.mxu1 %v6883_v29  ;;  %6138 = vmatprep.mubr.bf16.mxu0 %v6884_v20  ;;  %v6888_v39 = vld [vmem:[%s9966_s0 + $0xcc4] ss:$52 sps:$4 sm:$0xff]   ;;  %v6889_v29 = vld [vmem:[%s9966_s0 + $0xc60] ss:$52 sps:$4 sm:$0xff]  }
 0x36b   :  { %v4774_v16 = vpop.f32.mrf.mxu0  ;;  %v4935_v44 = vpop.f32.mrf.mxu1 }
 0x36d   :  { %v4775_v63 = vpop.f32.mrf.mxu0  ;;  %v4936_v21 = vpop.f32.mrf.mxu1 }
 0x36e   :  { %v9518_v40 = vadd.f32 %v4775_v63, %v9134_v9  ;;  %v9521_v34 = vadd.f32 %v4936_v21, %v9137_v54 }
 0x36f   :  { %v4777_v20 = vpop.f32.mrf.mxu0  ;;  %v4938_v11 = vpop.f32.mrf.mxu1 }
 0x370   :  { %v6886_v20 = vld [vmem:[%s9966_s0 + $0xcc0] ss:$52 sps:$4 sm:$0xff]  }
 0x371   :  { %v4780_v58 = vpop.f32.mrf.mxu0  ;;  %v4941_v1 = vpop.f32.mrf.mxu1  ;;  %5132 = vmatmul.mubr.bf16.gmra.mxu1 %v6881_v62  ;;  %6139 = vmatmul.mubr.bf16.gmra.mxu0 %v6885_v15  ;;  %v6890_v62 = vld [vmem:[%s9966_s0 + $0xcc8] ss:$52 sps:$4 sm:$0xff]  }
 0x372   :  { %v9530_v9 = vadd.f32 %v4780_v58, %v9146_v6  ;;  %v9533_v54 = vadd.f32 %v4941_v1, %v9149_v23  ;;  %5139 = vmatprep.mubr.bf16.mxu1 %v6888_v39  ;;  %6142 = vmatprep.mubr.bf16.mxu0 %v6889_v29 }
 0x373   :  { %v4782_v16 = vpop.f32.mrf.mxu0  ;;  %v4943_v44 = vpop.f32.mrf.mxu1 }
 0x374   :  { %10076 = vst [vmem:[#allocation4_spill] sm:$0xff] %v9530_v9 }
 0x375   :  { %v4783_v63 = vpop.f32.mrf.mxu0  ;;  %v4944_v21 = vpop.f32.mrf.mxu1 }
 0x376   :  { %v9542_v6 = vadd.f32 %v4783_v63, %v9158_v2  ;;  %v9545_v23 = vadd.f32 %v4944_v21, %v9161_v41 }
 0x377   :  { %v4785_v15 = vpop.f32.mrf.mxu0  ;;  %v4946_v39 = vpop.f32.mrf.mxu1 }
 0x379   :  { %v4788_v29 = vpop.f32.mrf.mxu0  ;;  %v4949_v11 = vpop.f32.mrf.mxu1  ;;  %5140 = vmatmul.mubr.bf16.gmra.mxu1 %v6886_v20  ;;  %6143 = vmatmul.mubr.bf16.gmra.mxu0 %v6890_v62 }
 0x37a   :  { %v9548_v58 = vadd.f32 %v4788_v29, %v9170_v17  ;;  %v9551_v1 = vadd.f32 %v4949_v11, %v9173_v38 }
 0x37b   :  { %v4790_v16 = vpop.f32.mrf.mxu0  ;;  %v4951_v44 = vpop.f32.mrf.mxu1 }
 0x37d   :  { %v4791_v9 = vpop.f32.mrf.mxu0  ;;  %v4952_v2 = vpop.f32.mrf.mxu1 }
 0x37e   :  { %v9554_v63 = vadd.f32 %v4791_v9, %v9182_v36  ;;  %v9557_v41 = vadd.f32 %v4952_v2, %v9185_v31 }
 0x37f   :  { %v4793_v21 = vpop.f32.mrf.mxu0  ;;  %v4954_v15 = vpop.f32.mrf.mxu1 }
 0x381   :  { %v4796_v20 = vpop.f32.mrf.mxu0  ;;  %v4957_v62 = vpop.f32.mrf.mxu1 }
 0x382   :  { %v9560_v17 = vadd.f32 %v4796_v20, %v9194_v14  ;;  %v9563_v38 = vadd.f32 %v4957_v62, %v9197_v60 }
 0x383   :  { %v4798_v39 = vpop.f32.mrf.mxu0  ;;  %v4959_v29 = vpop.f32.mrf.mxu1 }
 0x384   :  { %10077 = vst [vmem:[#allocation13_spill] sm:$0xff] %v9560_v17  ;;  %v10088_v17 = vld [vmem:[#allocation8_spill] sm:$0xff] }
 0x385   :  { %v4799_v11 = vpop.f32.mrf.mxu0  ;;  %v4960_v16 = vpop.f32.mrf.mxu1 }
 0x386   :  { %v9566_v36 = vadd.f32 %v4799_v11, %v9206_v30  ;;  %v9569_v31 = vadd.f32 %v4960_v16, %v9209_v12 }
 0x387   :  { %v4801_v9 = vpop.f32.mrf.mxu0  ;;  %v4962_v44 = vpop.f32.mrf.mxu1 }
 0x388   :  { %10078 = vst [vmem:[#allocation5_spill] sm:$0xff] %v9566_v36 }
 0x389   :  { %v4804_v2 = vpop.f32.mrf.mxu0  ;;  %v4965_v21 = vpop.f32.mrf.mxu1 }
 0x38a   :  { %v9572_v14 = vadd.f32 %v4804_v2, %v9218_v46  ;;  %v9575_v60 = vadd.f32 %v4965_v21, %v9221_v55 }
 0x38b   :  { %v4806_v15 = vpop.f32.mrf.mxu0  ;;  %v4967_v20 = vpop.f32.mrf.mxu1 }
 0x38c   :  { %10079 = vst [vmem:[#allocation14_spill] sm:$0xff] %v9572_v14  ;;  %v10082_v20 = vld [vmem:[#allocation6_spill] sm:$0xff] }
 0x38d   :  { %v4807_v62 = vpop.f32.mrf.mxu0  ;;  %v4968_v39 = vpop.f32.mrf.mxu1  ;;  %v10093_v14 = vld [vmem:[#allocation18_spill] sm:$0xff] }
 0x38e   :  { %v9578_v30 = vadd.f32 %v4807_v62, %v9230_v18  ;;  %v9581_v12 = vadd.f32 %v4968_v39, %v9233_v7  ;;  %v10084_v62 = vld [vmem:[#allocation15_spill] sm:$0xff] }
 0x38f   :  { %v4809_v29 = vpop.f32.mrf.mxu0  ;;  %v4970_v11 = vpop.f32.mrf.mxu1 }
 0x390   :  { %10080 = vst [vmem:[#allocation20_spill] sm:$0xff] %v9578_v30  ;;  %v10085_v30 = vld [vmem:[#allocation7_spill] sm:$0xff] }
 0x391   :  { %v4812_v16 = vpop.f32.mrf.mxu0  ;;  %v4973_v9 = vpop.f32.mrf.mxu1 }
 0x392   :  { %v9584_v46 = vadd.f32 %v4812_v16, %v9242_v59  ;;  %v9587_v55 = vadd.f32 %v4973_v9, %v9245_v61  ;;  %v10087_v16 = vld [vmem:[#allocation16_spill] sm:$0xff] }
 0x393   :  { %v4814_v44 = vpop.f32.mrf.mxu0  ;;  %v4975_v2 = vpop.f32.mrf.mxu1 }
 0x394   :  { %10081 = vst [vmem:[#allocation21_spill] sm:$0xff] %v9584_v46 }
 0x395   :  { %v4815_v21 = vpop.f32.mrf.mxu0  ;;  %v4976_v15 = vpop.f32.mrf.mxu1 }
 0x396   :  { %v9590_v18 = vadd.f32 %v4815_v21, %v10082_v20  ;;  %v9593_v7 = vadd.f32 %v4976_v15, %v10084_v62  ;;  %v10090_v20 = vld [vmem:[#allocation9_spill] sm:$0xff] }
 0x397   :  { %v4817_v39 = vpop.f32.mrf.mxu0  ;;  %v4978_v29 = vpop.f32.mrf.mxu1 }
 0x398   :  { %10083 = vst [vmem:[#allocation6_spill] sm:$0xff] %v9590_v18 }
 0x399   :  { %v4820_v11 = vpop.f32.mrf.mxu0  ;;  %v4981_v36 = vpop.f32.mrf.mxu1 }
 0x39a   :  { %v9596_v59 = vadd.f32 %v4820_v11, %v10085_v30  ;;  %v9599_v61 = vadd.f32 %v4981_v36, %v10087_v16  ;;  %v10092_v11 = vld [vmem:[#allocation17_spill] sm:$0xff] }
 0x39b   :  { %v4822_v9 = vpop.f32.mrf.mxu0  ;;  %v4983_v44 = vpop.f32.mrf.mxu1 }
 0x39c   :  { %10086 = vst [vmem:[#allocation15_spill] sm:$0xff] %v9596_v59 }
 0x39d   :  { %v4823_v2 = vpop.f32.mrf.mxu0  ;;  %v4984_v46 = vpop.f32.mrf.mxu1 }
 0x39e   :  { %v9602_v21 = vadd.f32 %v4823_v2, %v10088_v17  ;;  %v9605_v15 = vadd.f32 %v4984_v46, %v10090_v20  ;;  %v10095_v2 = vld [vmem:[#allocation19_spill] sm:$0xff] }
 0x39f   :  { %v4825_v62 = vpop.f32.mrf.mxu0  ;;  %v4986_v39 = vpop.f32.mrf.mxu1 }
 0x3a0   :  { %10089 = vst [vmem:[#allocation7_spill] sm:$0xff] %v9602_v21 }
 0x3a1   :  { %v4828_v29 = vpop.f32.mrf.mxu0  ;;  %v4989_v18 = vpop.f32.mrf.mxu1 }
 0x3a2   :  { %v9608_v30 = vadd.f32 %v4828_v29, %v9290_v43  ;;  %v9611_v36 = vadd.f32 %v4989_v18, %v10092_v11 }
 0x3a3   :  { %v4830_v16 = vpop.f32.mrf.mxu0  ;;  %v4991_v9 = vpop.f32.mrf.mxu1 }
 0x3a4   :  { %10091 = vst [vmem:[#allocation16_spill] sm:$0xff] %v9608_v30  ;;  %v10097_v30 = vld [vmem:[#allocation10_spill] sm:$0xff] }
 0x3a5   :  { %v4831_v44 = vpop.f32.mrf.mxu0  ;;  %v4992_v59 = vpop.f32.mrf.mxu1 }
 0x3a6   :  { %v9614_v17 = vadd.f32 %v4831_v44, %v10093_v14  ;;  %v9617_v46 = vadd.f32 %v4992_v59, %v10095_v2  ;;  %v10099_v44 = vld [vmem:[#allocation2_spill] sm:$0xff] }
 0x3a7   :  { %v4833_v20 = vpop.f32.mrf.mxu0  ;;  %v4994_v62 = vpop.f32.mrf.mxu1 }
 0x3a8   :  { %10094 = vst [vmem:[#allocation8_spill] sm:$0xff] %v9614_v17 }
 0x3a9   :  { %v4836_v39 = vpop.f32.mrf.mxu0  ;;  %v4997_v21 = vpop.f32.mrf.mxu1 }
 0x3aa   :  { %v9620_v43 = vadd.f32 %v4836_v39, %v9314_v48  ;;  %v9623_v18 = vadd.f32 %v4997_v21, %v9317_v42 }
 0x3ab   :  { %v4838_v29 = vpop.f32.mrf.mxu0  ;;  %v4999_v11 = vpop.f32.mrf.mxu1 }
 0x3ac   :  { %10096 = vst [vmem:[#allocation9_spill] sm:$0xff] %v9620_v43  ;;  %v10100_v43 = vld [vmem:[#allocation11_spill] sm:$0xff] }
 0x3ad   :  { %v4839_v16 = vpop.f32.mrf.mxu0  ;;  %v5000_v9 = vpop.f32.mrf.mxu1 }
 0x3ae   :  { %v9626_v14 = vadd.f32 %v4839_v16, %v10097_v30  ;;  %v9629_v59 = vadd.f32 %v5000_v9, %v10099_v44  ;;  %v10102_v16 = vld [vmem:[#allocation3_spill] sm:$0xff] }
 0x3af   :  { %v4841_v2 = vpop.f32.mrf.mxu0  ;;  %v5002_v20 = vpop.f32.mrf.mxu1 }
 0x3b0   :  { %10098 = vst [vmem:[#allocation17_spill] sm:$0xff] %v9626_v14 }
 0x3b1   :  { %v4844_v62 = vpop.f32.mrf.mxu0  ;;  %v5005_v17 = vpop.f32.mrf.mxu1 }
 0x3b2   :  { %v9632_v48 = vadd.f32 %v4844_v62, %v9338_v53  ;;  %v9635_v42 = vadd.f32 %v5005_v17, %v9341_v50 }
 0x3b3   :  { %v4846_v21 = vpop.f32.mrf.mxu0  ;;  %v5007_v39 = vpop.f32.mrf.mxu1 }
 0x3b5   :  { %v4847_v29 = vpop.f32.mrf.mxu0  ;;  %v5008_v11 = vpop.f32.mrf.mxu1 }
 0x3b6   :  { %v9638_v30 = vadd.f32 %v4847_v29, %v10100_v43  ;;  %v9641_v9 = vadd.f32 %v5008_v11, %v10102_v16 }
 0x3b7   :  { %v4849_v44 = vpop.f32.mrf.mxu0  ;;  %v5010_v2 = vpop.f32.mrf.mxu1 }
 0x3b8   :  { %10101 = vst [vmem:[#allocation18_spill] sm:$0xff] %v9638_v30 }
 0x3b9   :  { %v4852_v20 = vpop.f32.mrf.mxu0  ;;  %v9643_v14 = vpop.f32.mrf.mxu1 }
 0x3ba   :  { %v9646_v53 = vadd.f32 %v4852_v20, %v9362_v27 }
 0x3bb   :  { %v4854_v50 = vpop.f32.mrf.mxu0  ;;  %v5015_v17 = vpop.f32.mrf.mxu1 }
 0x3bd   :  { %v4855_v62 = vpop.f32.mrf.mxu0  ;;  %v9648_v21 = vpop.f32.mrf.mxu1 }
 0x3be   :  { %v9651_v39 = vadd.f32 %v4855_v62, %v9374_v32 }
 0x3bf   :  { %v4857_v43 = vpop.f32.mrf.mxu0  ;;  %v5018_v29 = vpop.f32.mrf.mxu1 }
 0x3c1   :  { %v5021_v11 = vpop.f32.mrf.mxu1  ;;  %v6084_v16 = vpop.f32.mrf.mxu0 }
 0x3c2   :  { %v9654_v44 = vadd.f32 %v5021_v11, %v9386_v57  ;;  %v5191_v2 = vadd.f32 %v6084_v16, %v9413_v8 }
 0x3c3   :  { %v5023_v30 = vpop.f32.mrf.mxu1  ;;  %v5182_v27 = vpop.f32.mrf.mxu0 }
 0x3c4   :  { %5439 = vst [vmem:[%s9968_s3 + $0x10] sm:$0xff] %v5191_v2  ;;  %v5183_v20 = vadd.f32 %v5182_v27, %v9389_v56 }
 0x3c5   :  { %v5024_v50 = vpop.f32.mrf.mxu1  ;;  %v6085_v32 = vpop.f32.mrf.mxu0 }
 0x3c6   :  { %5437 = vst [vmem:[%s9968_s3] sm:$0xff] %v5183_v20  ;;  %v9665_v17 = vadd.f32 %v5024_v50, %v9398_v25  ;;  %v5194_v57 = vadd.f32 %v6085_v32, %v9425_v33 }
 0x3c7   :  { %v5026_v8 = vpop.f32.mrf.mxu1  ;;  %v5185_v30 = vpop.f32.mrf.mxu0 }
 0x3c8   :  { %5440 = vst [vmem:[%s9968_s3 + $0x18] sm:$0xff] %v5194_v57  ;;  %v5186_v62 = vadd.f32 %v5185_v30, %v9401_v0 }
 0x3c9   :  { %v9672_v56 = vpop.f32.mrf.mxu1  ;;  %v6088_v43 = vpop.f32.mrf.mxu0 }
 0x3ca   :  { %5438 = vst [vmem:[%s9968_s3 + $0x8] sm:$0xff] %v5186_v62  ;;  %v5207_v25 = vadd.f32 %v6088_v43, %v9461_v19 }
 0x3cb   :  { %v5031_v29 = vpop.f32.mrf.mxu1  ;;  %v5198_v11 = vpop.f32.mrf.mxu0 }
 0x3cc   :  { %5443 = vst [vmem:[%s9968_s3 + $0x30] sm:$0xff] %v5207_v25  ;;  %v5199_v33 = vadd.f32 %v5198_v11, %v9437_v22 }
 0x3cd   :  { %v9682_v16 = vpop.f32.mrf.mxu1  ;;  %v6089_v0 = vpop.f32.mrf.mxu0 }
 0x3ce   :  { %5441 = vst [vmem:[%s9968_s3 + $0x20] sm:$0xff] %v5199_v33  ;;  %v5210_v2 = vadd.f32 %v6089_v0, %v9473_v37 }
 0x3cf   :  { %v5034_v27 = vpop.f32.mrf.mxu1  ;;  %v5201_v20 = vpop.f32.mrf.mxu0 }
 0x3d0   :  { %5444 = vst [vmem:[%s9968_s3 + $0x38] sm:$0xff] %v5210_v2  ;;  %v5202_v19 = vadd.f32 %v5201_v20, %v9449_v4 }
 0x3d1   :  { %v9692_v50 = vpop.f32.mrf.mxu1  ;;  %v6092_v22 = vpop.f32.mrf.mxu0 }
 0x3d2   :  { %5442 = vst [vmem:[%s9968_s3 + $0x28] sm:$0xff] %v5202_v19  ;;  %v5223_v32 = vadd.f32 %v6092_v22, %v9509_v24 }
 0x3d3   :  { %v5039_v57 = vpop.f32.mrf.mxu1  ;;  %v5214_v8 = vpop.f32.mrf.mxu0 }
 0x3d4   :  { %5447 = vst [vmem:[%s9968_s3 + $0x50] sm:$0xff] %v5223_v32  ;;  %v5215_v37 = vadd.f32 %v5214_v8, %v9485_v26 }
 0x3d5   :  { %v9702_v30 = vpop.f32.mrf.mxu1  ;;  %v6093_v4 = vpop.f32.mrf.mxu0 }
 0x3d6   :  { %5445 = vst [vmem:[%s9968_s3 + $0x40] sm:$0xff] %v5215_v37  ;;  %v5226_v62 = vadd.f32 %v6093_v4, %v9521_v34 }
 0x3d7   :  { %v5042_v43 = vpop.f32.mrf.mxu1  ;;  %v5217_v25 = vpop.f32.mrf.mxu0 }
 0x3d8   :  { %5448 = vst [vmem:[%s9968_s3 + $0x58] sm:$0xff] %v5226_v62  ;;  %v5218_v24 = vadd.f32 %v5217_v25, %v9497_v5 }
 0x3d9   :  { %v9712_v29 = vpop.f32.mrf.mxu1  ;;  %v6096_v26 = vpop.f32.mrf.mxu0 }
 0x3da   :  { %5446 = vst [vmem:[%s9968_s3 + $0x48] sm:$0xff] %v5218_v24  ;;  %v5239_v11 = vadd.f32 %v6096_v26, %v9551_v1 }
 0x3db   :  { %v5047_v33 = vpop.f32.mrf.mxu1  ;;  %v5230_v0 = vpop.f32.mrf.mxu0 }
 0x3dc   :  { %5451 = vst [vmem:[%s9968_s3 + $0x70] sm:$0xff] %v5239_v11  ;;  %v5231_v34 = vadd.f32 %v5230_v0, %v9533_v54 }
 0x3dd   :  { %v9722_v2 = vpop.f32.mrf.mxu1  ;;  %v6097_v5 = vpop.f32.mrf.mxu0 }
 0x3de   :  { %5449 = vst [vmem:[%s9968_s3 + $0x60] sm:$0xff] %v5231_v34  ;;  %v5242_v27 = vadd.f32 %v6097_v5, %v9557_v41 }
 0x3df   :  { %v5050_v20 = vpop.f32.mrf.mxu1  ;;  %v5233_v19 = vpop.f32.mrf.mxu0 }
 0x3e0   :  { %5452 = vst [vmem:[%s9968_s3 + $0x78] sm:$0xff] %v5242_v27  ;;  %v5234_v1 = vadd.f32 %v5233_v19, %v9545_v23 }
 0x3e1   :  { %v9732_v22 = vpop.f32.mrf.mxu1  ;;  %v6100_v54 = vpop.f32.mrf.mxu0 }
 0x3e2   :  { %5450 = vst [vmem:[%s9968_s3 + $0x68] sm:$0xff] %v5234_v1  ;;  %v5255_v32 = vadd.f32 %v6100_v54, %v9575_v60 }
 0x3e3   :  { %v5055_v57 = vpop.f32.mrf.mxu1  ;;  %v5246_v8 = vpop.f32.mrf.mxu0 }
 0x3e4   :  { %5455 = vst [vmem:[%s9968_s3 + $0x90] sm:$0xff] %v5255_v32  ;;  %v5247_v41 = vadd.f32 %v5246_v8, %v9563_v38 }
 0x3e5   :  { %v9742_v37 = vpop.f32.mrf.mxu1  ;;  %v6101_v23 = vpop.f32.mrf.mxu0 }
 0x3e6   :  { %5453 = vst [vmem:[%s9968_s3 + $0x80] sm:$0xff] %v5247_v41  ;;  %v5258_v4 = vadd.f32 %v6101_v23, %v9581_v12 }
 0x3e7   :  { %v5058_v62 = vpop.f32.mrf.mxu1  ;;  %v5249_v43 = vpop.f32.mrf.mxu0 }
 0x3e8   :  { %5456 = vst [vmem:[%s9968_s3 + $0x98] sm:$0xff] %v5258_v4  ;;  %v5250_v60 = vadd.f32 %v5249_v43, %v9569_v31  ;;  %v10103_v43 = vld [vmem:[#allocation12_spill] sm:$0xff] }
 0x3e9   :  { %v9752_v25 = vpop.f32.mrf.mxu1  ;;  %v6104_v38 = vpop.f32.mrf.mxu0 }
 0x3ea   :  { %5454 = vst [vmem:[%s9968_s3 + $0x88] sm:$0xff] %v5250_v60  ;;  %v5271_v24 = vadd.f32 %v6104_v38, %v9599_v61  ;;  %v5017_v60 = vadd.f32 %v9648_v21, %v10103_v43 }
 0x3eb   :  { %v5063_v26 = vpop.f32.mrf.mxu1  ;;  %v5262_v11 = vpop.f32.mrf.mxu0 }
 0x3ec   :  { %5459 = vst [vmem:[%s9968_s3 + $0xb0] sm:$0xff] %v5271_v24  ;;  %v5263_v12 = vadd.f32 %v5262_v11, %v9587_v55  ;;  %v5030_v11 = vadd.f32 %v9672_v56, %v9410_v13 }
 0x3ed   :  { %v9762_v33 = vpop.f32.mrf.mxu1  ;;  %v6105_v31 = vpop.f32.mrf.mxu0 }
 0x3ee   :  { %5457 = vst [vmem:[%s9968_s3 + $0xa0] sm:$0xff] %v5263_v12  ;;  %v5274_v0 = vadd.f32 %v6105_v31, %v9605_v15 }
 0x3ef   :  { %v5066_v34 = vpop.f32.mrf.mxu1  ;;  %v5265_v5 = vpop.f32.mrf.mxu0 }
 0x3f0   :  { %5460 = vst [vmem:[%s9968_s3 + $0xb8] sm:$0xff] %v5274_v0  ;;  %v5266_v61 = vadd.f32 %v5265_v5, %v9593_v7  ;;  %v5033_v5 = vadd.f32 %v9682_v16, %v9422_v45 }
 0x3f1   :  { %v9772_v27 = vpop.f32.mrf.mxu1  ;;  %v6108_v55 = vpop.f32.mrf.mxu0 }
 0x3f2   :  { %5458 = vst [vmem:[%s9968_s3 + $0xa8] sm:$0xff] %v5266_v61  ;;  %v5287_v20 = vadd.f32 %v6108_v55, %v9623_v18  ;;  %v5014_v18 = vadd.f32 %v9643_v14, %v9365_v49 }
 0x3f3   :  { %v5071_v19 = vpop.f32.mrf.mxu1  ;;  %v5278_v1 = vpop.f32.mrf.mxu0 }
 0x3f4   :  { %5463 = vst [vmem:[%s9968_s3 + $0xd0] sm:$0xff] %v5287_v20  ;;  %v5279_v15 = vadd.f32 %v5278_v1, %v9611_v36  ;;  %v5046_v19 = vadd.f32 %v9712_v29, %v9458_v51  ;;  %v5038_v1 = vadd.f32 %v9692_v50, %v9434_v35  ;;  %v5049_v51 = vadd.f32 %v9722_v2, %v9470_v10 }
 0x3f5   :  { %v9782_v54 = vpop.f32.mrf.mxu1  ;;  %v6109_v7 = vpop.f32.mrf.mxu0  ;;  %v5041_v35 = vadd.f32 %v9702_v30, %v9446_v47  ;;  %v5062_v10 = vadd.f32 %v9752_v25, %v9506_v52  ;;  %v5054_v47 = vadd.f32 %v9732_v22, %v9482_v28  ;;  %v5065_v52 = vadd.f32 %v9762_v33, %v9518_v40 }
 0x3f6   :  { %5461 = vst [vmem:[%s9968_s3 + $0xc0] sm:$0xff] %v5279_v15  ;;  %v5290_v32 = vadd.f32 %v6109_v7, %v9629_v59  ;;  %v5057_v28 = vadd.f32 %v9742_v37, %v9494_v3 }
 0x3f7   :  { %v5074_v57 = vpop.f32.mrf.mxu1  ;;  %v5281_v8 = vpop.f32.mrf.mxu0 }
 0x3f8   :  { %5464 = vst [vmem:[%s9968_s3 + $0xd8] sm:$0xff] %v5290_v32  ;;  %v5282_v36 = vadd.f32 %v5281_v8, %v9617_v46 }
 0x3f9   :  { %v9794_v41 = vpop.f32.mrf.mxu1  ;;  %v6112_v23 = vpop.f32.mrf.mxu0 }
 0x3fa   :  { %5462 = vst [vmem:[%s9968_s3 + $0xc8] sm:$0xff] %v5282_v36  ;;  %v5303_v4 = vadd.f32 %v6112_v23, %v5014_v18  ;;  %v5078_v40 = vadd.f32 %v9794_v41, %v9548_v58 }
 0x3fb   :  { %v5079_v59 = vpop.f32.mrf.mxu1  ;;  %v5294_v62 = vpop.f32.mrf.mxu0 }
 0x3fc   :  { %5467 = vst [vmem:[%s9968_s3 + $0xf0] sm:$0xff] %v5303_v4  ;;  %v5295_v49 = vadd.f32 %v5294_v62, %v9635_v42 }
 0x3fd   :  { %v9805_v46 = vpop.f32.mrf.mxu1  ;;  %v6113_v14 = vpop.f32.mrf.mxu0 }
 0x3fe   :  { %5465 = vst [vmem:[%s9968_s3 + $0xe0] sm:$0xff] %v5295_v49  ;;  %v5306_v38 = vadd.f32 %v6113_v14, %v5017_v60  ;;  %v5081_v58 = vadd.f32 %v9805_v46, %v9554_v63 }
 0x3ff   :  { %v5082_v24 = vpop.f32.mrf.mxu1  ;;  %v5297_v26 = vpop.f32.mrf.mxu0 }
 0x400   :  { %5468 = vst [vmem:[%s9968_s3 + $0xf8] sm:$0xff] %v5306_v38  ;;  %v5298_v21 = vadd.f32 %v5297_v26, %v9641_v9  ;;  %v10104_v24 = vld [vmem:[#allocation4_spill] sm:$0xff] }
 0x401   :  { %v9816_v42 = vpop.f32.mrf.mxu1  ;;  %v6116_v12 = vpop.f32.mrf.mxu0  ;;  %v5070_v3 = vadd.f32 %v9772_v27, %v10104_v24  ;;  %v5073_v27 = vadd.f32 %v9782_v54, %v9542_v6 }
 0x402   :  { %5466 = vst [vmem:[%s9968_s3 + $0xe8] sm:$0xff] %v5298_v21  ;;  %v5319_v31 = vadd.f32 %v6116_v12, %v5030_v11 }
 0x403   :  { %v5087_v0 = vpop.f32.mrf.mxu1  ;;  %v5310_v34 = vpop.f32.mrf.mxu0 }
 0x404   :  { %5471 = vst [vmem:[%s9968_s3 + $0x110] sm:$0xff] %v5319_v31  ;;  %v5311_v13 = vadd.f32 %v5310_v34, %v9654_v44 }
 0x405   :  { %v9827_v9 = vpop.f32.mrf.mxu1  ;;  %v6117_v56 = vpop.f32.mrf.mxu0 }
 0x406   :  { %5469 = vst [vmem:[%s9968_s3 + $0x100] sm:$0xff] %v5311_v13  ;;  %v5322_v61 = vadd.f32 %v6117_v56, %v5033_v5  ;;  %v10105_v5 = vld [vmem:[#allocation14_spill] sm:$0xff] }
 0x407   :  { %v5090_v55 = vpop.f32.mrf.mxu1  ;;  %v5313_v20 = vpop.f32.mrf.mxu0 }
 0x408   :  { %5472 = vst [vmem:[%s9968_s3 + $0x118] sm:$0xff] %v5322_v61  ;;  %v5314_v45 = vadd.f32 %v5313_v20, %v9665_v17  ;;  %v10106_v61 = vld [vmem:[#allocation13_spill] sm:$0xff] }
 0x409   :  { %v5093_v44 = vpop.f32.mrf.mxu1  ;;  %v6120_v16 = vpop.f32.mrf.mxu0  ;;  %v5086_v55 = vadd.f32 %v9816_v42, %v10106_v61 }
 0x40a   :  { %5470 = vst [vmem:[%s9968_s3 + $0x108] sm:$0xff] %v5314_v45  ;;  %v5335_v15 = vadd.f32 %v6120_v16, %v5046_v19  ;;  %v5094_v13 = vadd.f32 %v5093_v44, %v10105_v5  ;;  %v10107_v19 = vld [vmem:[#allocation20_spill] sm:$0xff] }
 0x40b   :  { %v5095_v7 = vpop.f32.mrf.mxu1  ;;  %v5326_v32 = vpop.f32.mrf.mxu0 }
 0x40c   :  { %5475 = vst [vmem:[%s9968_s3 + $0x130] sm:$0xff] %v5335_v15  ;;  %v5327_v17 = vadd.f32 %v5326_v32, %v5038_v1  ;;  %v10108_v15 = vld [vmem:[#allocation5_spill] sm:$0xff] }
 0x40d   :  { %v5096_v29 = vpop.f32.mrf.mxu1  ;;  %v6121_v57 = vpop.f32.mrf.mxu0  ;;  %v5089_v7 = vadd.f32 %v9827_v9, %v10108_v15 }
 0x40e   :  { %5473 = vst [vmem:[%s9968_s3 + $0x120] sm:$0xff] %v5327_v17  ;;  %v5338_v50 = vadd.f32 %v6121_v57, %v5049_v51  ;;  %v5097_v45 = vadd.f32 %v5096_v29, %v10107_v19  ;;  %v10109_v17 = vld [vmem:[#allocation15_spill] sm:$0xff]  ;;  %v10117_v19 = vld [vmem:[#allocation18_spill] sm:$0xff] }
 0x40f   :  { %v5098_v8 = vpop.f32.mrf.mxu1  ;;  %v5329_v18 = vpop.f32.mrf.mxu0 }
 0x410   :  { %5476 = vst [vmem:[%s9968_s3 + $0x138] sm:$0xff] %v5338_v50  ;;  %v5330_v2 = vadd.f32 %v5329_v18, %v5041_v35  ;;  %v10110_v8 = vld [vmem:[#allocation21_spill] sm:$0xff] }
 0x411   :  { %v5101_v36 = vpop.f32.mrf.mxu1  ;;  %v6124_v23 = vpop.f32.mrf.mxu0 }
 0x412   :  { %5474 = vst [vmem:[%s9968_s3 + $0x128] sm:$0xff] %v5330_v2  ;;  %v5351_v30 = vadd.f32 %v6124_v23, %v5062_v10  ;;  %v5102_v18 = vadd.f32 %v5101_v36, %v10110_v8  ;;  %v10111_v23 = vld [vmem:[#allocation7_spill] sm:$0xff] }
 0x413   :  { %v5103_v4 = vpop.f32.mrf.mxu1  ;;  %v5342_v59 = vpop.f32.mrf.mxu0 }
 0x414   :  { %5479 = vst [vmem:[%s9968_s3 + $0x150] sm:$0xff] %v5351_v30  ;;  %v5343_v25 = vadd.f32 %v5342_v59, %v5054_v47 }
 0x415   :  { %v5104_v62 = vpop.f32.mrf.mxu1  ;;  %v6125_v43 = vpop.f32.mrf.mxu0 }
 0x416   :  { %5477 = vst [vmem:[%s9968_s3 + $0x140] sm:$0xff] %v5343_v25  ;;  %v5354_v22 = vadd.f32 %v6125_v43, %v5065_v52  ;;  %v10112_v52 = vld [vmem:[#allocation6_spill] sm:$0xff] }
 0x417   :  { %v5106_v60 = vpop.f32.mrf.mxu1  ;;  %v5345_v49 = vpop.f32.mrf.mxu0  ;;  %v5105_v25 = vadd.f32 %v5104_v62, %v10112_v52 }
 0x418   :  { %5480 = vst [vmem:[%s9968_s3 + $0x158] sm:$0xff] %v5354_v22  ;;  %v5346_v33 = vadd.f32 %v5345_v49, %v5057_v28  ;;  %v10113_v22 = vld [vmem:[#allocation9_spill] sm:$0xff] }
 0x419   :  { %v5109_v14 = vpop.f32.mrf.mxu1  ;;  %v6128_v38 = vpop.f32.mrf.mxu0 }
 0x41a   :  { %5478 = vst [vmem:[%s9968_s3 + $0x148] sm:$0xff] %v5346_v33  ;;  %v5367_v37 = vadd.f32 %v6128_v38, %v5078_v40  ;;  %v5110_v57 = vadd.f32 %v5109_v14, %v10109_v17  ;;  %v10114_v14 = vld [vmem:[#allocation16_spill] sm:$0xff] }
 0x41b   :  { %v5111_v26 = vpop.f32.mrf.mxu1  ;;  %v5358_v11 = vpop.f32.mrf.mxu0 }
 0x41c   :  { %5483 = vst [vmem:[%s9968_s3 + $0x170] sm:$0xff] %v5367_v37  ;;  %v5359_v41 = vadd.f32 %v5358_v11, %v5070_v3  ;;  %v10115_v37 = vld [vmem:[#allocation17_spill] sm:$0xff] }
 0x41d   :  { %v5112_v21 = vpop.f32.mrf.mxu1  ;;  %v6129_v12 = vpop.f32.mrf.mxu0 }
 0x41e   :  { %5481 = vst [vmem:[%s9968_s3 + $0x160] sm:$0xff] %v5359_v41  ;;  %v5370_v31 = vadd.f32 %v6129_v12, %v5081_v58  ;;  %v5113_v47 = vadd.f32 %v5112_v21, %v10111_v23  ;;  %v10116_v21 = vld [vmem:[#allocation8_spill] sm:$0xff] }
 0x41f   :  { %v5114_v0 = vpop.f32.mrf.mxu1  ;;  %v5361_v34 = vpop.f32.mrf.mxu0 }
 0x420   :  { %5484 = vst [vmem:[%s9968_s3 + $0x178] sm:$0xff] %v5370_v31  ;;  %v5362_v63 = vadd.f32 %v5361_v34, %v5073_v27 }
 0x421   :  { %v5117_v46 = vpop.f32.mrf.mxu1  ;;  %v6132_v56 = vpop.f32.mrf.mxu0 }
 0x422   :  { %5482 = vst [vmem:[%s9968_s3 + $0x168] sm:$0xff] %v5362_v63  ;;  %v5383_v6 = vadd.f32 %v6132_v56, %v5094_v13  ;;  %v5118_v38 = vadd.f32 %v5117_v46, %v10114_v14 }
 0x423   :  { %v5119_v54 = vpop.f32.mrf.mxu1  ;;  %v5374_v20 = vpop.f32.mrf.mxu0 }
 0x424   :  { %5487 = vst [vmem:[%s9968_s3 + $0x190] sm:$0xff] %v5383_v6  ;;  %v5375_v44 = vadd.f32 %v5374_v20, %v5086_v55 }
 0x425   :  { %v5120_v16 = vpop.f32.mrf.mxu1  ;;  %v6133_v1 = vpop.f32.mrf.mxu0 }
 0x426   :  { %5485 = vst [vmem:[%s9968_s3 + $0x180] sm:$0xff] %v5375_v44  ;;  %v5386_v42 = vadd.f32 %v6133_v1, %v5097_v45  ;;  %v5121_v12 = vadd.f32 %v5120_v16, %v10116_v21 }
 0x427   :  { %v5122_v32 = vpop.f32.mrf.mxu1  ;;  %v5377_v51 = vpop.f32.mrf.mxu0 }
 0x428   :  { %5488 = vst [vmem:[%s9968_s3 + $0x198] sm:$0xff] %v5386_v42  ;;  %v5378_v29 = vadd.f32 %v5377_v51, %v5089_v7 }
 0x429   :  { %v5125_v35 = vpop.f32.mrf.mxu1  ;;  %v6136_v50 = vpop.f32.mrf.mxu0 }
 0x42a   :  { %5486 = vst [vmem:[%s9968_s3 + $0x188] sm:$0xff] %v5378_v29  ;;  %v5399_v9 = vadd.f32 %v6136_v50, %v5110_v57  ;;  %v5126_v60 = vadd.f32 %v5125_v35, %v10113_v22 }
 0x42b   :  { %v5127_v10 = vpop.f32.mrf.mxu1  ;;  %v5390_v2 = vpop.f32.mrf.mxu0 }
 0x42c   :  { %5491 = vst [vmem:[%s9968_s3 + $0x1b0] sm:$0xff] %v5399_v9  ;;  %v5391_v30 = vadd.f32 %v5390_v2, %v5102_v18 }
 0x42d   :  { %v5128_v4 = vpop.f32.mrf.mxu1  ;;  %v6137_v59 = vpop.f32.mrf.mxu0 }
 0x42e   :  { %5489 = vst [vmem:[%s9968_s3 + $0x1a0] sm:$0xff] %v5391_v30  ;;  %v5402_v36 = vadd.f32 %v6137_v59, %v5113_v47  ;;  %v5129_v26 = vadd.f32 %v5128_v4, %v10115_v37 }
 0x42f   :  { %v5130_v43 = vpop.f32.mrf.mxu1  ;;  %v5393_v28 = vpop.f32.mrf.mxu0 }
 0x430   :  { %5492 = vst [vmem:[%s9968_s3 + $0x1b8] sm:$0xff] %v5402_v36  ;;  %v5394_v49 = vadd.f32 %v5393_v28, %v5105_v25 }
 0x431   :  { %v5133_v40 = vpop.f32.mrf.mxu1  ;;  %v6140_v33 = vpop.f32.mrf.mxu0 }
 0x432   :  { %5490 = vst [vmem:[%s9968_s3 + $0x1a8] sm:$0xff] %v5394_v49  ;;  %v5415_v62 = vadd.f32 %v6140_v33, %v5126_v60  ;;  %v5134_v63 = vadd.f32 %v5133_v40, %v9632_v48 }
 0x433   :  { %v5135_v24 = vpop.f32.mrf.mxu1  ;;  %v5406_v3 = vpop.f32.mrf.mxu0 }
 0x434   :  { %5495 = vst [vmem:[%s9968_s3 + $0x1d0] sm:$0xff] %v5415_v62  ;;  %v5407_v11 = vadd.f32 %v5406_v3, %v5118_v38 }
 0x435   :  { %v5136_v58 = vpop.f32.mrf.mxu1  ;;  %v6141_v41 = vpop.f32.mrf.mxu0 }
 0x436   :  { %5493 = vst [vmem:[%s9968_s3 + $0x1c0] sm:$0xff] %v5407_v11  ;;  %v5418_v27 = vadd.f32 %v6141_v41, %v5129_v26  ;;  %v5137_v45 = vadd.f32 %v5136_v58, %v10117_v19 }
 0x437   :  { %v5138_v31 = vpop.f32.mrf.mxu1  ;;  %v5409_v0 = vpop.f32.mrf.mxu0 }
 0x438   :  { %5496 = vst [vmem:[%s9968_s3 + $0x1d8] sm:$0xff] %v5418_v27  ;;  %v5410_v34 = vadd.f32 %v5409_v0, %v5121_v12 }
 0x439   :  { %v5141_v5 = vpop.f32.mrf.mxu1  ;;  %v6144_v13 = vpop.f32.mrf.mxu0 }
 0x43a   :  { %5494 = vst [vmem:[%s9968_s3 + $0x1c8] sm:$0xff] %v5410_v34  ;;  %v5142_v46 = vadd.f32 %v5141_v5, %v9646_v53 }
 0x43b   :  { %v5143_v56 = vpop.f32.mrf.mxu1  ;;  %v5422_v61 = vpop.f32.mrf.mxu0 }
 0x43c   :  { %v5431_v55 = vadd.f32 %v6144_v13, %v5142_v46  ;;  %v5423_v6 = vadd.f32 %v5422_v61, %v5134_v63 }
 0x43d   :  { %v5144_v54 = vpop.f32.mrf.mxu1  ;;  %v6145_v20 = vpop.f32.mrf.mxu0 }
 0x43e   :  { %5499 = vst [vmem:[%s9968_s3 + $0x1f0] sm:$0xff] %v5431_v55  ;;  %5497 = vst [vmem:[%s9968_s3 + $0x1e0] sm:$0xff] %v5423_v6  ;;  %v5145_v48 = vadd.f32 %v5144_v54, %v9651_v39 }
 0x43f   :  { %v5146_v44 = vpop.f32.mrf.mxu1  ;;  %v5425_v53 = vpop.f32.mrf.mxu0 }
 0x440   :  { %v5434_v16 = vadd.f32 %v6145_v20, %v5145_v48  ;;  %v5426_v1 = vadd.f32 %v5425_v53, %v5137_v45 }
 0x442   :  { %5500 = vst [vmem:[%s9968_s3 + $0x1f8] sm:$0xff] %v5434_v16  ;;  %5498 = vst [vmem:[%s9968_s3 + $0x1e8] sm:$0xff] %v5426_v1 }

</bundles_post_ra>
